<compile_context>
chip_gen: v7x
topology: tpu7x:2x2x1
jax: 0.10.0
libtpu: 0.0.40
codegen_flags: <defaults>
</compile_context>

<pallas_src>
import functools

import jax
import jax.numpy as jnp
import numpy as np
from jax import lax
from jax.experimental import pallas as pl
from jax.experimental.pallas import tpu as pltpu

KSZ = 4                       # conv kernel size
_VMEM_LIMIT = 32 * 1024 * 1024
_VMEM_BUDGET = 24 * 1024 * 1024


def _round_up(v, m):
    return (v + m - 1) // m * m


def _clamp_tiles(tm, tk, npad, out_itemsize, budget=_VMEM_BUDGET):
    """Shrink (tm, tk) so the double-buffered working set fits the VMEM budget."""
    def step_bytes(tm_, tk_):
        return (2 * tm_ * tk_ * 2          # lhs (bf16, double buffered)
                + 2 * tk_ * npad * 2       # rhs
                + 2 * tm_ * npad * out_itemsize
                + tm_ * npad * 4)          # f32 accumulator
    while step_bytes(tm, tk) > budget and tm > 256:
        tm = _round_up(tm // 2, 8)
    while step_bytes(tm, tk) > budget and tk > 512:
        tk = _round_up(tk // 2, 128)
    return tm, tk


# ----------------------------------------------------------------------------
# Pallas kernels: matmul (single-K fast path + K-tiled accumulator path)
# with fused epilogue activation.
# ----------------------------------------------------------------------------
def _mm_kernel_single(a_ref, b_ref, o_ref, *, act):
    r = jnp.dot(a_ref[...], b_ref[...], preferred_element_type=jnp.float32)
    if act == "relu":
        r = jnp.maximum(r, 0.0)
    o_ref[...] = r.astype(o_ref.dtype)


def _mm_kernel_acc(a_ref, b_ref, o_ref, acc_ref, *, act):
    @pl.when(pl.program_id(1) == 0)
    def _init():
        acc_ref[...] = jnp.zeros_like(acc_ref)

    acc_ref[...] += jnp.dot(a_ref[...], b_ref[...],
                            preferred_element_type=jnp.float32)

    @pl.when(pl.program_id(1) == pl.num_programs(1) - 1)
    def _store():
        r = acc_ref[...]
        if act == "relu":
            r = jnp.maximum(r, 0.0)
        o_ref[...] = r.astype(o_ref.dtype)


def fused_matmul(a, b, *, act="none", out_dtype=jnp.float32,
                 tm=1024, tk_max=2048):
    """(M, K) @ (K, N) on the MXU.  bf16 operands, f32 accumulation.

    M is padded to the tile, N is padded to a multiple of 128 (lane-dense
    stores).  Returns the padded (mp, npad) array; the caller slices.
    """
    M, K = a.shape
    K2, N = b.shape
    assert K == K2
    a = a.astype(jnp.bfloat16)
    b = b.astype(jnp.bfloat16)

    npad = _round_up(N, 128)
    tm = min(tm, _round_up(M, 8))
    tk = min(tk_max, _round_up(K, 128))
    tm, tk = _clamp_tiles(tm, tk, npad, jnp.dtype(out_dtype).itemsize)

    mp, kp = _round_up(M, tm), _round_up(K, tk)
    a = jnp.pad(a, ((0, mp - M), (0, kp - K)))
    b = jnp.pad(b, ((0, kp - K), (0, npad - N)))
    kt = kp // tk

    if kt == 1:                               # no K reduction -> no accumulator
        return pl.pallas_call(
            functools.partial(_mm_kernel_single, act=act),
            out_shape=jax.ShapeDtypeStruct((mp, npad), out_dtype),
            grid=(mp // tm,),
            in_specs=[pl.BlockSpec((tm, kp), lambda mi: (mi, 0)),
                      pl.BlockSpec((kp, npad), lambda mi: (0, 0))],
            out_specs=pl.BlockSpec((tm, npad), lambda mi: (mi, 0)),
            compiler_params=pltpu.CompilerParams(
                dimension_semantics=("parallel",),
                vmem_limit_bytes=_VMEM_LIMIT),
        )(a, b)

    return pl.pallas_call(
        functools.partial(_mm_kernel_acc, act=act),
        out_shape=jax.ShapeDtypeStruct((mp, npad), out_dtype),
        grid=(mp // tm, kt),
        in_specs=[pl.BlockSpec((tm, tk), lambda mi, ki: (mi, ki)),
                  pl.BlockSpec((tk, npad), lambda mi, ki: (ki, 0))],
        out_specs=pl.BlockSpec((tm, npad), lambda mi, ki: (mi, 0)),
        scratch_shapes=[pltpu.VMEM((tm, npad), jnp.float32)],
        compiler_params=pltpu.CompilerParams(
            dimension_semantics=("parallel", "arbitrary"),
            vmem_limit_bytes=_VMEM_LIMIT),
    )(a, b)


# ----------------------------------------------------------------------------
# Pallas kernels: up-conv matmul with fused BatchNorm statistics
# (per packed-lane sum / sum-of-squares accumulated into a resident (2, npad)
#  output block; stats are computed from the f32 accumulator before the bf16
#  store, so no extra pass over t is needed).
# ----------------------------------------------------------------------------
def _up_mm_stats_kernel_single(a_ref, b_ref, o_ref, s_ref):
    t = jnp.dot(a_ref[...], b_ref[...], preferred_element_type=jnp.float32)
    o_ref[...] = t.astype(o_ref.dtype)

    @pl.when(pl.program_id(0) == 0)
    def _init():
        s_ref[...] = jnp.zeros_like(s_ref)

    s_ref[...] += jnp.concatenate(
        [jnp.sum(t, axis=0, keepdims=True),
         jnp.sum(t * t, axis=0, keepdims=True)], axis=0)


def _up_mm_stats_kernel(a_ref, b_ref, o_ref, s_ref, acc_ref):
    mi, ki = pl.program_id(0), pl.program_id(1)

    @pl.when(ki == 0)
    def _init_acc():
        acc_ref[...] = jnp.zeros_like(acc_ref)

    acc_ref[...] += jnp.dot(a_ref[...], b_ref[...],
                            preferred_element_type=jnp.float32)

    @pl.when((mi == 0) & (ki == 0))
    def _init_stats():
        s_ref[...] = jnp.zeros_like(s_ref)

    @pl.when(ki == pl.num_programs(1) - 1)
    def _store():
        t = acc_ref[...]
        o_ref[...] = t.astype(o_ref.dtype)
        s_ref[...] += jnp.concatenate(
            [jnp.sum(t, axis=0, keepdims=True),
             jnp.sum(t * t, axis=0, keepdims=True)], axis=0)


def up_matmul_bn_stats(a, b, *, out_dtype=jnp.bfloat16, tm=1024, tk_max=2048):
    """(M, K) @ (K, N) plus per-column (sum, sumsq) over rows, in one kernel."""
    M, K = a.shape
    K2, N = b.shape
    assert K == K2
    a = a.astype(jnp.bfloat16)
    b = b.astype(jnp.bfloat16)

    npad = _round_up(N, 128)
    tm = min(tm, _round_up(M, 8))
    tk = min(tk_max, _round_up(K, 128))
    tm, tk = _clamp_tiles(tm, tk, npad, jnp.dtype(out_dtype).itemsize)

    mp, kp = _round_up(M, tm), _round_up(K, tk)
    a = jnp.pad(a, ((0, mp - M), (0, kp - K)))
    b = jnp.pad(b, ((0, kp - K), (0, npad - N)))
    kt = kp // tk

    out_shapes = (jax.ShapeDtypeStruct((mp, npad), out_dtype),
                  jax.ShapeDtypeStruct((2, npad), jnp.float32))

    if kt == 1:
        t, stats = pl.pallas_call(
            _up_mm_stats_kernel_single,
            out_shape=out_shapes,
            grid=(mp // tm,),
            in_specs=[pl.BlockSpec((tm, kp), lambda mi: (mi, 0)),
                      pl.BlockSpec((kp, npad), lambda mi: (0, 0))],
            out_specs=(pl.BlockSpec((tm, npad), lambda mi: (mi, 0)),
                       pl.BlockSpec((2, npad), lambda mi: (0, 0))),
            compiler_params=pltpu.CompilerParams(
                # stats output is resident across M -> axis must stay arbitrary
                dimension_semantics=("arbitrary",),
                vmem_limit_bytes=_VMEM_LIMIT),
        )(a, b)
    else:
        t, stats = pl.pallas_call(
            _up_mm_stats_kernel,
            out_shape=out_shapes,
            grid=(mp // tm, kt),
            in_specs=[pl.BlockSpec((tm, tk), lambda mi, ki: (mi, ki)),
                      pl.BlockSpec((tk, npad), lambda mi, ki: (ki, 0))],
            out_specs=(pl.BlockSpec((tm, npad), lambda mi, ki: (mi, 0)),
                       pl.BlockSpec((2, npad), lambda mi, ki: (0, 0))),
            scratch_shapes=[pltpu.VMEM((tm, npad), jnp.float32)],
            compiler_params=pltpu.CompilerParams(
                dimension_semantics=("arbitrary", "arbitrary"),
                vmem_limit_bytes=_VMEM_LIMIT),
        )(a, b)
    return t, stats


# ----------------------------------------------------------------------------
# Pallas kernel: BatchNorm apply (y = x * scale + shift), row-tiled
# ----------------------------------------------------------------------------
def _bn_apply_kernel(x_ref, sc_ref, sh_ref, o_ref):
    o_ref[...] = x_ref[...].astype(jnp.float32) * sc_ref[...] + sh_ref[...]


def bn_apply(x2d, scale, shift, tr=2048):
    R, C = x2d.shape
    tr = min(tr, _round_up(R, 8))
    rp = _round_up(R, tr)
    xp = jnp.pad(x2d, ((0, rp - R), (0, 0)))
    out = pl.pallas_call(
        _bn_apply_kernel,
        out_shape=jax.ShapeDtypeStruct((rp, C), jnp.float32),
        grid=(rp // tr,),
        in_specs=[
            pl.BlockSpec((tr, C), lambda i: (i, 0)),
            pl.BlockSpec((1, C), lambda i: (0, 0)),
            pl.BlockSpec((1, C), lambda i: (0, 0)),
        ],
        out_specs=pl.BlockSpec((tr, C), lambda i: (i, 0)),
        compiler_params=pltpu.CompilerParams(
            dimension_semantics=("parallel",),
            vmem_limit_bytes=_VMEM_LIMIT),
    )(xp, scale.reshape(1, C), shift.reshape(1, C))
    return out[:R]


# ----------------------------------------------------------------------------
# XLA glue: im2col / weight re-layout helpers (layout only, no compute)
# TODO(synk): replace with in-kernel halo loads (pl.ANY + make_async_copy) to
#             avoid materializing the expanded patches in HBM.
# ----------------------------------------------------------------------------
def _im2col_s2(x_pad, so):
    """Conv3d k=4 s=2 im2col.  x_pad: (N, 2so+2, ..., C) -> (N*so^3, 64*C),
    taps ordered (kd, kh, kw, c)."""
    n, _, _, _, c = x_pad.shape
    taps = []
    for kd in range(KSZ):
        for kh in range(KSZ):
            for kw in range(KSZ):
                taps.append(x_pad[:, kd:kd + 2 * so:2,
                                     kh:kh + 2 * so:2,
                                     kw:kw + 2 * so:2, :])
    pat = jnp.stack(taps, axis=-2)                 # (N, so, so, so, 64, C)
    return pat.reshape(n * so ** 3, KSZ ** 3 * c)


def _im2col_27(d, so):
    """27-tap im2col of the (zero-padded) down-conv output for the single-matmul
    sub-pixel decomposition of ConvTranspose3d(k=4, s=2, p=1).
    d: (N, so, so, so, C) -> (N*so^3, 27*C), taps ordered (td, th, tw, c)."""
    n, _, _, _, c = d.shape
    dp = jnp.pad(d, ((0, 0), (1, 1), (1, 1), (1, 1), (0, 0)))
    taps = []
    for td in range(3):
        for th in range(3):
            for tw in range(3):
                taps.append(dp[:, td:td + so, th:th + so, tw:tw + so, :])
    pat = jnp.stack(taps, axis=-2)                 # (N, so, so, so, 27, C)
    return pat.reshape(n * so ** 3, 27 * c)


def _subpixel_weight_27(w_up):
    """PyTorch ConvTranspose3d weight (inner, outer, 4,4,4) -> (27*inner, 8*outer).
    Row = (tap td,th,tw, in-channel); column = (phase rd,rh,rw, out-channel).
    Output o = 2*j + r receives input dp[j + t] (i = j + t - 1) with kernel index
    k = 3 + r - 2*t per spatial dim, valid iff t - r in {0, 1}; else 0."""
    inner_nc, outer_nc = w_up.shape[0], w_up.shape[1]
    zeros = jnp.zeros((inner_nc, outer_nc), w_up.dtype)
    blocks = []
    for td in range(3):
        for th in range(3):
            for tw in range(3):
                cols = []
                for rd in range(2):
                    for rh in range(2):
                        for rw in range(2):
                            ok = (0 <= td - rd <= 1 and
                                  0 <= th - rh <= 1 and
                                  0 <= tw - rw <= 1)
                            if ok:
                                cols.append(w_up[:, :, 3 + rd - 2 * td,
                                                       3 + rh - 2 * th,
                                                       3 + rw - 2 * tw])
                            else:
                                cols.append(zeros)
                blocks.append(jnp.stack(cols, axis=1))   # (inner, 8, outer)
    w = jnp.stack(blocks, axis=0)                        # (27, inner, 8, outer)
    return w.reshape(27 * inner_nc, 8 * outer_nc)


# ----------------------------------------------------------------------------
# Forward pass of the innermost UnetSkipConnectionBlock
# ----------------------------------------------------------------------------
def unet_innermost_forward(x_ncdhw, params):
    w_down = params["w_down"]   # (inner_nc, input_nc, 4, 4, 4)  PyTorch Conv3d
    w_up = params["w_up"]       # (inner_nc, outer_nc, 4, 4, 4)  PyTorch ConvTranspose3d
    gamma, beta = params["gamma"], params["beta"]

    n, cin, dsp, hsp, wsp = x_ncdhw.shape
    inner_nc = w_down.shape[0]
    outer_nc = w_up.shape[1]
    so = dsp // 2
    m1 = n * so ** 3

    x = jnp.transpose(x_ncdhw, (0, 2, 3, 4, 1))             # NDHWC

    # --- down path: LeakyReLU(0.2) once, cast to bf16 at the source (halves the
    #     im2col HBM traffic), bf16 MXU matmul with fused ReLU epilogue.
    h = jnp.where(x > 0, x, 0.2 * x).astype(jnp.bfloat16)
    h_pad = jnp.pad(h, ((0, 0), (1, 1), (1, 1), (1, 1), (0, 0)))
    a_down = _im2col_s2(h_pad, so)                           # (M1, 64*cin) bf16
    w_down_mat = jnp.transpose(w_down, (2, 3, 4, 1, 0)).reshape(KSZ ** 3 * cin, inner_nc)
    d = fused_matmul(a_down, w_down_mat, act="relu", out_dtype=jnp.bfloat16)
    d = d[:m1, :inner_nc].reshape(n, so, so, so, inner_nc)   # bf16

    # --- up path: single matmul with the 8 output phases packed into lanes
    #     (N = 8*outer_nc) and BN sum / sumsq fused into the epilogue.
    a_up = _im2col_27(d, so)                                 # (M1, 27*inner_nc)
    w_up_mat = _subpixel_weight_27(w_up)                     # (27*inner_nc, 8*outer_nc)
    t, stats = up_matmul_bn_stats(a_up, w_up_mat, out_dtype=jnp.bfloat16)
    npad = t.shape[-1]
    ncols = 8 * outer_nc

    # --- BatchNorm3d (training-mode batch stats, eps=1e-5).  Stats are per packed
    #     (phase, channel) lane; reduce the 8 phases per channel here (tiny).
    #     NOTE: variance via E[x^2]-E[x]^2 in f32 — fine at the bf16 tolerance.
    cnt = jnp.float32(8 * m1)
    sum_c = stats[0, :ncols].reshape(8, outer_nc).sum(axis=0)
    ssq_c = stats[1, :ncols].reshape(8, outer_nc).sum(axis=0)
    mean = sum_c / cnt
    var = ssq_c / cnt - mean * mean                          # biased variance
    scale_c = gamma * lax.rsqrt(var + 1e-5)
    shift_c = beta - mean * scale_c
    scale = jnp.pad(jnp.tile(scale_c, 8), (0, npad - ncols))
    shift = jnp.pad(jnp.tile(shift_c, 8), (0, npad - ncols))
    y2d = bn_apply(t, scale, shift)                          # (mp, npad) f32

    # --- phase scatter (pixel shuffle) + skip connection cat([x, y], dim=1)
    y = y2d[:m1, :ncols].reshape(n, so, so, so, 2, 2, 2, outer_nc)
    y = jnp.transpose(y, (0, 1, 4, 2, 5, 3, 6, 7)).reshape(
        n, 2 * so, 2 * so, 2 * so, outer_nc)
    out = jnp.concatenate([x, y], axis=-1)
    return jnp.transpose(out, (0, 4, 1, 2, 3))               # back to NCDHW


# ----------------------------------------------------------------------------
# Pure-JAX reference (XLA convs) for a correctness sanity check
# ----------------------------------------------------------------------------
def reference_forward(x, params):
    lk = jnp.where(x > 0, x, 0.2 * x)
    d = lax.conv_general_dilated(
        lk, params["w_down"], (2, 2, 2), [(1, 1)] * 3,
        dimension_numbers=("NCDHW", "OIDHW", "NCDHW"))
    r = jnp.maximum(d, 0.0)
    w_up_oi = jnp.transpose(jnp.flip(params["w_up"], axis=(2, 3, 4)), (1, 0, 2, 3, 4))
    t = lax.conv_general_dilated(
        r, w_up_oi, (1, 1, 1), [(2, 2)] * 3, lhs_dilation=(2, 2, 2),
        dimension_numbers=("NCDHW", "OIDHW", "NCDHW"))
    mean = jnp.mean(t, axis=(0, 2, 3, 4), keepdims=True)
    var = jnp.mean((t - mean) ** 2, axis=(0, 2, 3, 4), keepdims=True)
    g = params["gamma"].reshape(1, -1, 1, 1, 1)
    b = params["beta"].reshape(1, -1, 1, 1, 1)
    y = (t - mean) * lax.rsqrt(var + 1e-5) * g + b
    return jnp.concatenate([x, y], axis=1)


# ----------------------------------------------------------------------------
if __name__ == "__main__":
    N, input_nc, outer_nc, inner_nc = 2, 4, 4, 8
    D = H = W = 16

    key = jax.random.PRNGKey(0)
    k1, k2, k3, k4, kx = jax.random.split(key, 5)
    params = {
        "w_down": 0.1 * jax.random.normal(k1, (inner_nc, input_nc, KSZ, KSZ, KSZ), jnp.float32),
        "w_up":   0.1 * jax.random.normal(k2, (inner_nc, outer_nc, KSZ, KSZ, KSZ), jnp.float32),
        "gamma":  1.0 + 0.1 * jax.random.normal(k3, (outer_nc,), jnp.float32),
        "beta":   0.1 * jax.random.normal(k4, (outer_nc,), jnp.float32),
    }
    x = jax.random.normal(kx, (N, input_nc, D, H, W), jnp.float32)

    out = jax.jit(unet_innermost_forward)(x, params)
    out = jax.block_until_ready(out)
    assert out.shape == (N, input_nc + outer_nc, D, H, W), out.shape

    ref = jax.block_until_ready(jax.jit(reference_forward)(x, params))
    # bf16 matmul operands / bf16 t storage -> loose tolerance for the bf16 path
    np.testing.assert_allclose(np.asarray(out), np.asarray(ref), rtol=5e-2, atol=5e-2)

    print("KERNEL_OK")
</pallas_src>

<mosaic_0001>
module attributes {stable_mosaic.version = 11 : i64} {
  func.func @_mm_kernel_single(%arg0: i32, %arg1: memref<1024x256xbf16, #tpu.memory_space<vmem>>, %arg2: memref<256x128xbf16, #tpu.memory_space<vmem>>, %arg3: memref<1024x128xbf16, #tpu.memory_space<vmem>>) attributes {dimension_semantics = [#tpu.dimension_semantics<parallel>], iteration_bounds = array<i64: 1>, scalar_prefetch = 0 : i64, scratch_operands = 0 : i64, tpu.core_type = #tpu.core_type<tc>, window_params = [{transform_indices = @transform_0, window_bounds = array<i64: 1024, 256>}, {pipeline_mode = #tpu.pipeline_mode<synchronous>, transform_indices = @transform_1, window_bounds = array<i64: 256, 128>}, {transform_indices = @transform_2, window_bounds = array<i64: 1024, 128>}]} {
    %c0 = arith.constant 0 : index
    %c0_0 = arith.constant 0 : index
    %0 = vector.load %arg1[%c0, %c0_0] : memref<1024x256xbf16, #tpu.memory_space<vmem>>, vector<1024x256xbf16>
    %c0_1 = arith.constant 0 : index
    %c0_2 = arith.constant 0 : index
    %1 = vector.load %arg2[%c0_1, %c0_2] : memref<256x128xbf16, #tpu.memory_space<vmem>>, vector<256x128xbf16>
    %cst = arith.constant dense<0.000000e+00> : vector<1024x128xf32>
    %2 = tpu.matmul %0, %1, %cst {dimension_numbers = #tpu.dot_dimension_numbers<[1], [0], [0], [1], [0, 0, 1, 1], [], []>} : vector<1024x256xbf16>, vector<256x128xbf16>, vector<1024x128xf32> -> vector<1024x128xf32>
    %cst_3 = arith.constant 0.000000e+00 : f32
    %3 = vector.broadcast %cst_3 : f32 to vector<1024x128xf32>
    %4 = arith.maximumf %2, %3 : vector<1024x128xf32>
    %5 = arith.truncf %4 : vector<1024x128xf32> to vector<1024x128xbf16>
    %c0_4 = arith.constant 0 : index
    %c0_5 = arith.constant 0 : index
    %6 = vector.load %arg3[%c0_4, %c0_5] : memref<1024x128xbf16, #tpu.memory_space<vmem>>, vector<1024x128xbf16>
    tpu.vector_store %arg3[%c0_4, %c0_5], %5 {strides = array<i32>} : memref<1024x128xbf16, #tpu.memory_space<vmem>>, vector<1024x128xbf16>,
    return
  }
  func.func @transform_0(%arg0: i32) -> (i32, i32) {
    %c0_i32 = arith.constant 0 : i32
    %c0_i32_0 = arith.constant 0 : i32
    return %arg0, %c0_i32 : i32, i32
  }
  func.func @transform_1(%arg0: i32) -> (i32, i32) {
    %c0_i32 = arith.constant 0 : i32
    %c0_i32_0 = arith.constant 0 : i32
    %c0_i32_1 = arith.constant 0 : i32
    return %c0_i32, %c0_i32_0 : i32, i32
  }
  func.func @transform_2(%arg0: i32) -> (i32, i32) {
    %c0_i32 = arith.constant 0 : i32
    %c0_i32_0 = arith.constant 0 : i32
    return %arg0, %c0_i32 : i32, i32
  }
}

module attributes {stable_mosaic.version = 11 : i64} {
  func.func @_up_mm_stats_kernel_single(%arg0: i32, %arg1: memref<1024x256xbf16, #tpu.memory_space<vmem>>, %arg2: memref<256x128xbf16, #tpu.memory_space<vmem>>, %arg3: memref<1024x128xbf16, #tpu.memory_space<vmem>>, %arg4: memref<2x128xf32, #tpu.memory_space<vmem>>) attributes {dimension_semantics = [#tpu.dimension_semantics<arbitrary>], iteration_bounds = array<i64: 1>, scalar_prefetch = 0 : i64, scratch_operands = 0 : i64, tpu.core_type = #tpu.core_type<tc>, window_params = [{transform_indices = @transform_0, window_bounds = array<i64: 1024, 256>}, {pipeline_mode = #tpu.pipeline_mode<synchronous>, transform_indices = @transform_1, window_bounds = array<i64: 256, 128>}, {transform_indices = @transform_2, window_bounds = array<i64: 1024, 128>}, {pipeline_mode = #tpu.pipeline_mode<synchronous>, transform_indices = @transform_3, window_bounds = array<i64: 2, 128>}]} {
    %c0 = arith.constant 0 : index
    %c0_0 = arith.constant 0 : index
    %0 = vector.load %arg1[%c0, %c0_0] : memref<1024x256xbf16, #tpu.memory_space<vmem>>, vector<1024x256xbf16>
    %c0_1 = arith.constant 0 : index
    %c0_2 = arith.constant 0 : index
    %1 = vector.load %arg2[%c0_1, %c0_2] : memref<256x128xbf16, #tpu.memory_space<vmem>>, vector<256x128xbf16>
    %cst = arith.constant dense<0.000000e+00> : vector<1024x128xf32>
    %2 = tpu.matmul %0, %1, %cst {dimension_numbers = #tpu.dot_dimension_numbers<[1], [0], [0], [1], [0, 0, 1, 1], [], []>} : vector<1024x256xbf16>, vector<256x128xbf16>, vector<1024x128xf32> -> vector<1024x128xf32>
    %3 = arith.truncf %2 : vector<1024x128xf32> to vector<1024x128xbf16>
    %c0_3 = arith.constant 0 : index
    %c0_4 = arith.constant 0 : index
    %4 = vector.load %arg3[%c0_3, %c0_4] : memref<1024x128xbf16, #tpu.memory_space<vmem>>, vector<1024x128xbf16>
    tpu.vector_store %arg3[%c0_3, %c0_4], %3 {strides = array<i32>} : memref<1024x128xbf16, #tpu.memory_space<vmem>>, vector<1024x128xbf16>,
    %c0_i32 = arith.constant 0 : i32
    %5 = arith.cmpi eq, %arg0, %c0_i32 : i32
    %6 = arith.extui %5 : i1 to i32
    %c0_i32_5 = arith.constant 0 : i32
    %7 = arith.cmpi ne, %6, %c0_i32_5 : i32
    scf.if %7 {
      %cst_12 = arith.constant 0.000000e+00 : f32
      %17 = vector.broadcast %cst_12 : f32 to vector<2x128xf32>
      %c0_13 = arith.constant 0 : index
      %c0_14 = arith.constant 0 : index
      %18 = vector.load %arg4[%c0_13, %c0_14] : memref<2x128xf32, #tpu.memory_space<vmem>>, vector<2x128xf32>
      tpu.vector_store %arg4[%c0_13, %c0_14], %17 {strides = array<i32>} : memref<2x128xf32, #tpu.memory_space<vmem>>, vector<2x128xf32>,
    } else {
    }
    %c0_6 = arith.constant 0 : index
    %c0_7 = arith.constant 0 : index
    %8 = vector.load %arg4[%c0_6, %c0_7] : memref<2x128xf32, #tpu.memory_space<vmem>>, vector<2x128xf32>
    %cst_8 = arith.constant dense<0.000000e+00> : vector<128xf32>
    %9 = vector.multi_reduction <add>, %2, %cst_8 [0] : vector<1024x128xf32> to vector<128xf32>
    %10 = vector.shape_cast %9 : vector<128xf32> to vector<1x128xf32>
    %11 = arith.mulf %2, %2 : vector<1024x128xf32>
    %cst_9 = arith.constant dense<0.000000e+00> : vector<128xf32>
    %12 = vector.multi_reduction <add>, %11, %cst_9 [0] : vector<1024x128xf32> to vector<128xf32>
    %13 = vector.shape_cast %12 : vector<128xf32> to vector<1x128xf32>
    %14 = tpu.concatenate %10, %13 in 0 : vector<1x128xf32>, vector<1x128xf32> -> vector<2x128xf32>
    %15 = arith.addf %8, %14 : vector<2x128xf32>
    %c0_10 = arith.constant 0 : index
    %c0_11 = arith.constant 0 : index
    %16 = vector.load %arg4[%c0_10, %c0_11] : memref<2x128xf32, #tpu.memory_space<vmem>>, vector<2x128xf32>
    tpu.vector_store %arg4[%c0_10, %c0_11], %15 {strides = array<i32>} : memref<2x128xf32, #tpu.memory_space<vmem>>, vector<2x128xf32>,
    return
  }
  func.func @transform_0(%arg0: i32) -> (i32, i32) {
    %c0_i32 = arith.constant 0 : i32
    %c0_i32_0 = arith.constant 0 : i32
    return %arg0, %c0_i32 : i32, i32
  }
  func.func @transform_1(%arg0: i32) -> (i32, i32) {
    %c0_i32 = arith.constant 0 : i32
    %c0_i32_0 = arith.constant 0 : i32
    %c0_i32_1 = arith.constant 0 : i32
    return %c0_i32, %c0_i32_0 : i32, i32
  }
  func.func @transform_2(%arg0: i32) -> (i32, i32) {
    %c0_i32 = arith.constant 0 : i32
    %c0_i32_0 = arith.constant 0 : i32
    return %arg0, %c0_i32 : i32, i32
  }
  func.func @transform_3(%arg0: i32) -> (i32, i32) {
    %c0_i32 = arith.constant 0 : i32
    %c0_i32_0 = arith.constant 0 : i32
    %c0_i32_1 = arith.constant 0 : i32
    return %c0_i32, %c0_i32_0 : i32, i32
  }
}

module attributes {stable_mosaic.version = 11 : i64} {
  func.func @_bn_apply_kernel(%arg0: i32, %arg1: memref<1024x128xbf16, #tpu.memory_space<vmem>>, %arg2: memref<1x128xf32, #tpu.memory_space<vmem>>, %arg3: memref<1x128xf32, #tpu.memory_space<vmem>>, %arg4: memref<1024x128xf32, #tpu.memory_space<vmem>>) attributes {dimension_semantics = [#tpu.dimension_semantics<parallel>], iteration_bounds = array<i64: 1>, scalar_prefetch = 0 : i64, scratch_operands = 0 : i64, tpu.core_type = #tpu.core_type<tc>, window_params = [{transform_indices = @transform_0, window_bounds = array<i64: 1024, 128>}, {pipeline_mode = #tpu.pipeline_mode<synchronous>, transform_indices = @transform_1, window_bounds = array<i64: 1, 128>}, {pipeline_mode = #tpu.pipeline_mode<synchronous>, transform_indices = @transform_2, window_bounds = array<i64: 1, 128>}, {transform_indices = @transform_3, window_bounds = array<i64: 1024, 128>}]} {
    %c0 = arith.constant 0 : index
    %c0_0 = arith.constant 0 : index
    %0 = vector.load %arg1[%c0, %c0_0] : memref<1024x128xbf16, #tpu.memory_space<vmem>>, vector<1024x128xbf16>
    %1 = arith.extf %0 : vector<1024x128xbf16> to vector<1024x128xf32>
    %c0_1 = arith.constant 0 : index
    %c0_2 = arith.constant 0 : index
    %2 = vector.load %arg2[%c0_1, %c0_2] : memref<1x128xf32, #tpu.memory_space<vmem>>, vector<1x128xf32>
    %3 = vector.broadcast %2 : vector<1x128xf32> to vector<1024x128xf32>
    %4 = arith.mulf %1, %3 : vector<1024x128xf32>
    %c0_3 = arith.constant 0 : index
    %c0_4 = arith.constant 0 : index
    %5 = vector.load %arg3[%c0_3, %c0_4] : memref<1x128xf32, #tpu.memory_space<vmem>>, vector<1x128xf32>
    %6 = vector.broadcast %5 : vector<1x128xf32> to vector<1024x128xf32>
    %7 = arith.addf %4, %6 : vector<1024x128xf32>
    %c0_5 = arith.constant 0 : index
    %c0_6 = arith.constant 0 : index
    %8 = vector.load %arg4[%c0_5, %c0_6] : memref<1024x128xf32, #tpu.memory_space<vmem>>, vector<1024x128xf32>
    tpu.vector_store %arg4[%c0_5, %c0_6], %7 {strides = array<i32>} : memref<1024x128xf32, #tpu.memory_space<vmem>>, vector<1024x128xf32>,
    return
  }
  func.func @transform_0(%arg0: i32) -> (i32, i32) {
    %c0_i32 = arith.constant 0 : i32
    %c0_i32_0 = arith.constant 0 : i32
    return %arg0, %c0_i32 : i32, i32
  }
  func.func @transform_1(%arg0: i32) -> (i32, i32) {
    %c0_i32 = arith.constant 0 : i32
    %c0_i32_0 = arith.constant 0 : i32
    %c0_i32_1 = arith.constant 0 : i32
    return %c0_i32, %c0_i32_0 : i32, i32
  }
  func.func @transform_2(%arg0: i32) -> (i32, i32) {
    %c0_i32 = arith.constant 0 : i32
    %c0_i32_0 = arith.constant 0 : i32
    %c0_i32_1 = arith.constant 0 : i32
    return %c0_i32, %c0_i32_0 : i32, i32
  }
  func.func @transform_3(%arg0: i32) -> (i32, i32) {
    %c0_i32 = arith.constant 0 : i32
    %c0_i32_0 = arith.constant 0 : i32
    return %arg0, %c0_i32 : i32, i32
  }
}

</mosaic_0001>

<bundles_post_ra>
// kernel: unet_innermost_forward.3
= control target key start
LH: loop header
LB: loop body
LE: loop exit
PB: predicated region body
PF: predicated region fallthrough
CT: control target
= control target key end

     0   :  { %v3249_v0 = vmov 0   ;;  %s3921_s1 = inlined_call_operand.vmem [shape: bf16[256,128], index: 1, kind: input, shape index: {}]   ;;  %s3922_s0 = inlined_call_operand.vmem [shape: bf16[1024,256], index: 0, kind: input, shape index: {}]   ;;  %s3923_s2 = inlined_call_operand.vmem [shape: bf16[1024,128], index: 2, kind: output, shape index: {}]  }
   0x1   :  { %908 = vmatprep.subr.bf16.mxu0 %v3249_v0  ;;  %3008 = vmatprep.subr.bf16.mxu1 %v3249_v0  ;;  %v3041_v1 = vld [vmem:[%s3921_s1] sm:$0xff]   ;;  %v3042_v2 = vld [vmem:[%s3921_s1 + $0x8] sm:$0xff]   ;;  %v3043_v3 = vld [vmem:[%s3921_s1 + $0x10] sm:$0xff]  }
   0x2   :  { %909 = vmatpush1.bf16.msra.mxu0 %v3041_v1  ;;  %3024 = vmatpush1.bf16.msra.mxu1 %v3041_v1  ;;  %v3044_v4 = vld [vmem:[%s3921_s1 + $0x18] sm:$0xff]   ;;  %v3045_v5 = vld [vmem:[%s3921_s1 + $0x20] sm:$0xff]   ;;  %v3046_v7 = vld [vmem:[%s3921_s1 + $0x28] sm:$0xff]  }
   0x3   :  { %910 = vmatprep.subr.bf16.mxu0 %v3249_v0  ;;  %3009 = vmatprep.subr.bf16.mxu1 %v3249_v0  ;;  %v3059_v6 = vld [vmem:[%s3922_s0 + $0x4] ss:$8 sps:$4 sm:$0xff]   ;;  %v3047_v9 = vld [vmem:[%s3921_s1 + $0x30] sm:$0xff]   ;;  %v3048_v10 = vld [vmem:[%s3921_s1 + $0x38] sm:$0xff]  }
   0x4   :  { %v3062_v8 = vld [vmem:[%s3922_s0 + $0x204] ss:$8 sps:$4 sm:$0xff]   ;;  %940 = vmatprep.mubr.bf16.mxu0 %v3059_v6  ;;  %v3051_v13 = vld [vmem:[%s3921_s1 + $0x50] sm:$0xff]   ;;  %v3052_v14 = vld [vmem:[%s3921_s1 + $0x58] sm:$0xff]  }
   0x5   :  { %1196 = vmatprep.mubr.bf16.mxu1 %v3062_v8  ;;  %v3049_v11 = vld [vmem:[%s3921_s1 + $0x40] sm:$0xff]   ;;  %v3050_v12 = vld [vmem:[%s3921_s1 + $0x48] sm:$0xff]   ;;  %v3055_v17 = vld [vmem:[%s3921_s1 + $0x70] sm:$0xff]  }
   0x6   :  { %911 = vmatpush1.bf16.msra.mxu0 %v3042_v2  ;;  %3025 = vmatpush1.bf16.msra.mxu1 %v3042_v2  ;;  %v3053_v15 = vld [vmem:[%s3921_s1 + $0x60] sm:$0xff]   ;;  %v3054_v16 = vld [vmem:[%s3921_s1 + $0x68] sm:$0xff]   ;;  %v3056_v18 = vld [vmem:[%s3921_s1 + $0x78] sm:$0xff]  }
   0x7   :  { %912 = vmatprep.subr.bf16.mxu0 %v3249_v0  ;;  %3010 = vmatprep.subr.bf16.mxu1 %v3249_v0  ;;  %v3057_v19 = vld [vmem:[%s3922_s0] ss:$8 sps:$4 sm:$0xff]   ;;  %v3063_v21 = vld [vmem:[%s3922_s0 + $0x14] ss:$8 sps:$4 sm:$0xff]   ;;  %v3067_v23 = vld [vmem:[%s3922_s0 + $0x10] ss:$8 sps:$4 sm:$0xff]  }
   0x8   :  { %v3060_v20 = vld [vmem:[%s3922_s0 + $0x200] ss:$8 sps:$4 sm:$0xff]   ;;  %v3065_v22 = vld [vmem:[%s3922_s0 + $0x214] ss:$8 sps:$4 sm:$0xff]   ;;  %v3068_v24 = vld [vmem:[%s3922_s0 + $0x210] ss:$8 sps:$4 sm:$0xff]  }
   0x9   :  { %v3069_v25 = vld [vmem:[%s3922_s0 + $0x24] ss:$8 sps:$4 sm:$0xff]   ;;  %v3073_v27 = vld [vmem:[%s3922_s0 + $0x20] ss:$8 sps:$4 sm:$0xff]   ;;  %v3075_v29 = vld [vmem:[%s3922_s0 + $0x34] ss:$8 sps:$4 sm:$0xff]  }
   0xa   :  { %913 = vmatpush1.bf16.msra.mxu0 %v3043_v3  ;;  %3026 = vmatpush1.bf16.msra.mxu1 %v3043_v3  ;;  %v3071_v26 = vld [vmem:[%s3922_s0 + $0x224] ss:$8 sps:$4 sm:$0xff]   ;;  %v3074_v28 = vld [vmem:[%s3922_s0 + $0x220] ss:$8 sps:$4 sm:$0xff]   ;;  %v3077_v30 = vld [vmem:[%s3922_s0 + $0x234] ss:$8 sps:$4 sm:$0xff]  }
   0xb   :  { %914 = vmatprep.subr.bf16.mxu0 %v3249_v0  ;;  %3011 = vmatprep.subr.bf16.mxu1 %v3249_v0  ;;  %v3079_v31 = vld [vmem:[%s3922_s0 + $0x30] ss:$8 sps:$4 sm:$0xff]   ;;  %v3081_v33 = vld [vmem:[%s3922_s0 + $0x44] ss:$8 sps:$4 sm:$0xff]   ;;  %v3085_v35 = vld [vmem:[%s3922_s0 + $0x40] ss:$8 sps:$4 sm:$0xff]  }
   0xc   :  { %v3080_v32 = vld [vmem:[%s3922_s0 + $0x230] ss:$8 sps:$4 sm:$0xff]   ;;  %v3083_v34 = vld [vmem:[%s3922_s0 + $0x244] ss:$8 sps:$4 sm:$0xff]   ;;  %v3086_v36 = vld [vmem:[%s3922_s0 + $0x240] ss:$8 sps:$4 sm:$0xff]  }
   0xd   :  { %v3087_v37 = vld [vmem:[%s3922_s0 + $0x54] ss:$8 sps:$4 sm:$0xff]   ;;  %v3091_v39 = vld [vmem:[%s3922_s0 + $0x50] ss:$8 sps:$4 sm:$0xff]   ;;  %v3093_v41 = vld [vmem:[%s3922_s0 + $0x64] ss:$8 sps:$4 sm:$0xff]  }
   0xe   :  { %915 = vmatpush1.bf16.msra.mxu0 %v3044_v4  ;;  %3027 = vmatpush1.bf16.msra.mxu1 %v3044_v4  ;;  %v3089_v38 = vld [vmem:[%s3922_s0 + $0x254] ss:$8 sps:$4 sm:$0xff]   ;;  %v3092_v40 = vld [vmem:[%s3922_s0 + $0x250] ss:$8 sps:$4 sm:$0xff]   ;;  %v3095_v42 = vld [vmem:[%s3922_s0 + $0x264] ss:$8 sps:$4 sm:$0xff]  }
   0xf   :  { %916 = vmatprep.subr.bf16.mxu0 %v3249_v0  ;;  %3012 = vmatprep.subr.bf16.mxu1 %v3249_v0  ;;  %v3097_v43 = vld [vmem:[%s3922_s0 + $0x60] ss:$8 sps:$4 sm:$0xff]   ;;  %v3099_v45 = vld [vmem:[%s3922_s0 + $0x74] ss:$8 sps:$4 sm:$0xff]   ;;  %v3103_v47 = vld [vmem:[%s3922_s0 + $0x70] ss:$8 sps:$4 sm:$0xff]  }
  0x10   :  { %v3098_v44 = vld [vmem:[%s3922_s0 + $0x260] ss:$8 sps:$4 sm:$0xff]   ;;  %v3101_v46 = vld [vmem:[%s3922_s0 + $0x274] ss:$8 sps:$4 sm:$0xff]   ;;  %v3104_v48 = vld [vmem:[%s3922_s0 + $0x270] ss:$8 sps:$4 sm:$0xff]  }
  0x11   :  { %v3105_v49 = vld [vmem:[%s3922_s0 + $0x84] ss:$8 sps:$4 sm:$0xff]   ;;  %v3109_v51 = vld [vmem:[%s3922_s0 + $0x80] ss:$8 sps:$4 sm:$0xff]   ;;  %v3111_v53 = vld [vmem:[%s3922_s0 + $0x94] ss:$8 sps:$4 sm:$0xff]  }
  0x12   :  { %917 = vmatpush1.bf16.msra.mxu0 %v3045_v5  ;;  %3028 = vmatpush1.bf16.msra.mxu1 %v3045_v5  ;;  %v3107_v50 = vld [vmem:[%s3922_s0 + $0x284] ss:$8 sps:$4 sm:$0xff]   ;;  %v3110_v52 = vld [vmem:[%s3922_s0 + $0x280] ss:$8 sps:$4 sm:$0xff]   ;;  %v3113_v54 = vld [vmem:[%s3922_s0 + $0x294] ss:$8 sps:$4 sm:$0xff]  }
  0x13   :  { %918 = vmatprep.subr.bf16.mxu0 %v3249_v0  ;;  %3013 = vmatprep.subr.bf16.mxu1 %v3249_v0  ;;  %v3115_v55 = vld [vmem:[%s3922_s0 + $0x90] ss:$8 sps:$4 sm:$0xff]   ;;  %v3117_v57 = vld [vmem:[%s3922_s0 + $0xa4] ss:$8 sps:$4 sm:$0xff]   ;;  %v3121_v59 = vld [vmem:[%s3922_s0 + $0xa0] ss:$8 sps:$4 sm:$0xff]  }
  0x14   :  { %v3116_v56 = vld [vmem:[%s3922_s0 + $0x290] ss:$8 sps:$4 sm:$0xff]   ;;  %v3119_v58 = vld [vmem:[%s3922_s0 + $0x2a4] ss:$8 sps:$4 sm:$0xff]   ;;  %v3122_v60 = vld [vmem:[%s3922_s0 + $0x2a0] ss:$8 sps:$4 sm:$0xff]  }
  0x15   :  { %v3123_v61 = vld [vmem:[%s3922_s0 + $0xb4] ss:$8 sps:$4 sm:$0xff]   ;;  %v3127_v63 = vld [vmem:[%s3922_s0 + $0xb0] ss:$8 sps:$4 sm:$0xff]   ;;  %v3129_v1 = vld [vmem:[%s3922_s0 + $0xc4] ss:$8 sps:$4 sm:$0xff]  }
  0x16   :  { %919 = vmatpush1.bf16.msra.mxu0 %v3046_v7  ;;  %3029 = vmatpush1.bf16.msra.mxu1 %v3046_v7  ;;  %v3125_v62 = vld [vmem:[%s3922_s0 + $0x2b4] ss:$8 sps:$4 sm:$0xff]   ;;  %v3131_v2 = vld [vmem:[%s3922_s0 + $0x2c4] ss:$8 sps:$4 sm:$0xff]   ;;  %v3133_v3 = vld [vmem:[%s3922_s0 + $0xc0] ss:$8 sps:$4 sm:$0xff]  }
  0x17   :  { %920 = vmatprep.subr.bf16.mxu0 %v3249_v0  ;;  %3014 = vmatprep.subr.bf16.mxu1 %v3249_v0  ;;  %v3134_v4 = vld [vmem:[%s3922_s0 + $0x2c0] ss:$8 sps:$4 sm:$0xff]   ;;  %v3135_v5 = vld [vmem:[%s3922_s0 + $0xd4] ss:$8 sps:$4 sm:$0xff]   ;;  %v3139_v7 = vld [vmem:[%s3922_s0 + $0xd0] ss:$8 sps:$4 sm:$0xff]  }
  0x18   :  { %v3137_v6 = vld [vmem:[%s3922_s0 + $0x2d4] ss:$8 sps:$4 sm:$0xff]   ;;  %v3140_v8 = vld [vmem:[%s3922_s0 + $0x2d0] ss:$8 sps:$4 sm:$0xff]  }
  0x1a   :  { %921 = vmatpush1.bf16.msra.mxu0 %v3047_v9  ;;  %3030 = vmatpush1.bf16.msra.mxu1 %v3047_v9  ;;  %v3141_v9 = vld [vmem:[%s3922_s0 + $0xe4] ss:$8 sps:$4 sm:$0xff]  }
  0x1b   :  { %922 = vmatprep.subr.bf16.mxu0 %v3249_v0  ;;  %3015 = vmatprep.subr.bf16.mxu1 %v3249_v0 }
  0x1e   :  { %923 = vmatpush1.bf16.msra.mxu0 %v3048_v10  ;;  %3031 = vmatpush1.bf16.msra.mxu1 %v3048_v10  ;;  %v3143_v10 = vld [vmem:[%s3922_s0 + $0x2e4] ss:$8 sps:$4 sm:$0xff]  }
  0x1f   :  { %924 = vmatprep.subr.bf16.mxu0 %v3249_v0  ;;  %3016 = vmatprep.subr.bf16.mxu1 %v3249_v0 }
  0x22   :  { %925 = vmatpush1.bf16.msra.mxu0 %v3049_v11  ;;  %3032 = vmatpush1.bf16.msra.mxu1 %v3049_v11  ;;  %v3145_v11 = vld [vmem:[%s3922_s0 + $0xe0] ss:$8 sps:$4 sm:$0xff]  }
  0x23   :  { %926 = vmatprep.subr.bf16.mxu0 %v3249_v0  ;;  %3017 = vmatprep.subr.bf16.mxu1 %v3249_v0 }
  0x26   :  { %927 = vmatpush1.bf16.msra.mxu0 %v3050_v12  ;;  %3033 = vmatpush1.bf16.msra.mxu1 %v3050_v12  ;;  %v3146_v12 = vld [vmem:[%s3922_s0 + $0x2e0] ss:$8 sps:$4 sm:$0xff]  }
  0x27   :  { %928 = vmatprep.subr.bf16.mxu0 %v3249_v0  ;;  %3018 = vmatprep.subr.bf16.mxu1 %v3249_v0 }
  0x2a   :  { %929 = vmatpush1.bf16.msra.mxu0 %v3051_v13  ;;  %3034 = vmatpush1.bf16.msra.mxu1 %v3051_v13  ;;  %v3147_v13 = vld [vmem:[%s3922_s0 + $0xf4] ss:$8 sps:$4 sm:$0xff]  }
  0x2b   :  { %930 = vmatprep.subr.bf16.mxu0 %v3249_v0  ;;  %3019 = vmatprep.subr.bf16.mxu1 %v3249_v0 }
  0x2e   :  { %931 = vmatpush1.bf16.msra.mxu0 %v3052_v14  ;;  %3035 = vmatpush1.bf16.msra.mxu1 %v3052_v14  ;;  %v3149_v14 = vld [vmem:[%s3922_s0 + $0x2f4] ss:$8 sps:$4 sm:$0xff]  }
  0x2f   :  { %932 = vmatprep.subr.bf16.mxu0 %v3249_v0  ;;  %3020 = vmatprep.subr.bf16.mxu1 %v3249_v0 }
  0x32   :  { %933 = vmatpush1.bf16.msra.mxu0 %v3053_v15  ;;  %3036 = vmatpush1.bf16.msra.mxu1 %v3053_v15  ;;  %v3151_v15 = vld [vmem:[%s3922_s0 + $0xf0] ss:$8 sps:$4 sm:$0xff]  }
  0x33   :  { %934 = vmatprep.subr.bf16.mxu0 %v3249_v0  ;;  %3021 = vmatprep.subr.bf16.mxu1 %v3249_v0 }
  0x36   :  { %935 = vmatpush1.bf16.msra.mxu0 %v3054_v16  ;;  %3037 = vmatpush1.bf16.msra.mxu1 %v3054_v16  ;;  %v3152_v16 = vld [vmem:[%s3922_s0 + $0x2f0] ss:$8 sps:$4 sm:$0xff]  }
  0x37   :  { %936 = vmatprep.subr.bf16.mxu0 %v3249_v0  ;;  %3022 = vmatprep.subr.bf16.mxu1 %v3249_v0 }
  0x3a   :  { %937 = vmatpush1.bf16.msra.mxu0 %v3055_v17  ;;  %3038 = vmatpush1.bf16.msra.mxu1 %v3055_v17  ;;  %v3153_v17 = vld [vmem:[%s3922_s0 + $0x104] ss:$8 sps:$4 sm:$0xff]  }
  0x3b   :  { %938 = vmatprep.subr.bf16.mxu0 %v3249_v0  ;;  %3023 = vmatprep.subr.bf16.mxu1 %v3249_v0  ;;  %v3128_v0 = vld [vmem:[%s3922_s0 + $0x2b0] ss:$8 sps:$4 sm:$0xff]  }
  0x3e   :  { %939 = vmatpush1.bf16.msra.mxu0 %v3056_v18  ;;  %3039 = vmatpush1.bf16.msra.mxu1 %v3056_v18  ;;  %v3155_v18 = vld [vmem:[%s3922_s0 + $0x304] ss:$8 sps:$4 sm:$0xff]  }
  0x41   :  { %941 = vmatmul.mubr.bf16.vlgmr.msra.gmra.mrb[0].mxu0 %v3057_v19  ;;  %1197 = vmatmul.mubr.bf16.vlgmr.msra.gmra.mrb[0].mxu1 %v3060_v20  ;;  %v3157_v19 = vld [vmem:[%s3922_s0 + $0x100] ss:$8 sps:$4 sm:$0xff]  }
  0x42   :  { %948 = vmatprep.mubr.bf16.mxu0 %v3063_v21  ;;  %1204 = vmatprep.mubr.bf16.mxu1 %v3065_v22  ;;  %v3158_v20 = vld [vmem:[%s3922_s0 + $0x300] ss:$8 sps:$4 sm:$0xff]   ;;  %v3159_v21 = vld [vmem:[%s3922_s0 + $0x114] ss:$8 sps:$4 sm:$0xff]  }
  0x43   :  { %v3161_v22 = vld [vmem:[%s3922_s0 + $0x314] ss:$8 sps:$4 sm:$0xff]  }
  0x49   :  { %949 = vmatmul.mubr.bf16.gmra.mrb[4].mxu0 %v3067_v23  ;;  %1205 = vmatmul.mubr.bf16.gmra.mrb[4].mxu1 %v3068_v24  ;;  %v3163_v23 = vld [vmem:[%s3922_s0 + $0x110] ss:$8 sps:$4 sm:$0xff]  }
  0x4a   :  { %956 = vmatprep.mubr.bf16.mxu0 %v3069_v25  ;;  %1212 = vmatprep.mubr.bf16.mxu1 %v3071_v26  ;;  %v3164_v24 = vld [vmem:[%s3922_s0 + $0x310] ss:$8 sps:$4 sm:$0xff]   ;;  %v3165_v25 = vld [vmem:[%s3922_s0 + $0x124] ss:$8 sps:$4 sm:$0xff]  }
  0x4b   :  { %v3167_v26 = vld [vmem:[%s3922_s0 + $0x324] ss:$8 sps:$4 sm:$0xff]  }
  0x51   :  { %957 = vmatmul.mubr.bf16.gmra.mrb[8].mxu0 %v3073_v27  ;;  %1213 = vmatmul.mubr.bf16.gmra.mrb[8].mxu1 %v3074_v28  ;;  %v3169_v27 = vld [vmem:[%s3922_s0 + $0x120] ss:$8 sps:$4 sm:$0xff]  }
  0x52   :  { %964 = vmatprep.mubr.bf16.mxu0 %v3075_v29  ;;  %1220 = vmatprep.mubr.bf16.mxu1 %v3077_v30  ;;  %v3170_v28 = vld [vmem:[%s3922_s0 + $0x320] ss:$8 sps:$4 sm:$0xff]   ;;  %v3171_v29 = vld [vmem:[%s3922_s0 + $0x134] ss:$8 sps:$4 sm:$0xff]  }
  0x53   :  { %v3173_v30 = vld [vmem:[%s3922_s0 + $0x334] ss:$8 sps:$4 sm:$0xff]  }
  0x59   :  { %965 = vmatmul.mubr.bf16.gmra.mrb[12].mxu0 %v3079_v31  ;;  %1221 = vmatmul.mubr.bf16.gmra.mrb[12].mxu1 %v3080_v32  ;;  %v3175_v31 = vld [vmem:[%s3922_s0 + $0x130] ss:$8 sps:$4 sm:$0xff]  }
  0x5a   :  { %972 = vmatprep.mubr.bf16.mxu0 %v3081_v33  ;;  %1228 = vmatprep.mubr.bf16.mxu1 %v3083_v34  ;;  %v3176_v32 = vld [vmem:[%s3922_s0 + $0x330] ss:$8 sps:$4 sm:$0xff]   ;;  %v3177_v33 = vld [vmem:[%s3922_s0 + $0x144] ss:$8 sps:$4 sm:$0xff]  }
  0x5b   :  { %v3179_v34 = vld [vmem:[%s3922_s0 + $0x344] ss:$8 sps:$4 sm:$0xff]  }
  0x61   :  { %973 = vmatmul.mubr.bf16.gmra.mrb[16].mxu0 %v3085_v35  ;;  %1229 = vmatmul.mubr.bf16.gmra.mrb[16].mxu1 %v3086_v36  ;;  %v3181_v35 = vld [vmem:[%s3922_s0 + $0x140] ss:$8 sps:$4 sm:$0xff]  }
  0x62   :  { %980 = vmatprep.mubr.bf16.mxu0 %v3087_v37  ;;  %1236 = vmatprep.mubr.bf16.mxu1 %v3089_v38  ;;  %v3182_v36 = vld [vmem:[%s3922_s0 + $0x340] ss:$8 sps:$4 sm:$0xff]   ;;  %v3183_v37 = vld [vmem:[%s3922_s0 + $0x154] ss:$8 sps:$4 sm:$0xff]  }
  0x63   :  { %v3185_v38 = vld [vmem:[%s3922_s0 + $0x354] ss:$8 sps:$4 sm:$0xff]  }
  0x69   :  { %981 = vmatmul.mubr.bf16.gmra.mrb[20].mxu0 %v3091_v39  ;;  %1237 = vmatmul.mubr.bf16.gmra.mrb[20].mxu1 %v3092_v40  ;;  %v3187_v39 = vld [vmem:[%s3922_s0 + $0x150] ss:$8 sps:$4 sm:$0xff]  }
  0x6a   :  { %988 = vmatprep.mubr.bf16.mxu0 %v3093_v41  ;;  %1244 = vmatprep.mubr.bf16.mxu1 %v3095_v42  ;;  %v3188_v40 = vld [vmem:[%s3922_s0 + $0x350] ss:$8 sps:$4 sm:$0xff]   ;;  %v3189_v41 = vld [vmem:[%s3922_s0 + $0x164] ss:$8 sps:$4 sm:$0xff]  }
  0x6b   :  { %v3191_v42 = vld [vmem:[%s3922_s0 + $0x364] ss:$8 sps:$4 sm:$0xff]  }
  0x71   :  { %989 = vmatmul.mubr.bf16.gmra.mrb[24].mxu0 %v3097_v43  ;;  %1245 = vmatmul.mubr.bf16.gmra.mrb[24].mxu1 %v3098_v44  ;;  %v3193_v43 = vld [vmem:[%s3922_s0 + $0x160] ss:$8 sps:$4 sm:$0xff]  }
  0x72   :  { %996 = vmatprep.mubr.bf16.mxu0 %v3099_v45  ;;  %1252 = vmatprep.mubr.bf16.mxu1 %v3101_v46  ;;  %v3194_v44 = vld [vmem:[%s3922_s0 + $0x360] ss:$8 sps:$4 sm:$0xff]   ;;  %v3195_v45 = vld [vmem:[%s3922_s0 + $0x174] ss:$8 sps:$4 sm:$0xff]  }
  0x73   :  { %v3197_v46 = vld [vmem:[%s3922_s0 + $0x374] ss:$8 sps:$4 sm:$0xff]  }
  0x79   :  { %997 = vmatmul.mubr.bf16.gmra.mrb[28].mxu0 %v3103_v47  ;;  %1253 = vmatmul.mubr.bf16.gmra.mrb[28].mxu1 %v3104_v48  ;;  %v3199_v47 = vld [vmem:[%s3922_s0 + $0x170] ss:$8 sps:$4 sm:$0xff]  }
  0x7a   :  { %1004 = vmatprep.mubr.bf16.mxu0 %v3105_v49  ;;  %1260 = vmatprep.mubr.bf16.mxu1 %v3107_v50  ;;  %v3200_v48 = vld [vmem:[%s3922_s0 + $0x370] ss:$8 sps:$4 sm:$0xff]   ;;  %v3201_v49 = vld [vmem:[%s3922_s0 + $0x184] ss:$8 sps:$4 sm:$0xff]  }
  0x7b   :  { %v3203_v50 = vld [vmem:[%s3922_s0 + $0x384] ss:$8 sps:$4 sm:$0xff]  }
  0x81   :  { %1005 = vmatmul.mubr.bf16.gmra.mrb[32].mxu0 %v3109_v51  ;;  %1261 = vmatmul.mubr.bf16.gmra.mrb[32].mxu1 %v3110_v52  ;;  %v3205_v51 = vld [vmem:[%s3922_s0 + $0x180] ss:$8 sps:$4 sm:$0xff]  }
  0x82   :  { %1012 = vmatprep.mubr.bf16.mxu0 %v3111_v53  ;;  %1268 = vmatprep.mubr.bf16.mxu1 %v3113_v54  ;;  %v3206_v52 = vld [vmem:[%s3922_s0 + $0x380] ss:$8 sps:$4 sm:$0xff]   ;;  %v3207_v53 = vld [vmem:[%s3922_s0 + $0x194] ss:$8 sps:$4 sm:$0xff]  }
  0x83   :  { %v3209_v54 = vld [vmem:[%s3922_s0 + $0x394] ss:$8 sps:$4 sm:$0xff]  }
  0x89   :  { %1013 = vmatmul.mubr.bf16.gmra.mrb[36].mxu0 %v3115_v55  ;;  %1269 = vmatmul.mubr.bf16.gmra.mrb[36].mxu1 %v3116_v56  ;;  %v3211_v55 = vld [vmem:[%s3922_s0 + $0x190] ss:$8 sps:$4 sm:$0xff]  }
  0x8a   :  { %1020 = vmatprep.mubr.bf16.mxu0 %v3117_v57  ;;  %1276 = vmatprep.mubr.bf16.mxu1 %v3119_v58  ;;  %v3212_v56 = vld [vmem:[%s3922_s0 + $0x390] ss:$8 sps:$4 sm:$0xff]   ;;  %v3213_v57 = vld [vmem:[%s3922_s0 + $0x1a4] ss:$8 sps:$4 sm:$0xff]  }
  0x8b   :  { %v3215_v58 = vld [vmem:[%s3922_s0 + $0x3a4] ss:$8 sps:$4 sm:$0xff]  }
  0x91   :  { %1021 = vmatmul.mubr.bf16.gmra.mrb[40].mxu0 %v3121_v59  ;;  %1277 = vmatmul.mubr.bf16.gmra.mrb[40].mxu1 %v3122_v60  ;;  %v3217_v59 = vld [vmem:[%s3922_s0 + $0x1a0] ss:$8 sps:$4 sm:$0xff]  }
  0x92   :  { %1028 = vmatprep.mubr.bf16.mxu0 %v3123_v61  ;;  %1284 = vmatprep.mubr.bf16.mxu1 %v3125_v62  ;;  %v3218_v60 = vld [vmem:[%s3922_s0 + $0x3a0] ss:$8 sps:$4 sm:$0xff]   ;;  %v3219_v61 = vld [vmem:[%s3922_s0 + $0x1b4] ss:$8 sps:$4 sm:$0xff]  }
  0x93   :  { %v3221_v62 = vld [vmem:[%s3922_s0 + $0x3b4] ss:$8 sps:$4 sm:$0xff]  }
  0x99   :  { %1029 = vmatmul.mubr.bf16.gmra.mrb[44].mxu0 %v3127_v63  ;;  %1285 = vmatmul.mubr.bf16.gmra.mrb[44].mxu1 %v3128_v0 }
  0x9a   :  { %1036 = vmatprep.mubr.bf16.mxu0 %v3129_v1  ;;  %1292 = vmatprep.mubr.bf16.mxu1 %v3131_v2 }
  0xa1   :  { %1037 = vmatmul.mubr.bf16.gmra.mrb[48].mxu0 %v3133_v3  ;;  %1293 = vmatmul.mubr.bf16.gmra.mrb[48].mxu1 %v3134_v4  ;;  %v3223_v3 = vld [vmem:[%s3922_s0 + $0x1b0] ss:$8 sps:$4 sm:$0xff]  }
  0xa2   :  { %1044 = vmatprep.mubr.bf16.mxu0 %v3135_v5  ;;  %1300 = vmatprep.mubr.bf16.mxu1 %v3137_v6  ;;  %v3224_v4 = vld [vmem:[%s3922_s0 + $0x3b0] ss:$8 sps:$4 sm:$0xff]  }
  0xa9   :  { %1045 = vmatmul.mubr.bf16.gmra.mrb[52].mxu0 %v3139_v7  ;;  %1301 = vmatmul.mubr.bf16.gmra.mrb[52].mxu1 %v3140_v8  ;;  %v3225_v7 = vld [vmem:[%s3922_s0 + $0x1c4] ss:$8 sps:$4 sm:$0xff]  }
  0xaa   :  { %1052 = vmatprep.mubr.bf16.mxu0 %v3141_v9  ;;  %1308 = vmatprep.mubr.bf16.mxu1 %v3143_v10  ;;  %v3227_v8 = vld [vmem:[%s3922_s0 + $0x3c4] ss:$8 sps:$4 sm:$0xff]  }
  0xb1   :  { %1053 = vmatmul.mubr.bf16.gmra.mrb[56].mxu0 %v3145_v11  ;;  %1309 = vmatmul.mubr.bf16.gmra.mrb[56].mxu1 %v3146_v12 }
  0xb2   :  { %1060 = vmatprep.mubr.bf16.mxu0 %v3147_v13  ;;  %1316 = vmatprep.mubr.bf16.mxu1 %v3149_v14 }
  0xb9   :  { %1061 = vmatmul.mubr.bf16.gmra.mrb[60].mxu0 %v3151_v15  ;;  %1317 = vmatmul.mubr.bf16.gmra.mrb[60].mxu1 %v3152_v16 }
  0xba   :  { %1068 = vmatprep.mubr.bf16.mxu0 %v3153_v17  ;;  %1324 = vmatprep.mubr.bf16.mxu1 %v3155_v18 }
  0xc1   :  { %1069 = vmatmul.mubr.bf16.gmra.mrb[64].mxu0 %v3157_v19  ;;  %1325 = vmatmul.mubr.bf16.gmra.mrb[64].mxu1 %v3158_v20 }
  0xc2   :  { %1076 = vmatprep.mubr.bf16.mxu0 %v3159_v21  ;;  %1332 = vmatprep.mubr.bf16.mxu1 %v3161_v22  ;;  %v3229_v21 = vld [vmem:[%s3922_s0 + $0x1c0] ss:$8 sps:$4 sm:$0xff]  }
  0xc3   :  { %v3230_v22 = vld [vmem:[%s3922_s0 + $0x3c0] ss:$8 sps:$4 sm:$0xff]  }
  0xc9   :  { %1077 = vmatmul.mubr.bf16.gmra.mrb[68].mxu0 %v3163_v23  ;;  %1333 = vmatmul.mubr.bf16.gmra.mrb[68].mxu1 %v3164_v24 }
  0xca   :  { %1084 = vmatprep.mubr.bf16.mxu0 %v3165_v25  ;;  %1340 = vmatprep.mubr.bf16.mxu1 %v3167_v26  ;;  %v3231_v25 = vld [vmem:[%s3922_s0 + $0x1d4] ss:$8 sps:$4 sm:$0xff]  }
  0xcb   :  { %v3233_v26 = vld [vmem:[%s3922_s0 + $0x3d4] ss:$8 sps:$4 sm:$0xff]  }
  0xd1   :  { %1085 = vmatmul.mubr.bf16.gmra.mrb[72].mxu0 %v3169_v27  ;;  %1341 = vmatmul.mubr.bf16.gmra.mrb[72].mxu1 %v3170_v28 }
  0xd2   :  { %1092 = vmatprep.mubr.bf16.mxu0 %v3171_v29  ;;  %1348 = vmatprep.mubr.bf16.mxu1 %v3173_v30 }
  0xd9   :  { %1093 = vmatmul.mubr.bf16.gmra.mrb[76].mxu0 %v3175_v31  ;;  %1349 = vmatmul.mubr.bf16.gmra.mrb[76].mxu1 %v3176_v32 }
  0xda   :  { %1100 = vmatprep.mubr.bf16.mxu0 %v3177_v33  ;;  %1356 = vmatprep.mubr.bf16.mxu1 %v3179_v34 }
  0xe1   :  { %1101 = vmatmul.mubr.bf16.gmra.mrb[80].mxu0 %v3181_v35  ;;  %1357 = vmatmul.mubr.bf16.gmra.mrb[80].mxu1 %v3182_v36 }
  0xe2   :  { %1108 = vmatprep.mubr.bf16.mxu0 %v3183_v37  ;;  %1364 = vmatprep.mubr.bf16.mxu1 %v3185_v38 }
  0xe9   :  { %1109 = vmatmul.mubr.bf16.gmra.mrb[84].mxu0 %v3187_v39  ;;  %1365 = vmatmul.mubr.bf16.gmra.mrb[84].mxu1 %v3188_v40  ;;  %v3235_v39 = vld [vmem:[%s3922_s0 + $0x1d0] ss:$8 sps:$4 sm:$0xff]  }
  0xea   :  { %1116 = vmatprep.mubr.bf16.mxu0 %v3189_v41  ;;  %1372 = vmatprep.mubr.bf16.mxu1 %v3191_v42  ;;  %v3236_v40 = vld [vmem:[%s3922_s0 + $0x3d0] ss:$8 sps:$4 sm:$0xff]  }
  0xf1   :  { %1117 = vmatmul.mubr.bf16.gmra.mrb[88].mxu0 %v3193_v43  ;;  %1373 = vmatmul.mubr.bf16.gmra.mrb[88].mxu1 %v3194_v44  ;;  %v3237_v43 = vld [vmem:[%s3922_s0 + $0x1e4] ss:$8 sps:$4 sm:$0xff]  }
  0xf2   :  { %1124 = vmatprep.mubr.bf16.mxu0 %v3195_v45  ;;  %1380 = vmatprep.mubr.bf16.mxu1 %v3197_v46  ;;  %v3239_v44 = vld [vmem:[%s3922_s0 + $0x3e4] ss:$8 sps:$4 sm:$0xff]  }
  0xf9   :  { %1125 = vmatmul.mubr.bf16.gmra.mrb[92].mxu0 %v3199_v47  ;;  %1381 = vmatmul.mubr.bf16.gmra.mrb[92].mxu1 %v3200_v48 }
  0xfa   :  { %1132 = vmatprep.mubr.bf16.mxu0 %v3201_v49  ;;  %1388 = vmatprep.mubr.bf16.mxu1 %v3203_v50 }
 0x101   :  { %1133 = vmatmul.mubr.bf16.gmra.mrb[96].mxu0 %v3205_v51  ;;  %1389 = vmatmul.mubr.bf16.gmra.mrb[96].mxu1 %v3206_v52 }
 0x102   :  { %1140 = vmatprep.mubr.bf16.mxu0 %v3207_v53  ;;  %1396 = vmatprep.mubr.bf16.mxu1 %v3209_v54 }
 0x109   :  { %1141 = vmatmul.mubr.bf16.gmra.mrb[100].mxu0 %v3211_v55  ;;  %1397 = vmatmul.mubr.bf16.gmra.mrb[100].mxu1 %v3212_v56 }
 0x10a   :  { %1148 = vmatprep.mubr.bf16.mxu0 %v3213_v57  ;;  %1404 = vmatprep.mubr.bf16.mxu1 %v3215_v58  ;;  %v3241_v57 = vld [vmem:[%s3922_s0 + $0x1e0] ss:$8 sps:$4 sm:$0xff]  }
 0x10b   :  { %v3242_v58 = vld [vmem:[%s3922_s0 + $0x3e0] ss:$8 sps:$4 sm:$0xff]  }
 0x111   :  { %1149 = vmatmul.mubr.bf16.gmra.mrb[104].mxu0 %v3217_v59  ;;  %1405 = vmatmul.mubr.bf16.gmra.mrb[104].mxu1 %v3218_v60 }
 0x112   :  { %1156 = vmatprep.mubr.bf16.mxu0 %v3219_v61  ;;  %1412 = vmatprep.mubr.bf16.mxu1 %v3221_v62  ;;  %v3243_v61 = vld [vmem:[%s3922_s0 + $0x1f4] ss:$8 sps:$4 sm:$0xff]  }
 0x113   :  { %v3245_v62 = vld [vmem:[%s3922_s0 + $0x3f4] ss:$8 sps:$4 sm:$0xff]  }
 0x114   :  { %v942_v63 = vpop.f32.mrb[0].mxu0  ;;  %v1198_v0 = vpop.f32.mrb[0].mxu1 }
 0x115   :  { %v944_v1 = vpop.f32.mrb[1].mxu0  ;;  %v1200_v2 = vpop.f32.mrb[1].mxu1  ;;  %v1453_v9 = vmax.f32 %v942_v63, 0.0  ;;  %v1517_v10 = vmax.f32 %v1198_v0, 0.0 }
 0x116   :  { %v945_v5 = vpop.f32.mrb[2].mxu0  ;;  %v1201_v6 = vpop.f32.mrb[2].mxu1 }
 0x117   :  { %v1454_v11 = vmax.f32 %v945_v5, 0.0  ;;  %v1518_v12 = vmax.f32 %v1201_v6, 0.0  ;;  %v947_v13 = vpop.f32.mrb[3].mxu0  ;;  %v1203_v14 = vpop.f32.mrb[3].mxu1 }
 0x119   :  { %v2628_v15 = vpack.c.bf16 %v1454_v11, %v1453_v9  ;;  %v2788_v16 = vpack.c.bf16 %v1518_v12, %v1517_v10  ;;  %1157 = vmatmul.mubr.bf16.gmra.mrb[108].mxu0 %v3223_v3  ;;  %1413 = vmatmul.mubr.bf16.gmra.mrb[108].mxu1 %v3224_v4  ;;  %v3247_v11 = vld [vmem:[%s3922_s0 + $0x1f0] ss:$8 sps:$4 sm:$0xff]  }
 0x11a   :  { %1164 = vmatprep.mubr.bf16.mxu0 %v3225_v7  ;;  %1420 = vmatprep.mubr.bf16.mxu1 %v3227_v8  ;;  %v3248_v12 = vld [vmem:[%s3922_s0 + $0x3f0] ss:$8 sps:$4 sm:$0xff]  }
 0x11b   :  { %2629 = vst [vmem:[%s3923_s2] sm:$0xff] %v2628_v15   ;;  %2976 = vst [vmem:[%s3923_s2 + $0x100] sm:$0xff] %v2788_v16  }
 0x11c   :  { %v950_v17 = vpop.f32.mrb[4].mxu0  ;;  %v1206_v18 = vpop.f32.mrb[4].mxu1 }
 0x11d   :  { %v952_v19 = vpop.f32.mrb[5].mxu0  ;;  %v1208_v20 = vpop.f32.mrb[5].mxu1  ;;  %v1455_v27 = vmax.f32 %v950_v17, 0.0  ;;  %v1519_v28 = vmax.f32 %v1206_v18, 0.0 }
 0x11e   :  { %v953_v23 = vpop.f32.mrb[6].mxu0  ;;  %v1209_v24 = vpop.f32.mrb[6].mxu1 }
 0x11f   :  { %v1456_v29 = vmax.f32 %v953_v23, 0.0  ;;  %v1520_v30 = vmax.f32 %v1209_v24, 0.0  ;;  %v955_v31 = vpop.f32.mrb[7].mxu0  ;;  %v1211_v32 = vpop.f32.mrb[7].mxu1 }
 0x121   :  { %v2633_v33 = vpack.c.bf16 %v1456_v29, %v1455_v27  ;;  %v2793_v34 = vpack.c.bf16 %v1520_v30, %v1519_v28  ;;  %1165 = vmatmul.mubr.bf16.gmra.mrb[112].mxu0 %v3229_v21  ;;  %1421 = vmatmul.mubr.bf16.gmra.mrb[112].mxu1 %v3230_v22 }
 0x122   :  { %1172 = vmatprep.mubr.bf16.mxu0 %v3231_v25  ;;  %1428 = vmatprep.mubr.bf16.mxu1 %v3233_v26 }
 0x123   :  { %2945 = vst [vmem:[%s3923_s2 + $0x8] sm:$0xff] %v2633_v33   ;;  %2977 = vst [vmem:[%s3923_s2 + $0x108] sm:$0xff] %v2793_v34  }
 0x124   :  { %v958_v35 = vpop.f32.mrb[8].mxu0  ;;  %v1214_v36 = vpop.f32.mrb[8].mxu1 }
 0x125   :  { %v960_v37 = vpop.f32.mrb[9].mxu0  ;;  %v1216_v38 = vpop.f32.mrb[9].mxu1  ;;  %v1457_v45 = vmax.f32 %v958_v35, 0.0  ;;  %v1521_v46 = vmax.f32 %v1214_v36, 0.0 }
 0x126   :  { %v961_v41 = vpop.f32.mrb[10].mxu0  ;;  %v1217_v42 = vpop.f32.mrb[10].mxu1 }
 0x127   :  { %v1458_v47 = vmax.f32 %v961_v41, 0.0  ;;  %v1522_v48 = vmax.f32 %v1217_v42, 0.0  ;;  %v963_v49 = vpop.f32.mrb[11].mxu0  ;;  %v1219_v50 = vpop.f32.mrb[11].mxu1 }
 0x129   :  { %v2638_v51 = vpack.c.bf16 %v1458_v47, %v1457_v45  ;;  %v2798_v52 = vpack.c.bf16 %v1522_v48, %v1521_v46  ;;  %1173 = vmatmul.mubr.bf16.gmra.mrb[116].mxu0 %v3235_v39  ;;  %1429 = vmatmul.mubr.bf16.gmra.mrb[116].mxu1 %v3236_v40 }
 0x12a   :  { %1180 = vmatprep.mubr.bf16.mxu0 %v3237_v43  ;;  %1436 = vmatprep.mubr.bf16.mxu1 %v3239_v44 }
 0x12b   :  { %2946 = vst [vmem:[%s3923_s2 + $0x10] sm:$0xff] %v2638_v51   ;;  %2978 = vst [vmem:[%s3923_s2 + $0x110] sm:$0xff] %v2798_v52  }
 0x12c   :  { %v966_v53 = vpop.f32.mrb[12].mxu0  ;;  %v1222_v54 = vpop.f32.mrb[12].mxu1 }
 0x12d   :  { %v968_v55 = vpop.f32.mrb[13].mxu0  ;;  %v1224_v56 = vpop.f32.mrb[13].mxu1  ;;  %v1459_v63 = vmax.f32 %v966_v53, 0.0  ;;  %v1523_v0 = vmax.f32 %v1222_v54, 0.0 }
 0x12e   :  { %v969_v59 = vpop.f32.mrb[14].mxu0  ;;  %v1225_v60 = vpop.f32.mrb[14].mxu1 }
 0x12f   :  { %v1460_v1 = vmax.f32 %v969_v59, 0.0  ;;  %v1524_v2 = vmax.f32 %v1225_v60, 0.0  ;;  %v971_v3 = vpop.f32.mrb[15].mxu0  ;;  %v1227_v4 = vpop.f32.mrb[15].mxu1 }
 0x131   :  { %v2643_v5 = vpack.c.bf16 %v1460_v1, %v1459_v63  ;;  %v2803_v6 = vpack.c.bf16 %v1524_v2, %v1523_v0  ;;  %1181 = vmatmul.mubr.bf16.gmra.mrb[120].mxu0 %v3241_v57  ;;  %1437 = vmatmul.mubr.bf16.gmra.mrb[120].mxu1 %v3242_v58 }
 0x132   :  { %1188 = vmatprep.mubr.bf16.mxu0 %v3243_v61  ;;  %1444 = vmatprep.mubr.bf16.mxu1 %v3245_v62 }
 0x133   :  { %2947 = vst [vmem:[%s3923_s2 + $0x18] sm:$0xff] %v2643_v5   ;;  %2979 = vst [vmem:[%s3923_s2 + $0x118] sm:$0xff] %v2803_v6  }
 0x134   :  { %v974_v7 = vpop.f32.mrb[16].mxu0  ;;  %v1230_v8 = vpop.f32.mrb[16].mxu1 }
 0x135   :  { %v976_v9 = vpop.f32.mrb[17].mxu0  ;;  %v1232_v10 = vpop.f32.mrb[17].mxu1  ;;  %v1461_v15 = vmax.f32 %v974_v7, 0.0  ;;  %v1525_v16 = vmax.f32 %v1230_v8, 0.0 }
 0x136   :  { %v977_v13 = vpop.f32.mrb[18].mxu0  ;;  %v1233_v14 = vpop.f32.mrb[18].mxu1 }
 0x137   :  { %v1462_v17 = vmax.f32 %v977_v13, 0.0  ;;  %v1526_v18 = vmax.f32 %v1233_v14, 0.0  ;;  %v979_v19 = vpop.f32.mrb[19].mxu0  ;;  %v1235_v20 = vpop.f32.mrb[19].mxu1 }
 0x139   :  { %v2648_v21 = vpack.c.bf16 %v1462_v17, %v1461_v15  ;;  %v2808_v22 = vpack.c.bf16 %v1526_v18, %v1525_v16  ;;  %1189 = vmatmul.mubr.bf16.gmra.mrb[124].mxu0 %v3247_v11  ;;  %1445 = vmatmul.mubr.bf16.gmra.mrb[124].mxu1 %v3248_v12 }
 0x13b   :  { %2948 = vst [vmem:[%s3923_s2 + $0x20] sm:$0xff] %v2648_v21   ;;  %2980 = vst [vmem:[%s3923_s2 + $0x120] sm:$0xff] %v2808_v22  }
 0x13c   :  { %v982_v23 = vpop.f32.mrb[20].mxu0  ;;  %v1238_v24 = vpop.f32.mrb[20].mxu1 }
 0x13d   :  { %v984_v25 = vpop.f32.mrb[21].mxu0  ;;  %v1240_v26 = vpop.f32.mrb[21].mxu1  ;;  %v1463_v29 = vmax.f32 %v982_v23, 0.0  ;;  %v1527_v30 = vmax.f32 %v1238_v24, 0.0 }
 0x13e   :  { %v985_v27 = vpop.f32.mrb[22].mxu0  ;;  %v1241_v28 = vpop.f32.mrb[22].mxu1 }
 0x13f   :  { %v1464_v31 = vmax.f32 %v985_v27, 0.0  ;;  %v1528_v32 = vmax.f32 %v1241_v28, 0.0  ;;  %v987_v33 = vpop.f32.mrb[23].mxu0  ;;  %v1243_v34 = vpop.f32.mrb[23].mxu1 }
 0x141   :  { %v2653_v35 = vpack.c.bf16 %v1464_v31, %v1463_v29  ;;  %v2813_v36 = vpack.c.bf16 %v1528_v32, %v1527_v30 }
 0x143   :  { %2949 = vst [vmem:[%s3923_s2 + $0x28] sm:$0xff] %v2653_v35   ;;  %2981 = vst [vmem:[%s3923_s2 + $0x128] sm:$0xff] %v2813_v36  }
 0x144   :  { %v990_v37 = vpop.f32.mrb[24].mxu0  ;;  %v1246_v38 = vpop.f32.mrb[24].mxu1 }
 0x145   :  { %v992_v39 = vpop.f32.mrb[25].mxu0  ;;  %v1248_v40 = vpop.f32.mrb[25].mxu1  ;;  %v1465_v43 = vmax.f32 %v990_v37, 0.0  ;;  %v1529_v44 = vmax.f32 %v1246_v38, 0.0 }
 0x146   :  { %v993_v41 = vpop.f32.mrb[26].mxu0  ;;  %v1249_v42 = vpop.f32.mrb[26].mxu1 }
 0x147   :  { %v1466_v45 = vmax.f32 %v993_v41, 0.0  ;;  %v1530_v46 = vmax.f32 %v1249_v42, 0.0  ;;  %v995_v47 = vpop.f32.mrb[27].mxu0  ;;  %v1251_v48 = vpop.f32.mrb[27].mxu1 }
 0x149   :  { %v2658_v49 = vpack.c.bf16 %v1466_v45, %v1465_v43  ;;  %v2818_v50 = vpack.c.bf16 %v1530_v46, %v1529_v44 }
 0x14b   :  { %2950 = vst [vmem:[%s3923_s2 + $0x30] sm:$0xff] %v2658_v49   ;;  %2982 = vst [vmem:[%s3923_s2 + $0x130] sm:$0xff] %v2818_v50  }
 0x14c   :  { %v998_v51 = vpop.f32.mrb[28].mxu0  ;;  %v1254_v52 = vpop.f32.mrb[28].mxu1 }
 0x14d   :  { %v1000_v53 = vpop.f32.mrb[29].mxu0  ;;  %v1256_v54 = vpop.f32.mrb[29].mxu1  ;;  %v1467_v57 = vmax.f32 %v998_v51, 0.0  ;;  %v1531_v58 = vmax.f32 %v1254_v52, 0.0 }
 0x14e   :  { %v1001_v55 = vpop.f32.mrb[30].mxu0  ;;  %v1257_v56 = vpop.f32.mrb[30].mxu1 }
 0x14f   :  { %v1468_v59 = vmax.f32 %v1001_v55, 0.0  ;;  %v1532_v60 = vmax.f32 %v1257_v56, 0.0  ;;  %v1003_v61 = vpop.f32.mrb[31].mxu0  ;;  %v1259_v62 = vpop.f32.mrb[31].mxu1 }
 0x151   :  { %v2663_v63 = vpack.c.bf16 %v1468_v59, %v1467_v57  ;;  %v2823_v0 = vpack.c.bf16 %v1532_v60, %v1531_v58 }
 0x153   :  { %2951 = vst [vmem:[%s3923_s2 + $0x38] sm:$0xff] %v2663_v63   ;;  %2983 = vst [vmem:[%s3923_s2 + $0x138] sm:$0xff] %v2823_v0  }
 0x154   :  { %v1006_v1 = vpop.f32.mrb[32].mxu0  ;;  %v1262_v2 = vpop.f32.mrb[32].mxu1 }
 0x155   :  { %v1008_v3 = vpop.f32.mrb[33].mxu0  ;;  %v1264_v4 = vpop.f32.mrb[33].mxu1  ;;  %v1469_v7 = vmax.f32 %v1006_v1, 0.0  ;;  %v1533_v8 = vmax.f32 %v1262_v2, 0.0 }
 0x156   :  { %v1009_v5 = vpop.f32.mrb[34].mxu0  ;;  %v1265_v6 = vpop.f32.mrb[34].mxu1 }
 0x157   :  { %v1470_v9 = vmax.f32 %v1009_v5, 0.0  ;;  %v1534_v10 = vmax.f32 %v1265_v6, 0.0  ;;  %v1011_v11 = vpop.f32.mrb[35].mxu0  ;;  %v1267_v12 = vpop.f32.mrb[35].mxu1 }
 0x159   :  { %v2668_v13 = vpack.c.bf16 %v1470_v9, %v1469_v7  ;;  %v2828_v14 = vpack.c.bf16 %v1534_v10, %v1533_v8 }
 0x15b   :  { %2952 = vst [vmem:[%s3923_s2 + $0x40] sm:$0xff] %v2668_v13   ;;  %2984 = vst [vmem:[%s3923_s2 + $0x140] sm:$0xff] %v2828_v14  }
 0x15c   :  { %v1014_v15 = vpop.f32.mrb[36].mxu0  ;;  %v1270_v16 = vpop.f32.mrb[36].mxu1 }
 0x15d   :  { %v1016_v17 = vpop.f32.mrb[37].mxu0  ;;  %v1272_v18 = vpop.f32.mrb[37].mxu1  ;;  %v1471_v21 = vmax.f32 %v1014_v15, 0.0  ;;  %v1535_v22 = vmax.f32 %v1270_v16, 0.0 }
 0x15e   :  { %v1017_v19 = vpop.f32.mrb[38].mxu0  ;;  %v1273_v20 = vpop.f32.mrb[38].mxu1 }
 0x15f   :  { %v1472_v23 = vmax.f32 %v1017_v19, 0.0  ;;  %v1536_v24 = vmax.f32 %v1273_v20, 0.0  ;;  %v1019_v25 = vpop.f32.mrb[39].mxu0  ;;  %v1275_v26 = vpop.f32.mrb[39].mxu1 }
 0x161   :  { %v2673_v27 = vpack.c.bf16 %v1472_v23, %v1471_v21  ;;  %v2833_v28 = vpack.c.bf16 %v1536_v24, %v1535_v22 }
 0x163   :  { %2953 = vst [vmem:[%s3923_s2 + $0x48] sm:$0xff] %v2673_v27   ;;  %2985 = vst [vmem:[%s3923_s2 + $0x148] sm:$0xff] %v2833_v28  }
 0x164   :  { %v1022_v29 = vpop.f32.mrb[40].mxu0  ;;  %v1278_v30 = vpop.f32.mrb[40].mxu1 }
 0x165   :  { %v1024_v31 = vpop.f32.mrb[41].mxu0  ;;  %v1280_v32 = vpop.f32.mrb[41].mxu1  ;;  %v1473_v35 = vmax.f32 %v1022_v29, 0.0  ;;  %v1537_v36 = vmax.f32 %v1278_v30, 0.0 }
 0x166   :  { %v1025_v33 = vpop.f32.mrb[42].mxu0  ;;  %v1281_v34 = vpop.f32.mrb[42].mxu1 }
 0x167   :  { %v1474_v37 = vmax.f32 %v1025_v33, 0.0  ;;  %v1538_v38 = vmax.f32 %v1281_v34, 0.0  ;;  %v1027_v39 = vpop.f32.mrb[43].mxu0  ;;  %v1283_v40 = vpop.f32.mrb[43].mxu1 }
 0x169   :  { %v2678_v41 = vpack.c.bf16 %v1474_v37, %v1473_v35  ;;  %v2838_v42 = vpack.c.bf16 %v1538_v38, %v1537_v36 }
 0x16b   :  { %2954 = vst [vmem:[%s3923_s2 + $0x50] sm:$0xff] %v2678_v41   ;;  %2986 = vst [vmem:[%s3923_s2 + $0x150] sm:$0xff] %v2838_v42  }
 0x16c   :  { %v1030_v43 = vpop.f32.mrb[44].mxu0  ;;  %v1286_v44 = vpop.f32.mrb[44].mxu1 }
 0x16d   :  { %v1032_v45 = vpop.f32.mrb[45].mxu0  ;;  %v1288_v46 = vpop.f32.mrb[45].mxu1  ;;  %v1475_v49 = vmax.f32 %v1030_v43, 0.0  ;;  %v1539_v50 = vmax.f32 %v1286_v44, 0.0 }
 0x16e   :  { %v1033_v47 = vpop.f32.mrb[46].mxu0  ;;  %v1289_v48 = vpop.f32.mrb[46].mxu1 }
 0x16f   :  { %v1476_v51 = vmax.f32 %v1033_v47, 0.0  ;;  %v1540_v52 = vmax.f32 %v1289_v48, 0.0  ;;  %v1035_v53 = vpop.f32.mrb[47].mxu0  ;;  %v1291_v54 = vpop.f32.mrb[47].mxu1 }
 0x171   :  { %v2683_v55 = vpack.c.bf16 %v1476_v51, %v1475_v49  ;;  %v2843_v56 = vpack.c.bf16 %v1540_v52, %v1539_v50 }
 0x173   :  { %2955 = vst [vmem:[%s3923_s2 + $0x58] sm:$0xff] %v2683_v55   ;;  %2987 = vst [vmem:[%s3923_s2 + $0x158] sm:$0xff] %v2843_v56  }
 0x174   :  { %v1038_v57 = vpop.f32.mrb[48].mxu0  ;;  %v1294_v58 = vpop.f32.mrb[48].mxu1 }
 0x175   :  { %v1040_v59 = vpop.f32.mrb[49].mxu0  ;;  %v1296_v60 = vpop.f32.mrb[49].mxu1  ;;  %v1477_v63 = vmax.f32 %v1038_v57, 0.0  ;;  %v1541_v0 = vmax.f32 %v1294_v58, 0.0 }
 0x176   :  { %v1041_v61 = vpop.f32.mrb[50].mxu0  ;;  %v1297_v62 = vpop.f32.mrb[50].mxu1 }
 0x177   :  { %v1478_v1 = vmax.f32 %v1041_v61, 0.0  ;;  %v1542_v2 = vmax.f32 %v1297_v62, 0.0  ;;  %v1043_v3 = vpop.f32.mrb[51].mxu0  ;;  %v1299_v4 = vpop.f32.mrb[51].mxu1 }
 0x179   :  { %v2688_v5 = vpack.c.bf16 %v1478_v1, %v1477_v63  ;;  %v2848_v6 = vpack.c.bf16 %v1542_v2, %v1541_v0 }
 0x17b   :  { %2956 = vst [vmem:[%s3923_s2 + $0x60] sm:$0xff] %v2688_v5   ;;  %2988 = vst [vmem:[%s3923_s2 + $0x160] sm:$0xff] %v2848_v6  }
 0x17c   :  { %v1046_v7 = vpop.f32.mrb[52].mxu0  ;;  %v1302_v8 = vpop.f32.mrb[52].mxu1 }
 0x17d   :  { %v1048_v9 = vpop.f32.mrb[53].mxu0  ;;  %v1304_v10 = vpop.f32.mrb[53].mxu1  ;;  %v1479_v13 = vmax.f32 %v1046_v7, 0.0  ;;  %v1543_v14 = vmax.f32 %v1302_v8, 0.0 }
 0x17e   :  { %v1049_v11 = vpop.f32.mrb[54].mxu0  ;;  %v1305_v12 = vpop.f32.mrb[54].mxu1 }
 0x17f   :  { %v1480_v15 = vmax.f32 %v1049_v11, 0.0  ;;  %v1544_v16 = vmax.f32 %v1305_v12, 0.0  ;;  %v1051_v17 = vpop.f32.mrb[55].mxu0  ;;  %v1307_v18 = vpop.f32.mrb[55].mxu1 }
 0x181   :  { %v2693_v19 = vpack.c.bf16 %v1480_v15, %v1479_v13  ;;  %v2853_v20 = vpack.c.bf16 %v1544_v16, %v1543_v14 }
 0x183   :  { %2957 = vst [vmem:[%s3923_s2 + $0x68] sm:$0xff] %v2693_v19   ;;  %2989 = vst [vmem:[%s3923_s2 + $0x168] sm:$0xff] %v2853_v20  }
 0x184   :  { %v1054_v21 = vpop.f32.mrb[56].mxu0  ;;  %v1310_v22 = vpop.f32.mrb[56].mxu1 }
 0x185   :  { %v1056_v23 = vpop.f32.mrb[57].mxu0  ;;  %v1312_v24 = vpop.f32.mrb[57].mxu1  ;;  %v1481_v27 = vmax.f32 %v1054_v21, 0.0  ;;  %v1545_v28 = vmax.f32 %v1310_v22, 0.0 }
 0x186   :  { %v1057_v25 = vpop.f32.mrb[58].mxu0  ;;  %v1313_v26 = vpop.f32.mrb[58].mxu1 }
 0x187   :  { %v1482_v29 = vmax.f32 %v1057_v25, 0.0  ;;  %v1546_v30 = vmax.f32 %v1313_v26, 0.0  ;;  %v1059_v31 = vpop.f32.mrb[59].mxu0  ;;  %v1315_v32 = vpop.f32.mrb[59].mxu1 }
 0x189   :  { %v2698_v33 = vpack.c.bf16 %v1482_v29, %v1481_v27  ;;  %v2858_v34 = vpack.c.bf16 %v1546_v30, %v1545_v28 }
 0x18b   :  { %2958 = vst [vmem:[%s3923_s2 + $0x70] sm:$0xff] %v2698_v33   ;;  %2990 = vst [vmem:[%s3923_s2 + $0x170] sm:$0xff] %v2858_v34  }
 0x18c   :  { %v1062_v35 = vpop.f32.mrb[60].mxu0  ;;  %v1318_v36 = vpop.f32.mrb[60].mxu1 }
 0x18d   :  { %v1064_v37 = vpop.f32.mrb[61].mxu0  ;;  %v1320_v38 = vpop.f32.mrb[61].mxu1  ;;  %v1483_v41 = vmax.f32 %v1062_v35, 0.0  ;;  %v1547_v42 = vmax.f32 %v1318_v36, 0.0 }
 0x18e   :  { %v1065_v39 = vpop.f32.mrb[62].mxu0  ;;  %v1321_v40 = vpop.f32.mrb[62].mxu1 }
 0x18f   :  { %v1484_v43 = vmax.f32 %v1065_v39, 0.0  ;;  %v1548_v44 = vmax.f32 %v1321_v40, 0.0  ;;  %v1067_v45 = vpop.f32.mrb[63].mxu0  ;;  %v1323_v46 = vpop.f32.mrb[63].mxu1 }
 0x191   :  { %v2703_v47 = vpack.c.bf16 %v1484_v43, %v1483_v41  ;;  %v2863_v48 = vpack.c.bf16 %v1548_v44, %v1547_v42 }
 0x193   :  { %2959 = vst [vmem:[%s3923_s2 + $0x78] sm:$0xff] %v2703_v47   ;;  %2991 = vst [vmem:[%s3923_s2 + $0x178] sm:$0xff] %v2863_v48  }
 0x194   :  { %v1070_v49 = vpop.f32.mrb[64].mxu0  ;;  %v1326_v50 = vpop.f32.mrb[64].mxu1 }
 0x195   :  { %v1072_v51 = vpop.f32.mrb[65].mxu0  ;;  %v1328_v52 = vpop.f32.mrb[65].mxu1  ;;  %v1485_v55 = vmax.f32 %v1070_v49, 0.0  ;;  %v1549_v56 = vmax.f32 %v1326_v50, 0.0 }
 0x196   :  { %v1073_v53 = vpop.f32.mrb[66].mxu0  ;;  %v1329_v54 = vpop.f32.mrb[66].mxu1 }
 0x197   :  { %v1486_v57 = vmax.f32 %v1073_v53, 0.0  ;;  %v1550_v58 = vmax.f32 %v1329_v54, 0.0  ;;  %v1075_v59 = vpop.f32.mrb[67].mxu0  ;;  %v1331_v60 = vpop.f32.mrb[67].mxu1 }
 0x199   :  { %v2708_v61 = vpack.c.bf16 %v1486_v57, %v1485_v55  ;;  %v2868_v62 = vpack.c.bf16 %v1550_v58, %v1549_v56 }
 0x19b   :  { %2960 = vst [vmem:[%s3923_s2 + $0x80] sm:$0xff] %v2708_v61   ;;  %2992 = vst [vmem:[%s3923_s2 + $0x180] sm:$0xff] %v2868_v62  }
 0x19c   :  { %v1078_v63 = vpop.f32.mrb[68].mxu0  ;;  %v1334_v0 = vpop.f32.mrb[68].mxu1 }
 0x19d   :  { %v1080_v1 = vpop.f32.mrb[69].mxu0  ;;  %v1336_v2 = vpop.f32.mrb[69].mxu1  ;;  %v1487_v5 = vmax.f32 %v1078_v63, 0.0  ;;  %v1551_v6 = vmax.f32 %v1334_v0, 0.0 }
 0x19e   :  { %v1081_v3 = vpop.f32.mrb[70].mxu0  ;;  %v1337_v4 = vpop.f32.mrb[70].mxu1 }
 0x19f   :  { %v1488_v7 = vmax.f32 %v1081_v3, 0.0  ;;  %v1552_v8 = vmax.f32 %v1337_v4, 0.0  ;;  %v1083_v9 = vpop.f32.mrb[71].mxu0  ;;  %v1339_v10 = vpop.f32.mrb[71].mxu1 }
 0x1a1   :  { %v2713_v11 = vpack.c.bf16 %v1488_v7, %v1487_v5  ;;  %v2873_v12 = vpack.c.bf16 %v1552_v8, %v1551_v6 }
 0x1a3   :  { %2961 = vst [vmem:[%s3923_s2 + $0x88] sm:$0xff] %v2713_v11   ;;  %2993 = vst [vmem:[%s3923_s2 + $0x188] sm:$0xff] %v2873_v12  }
 0x1a4   :  { %v1086_v13 = vpop.f32.mrb[72].mxu0  ;;  %v1342_v14 = vpop.f32.mrb[72].mxu1 }
 0x1a5   :  { %v1088_v15 = vpop.f32.mrb[73].mxu0  ;;  %v1344_v16 = vpop.f32.mrb[73].mxu1  ;;  %v1489_v19 = vmax.f32 %v1086_v13, 0.0  ;;  %v1553_v20 = vmax.f32 %v1342_v14, 0.0 }
 0x1a6   :  { %v1089_v17 = vpop.f32.mrb[74].mxu0  ;;  %v1345_v18 = vpop.f32.mrb[74].mxu1 }
 0x1a7   :  { %v1490_v21 = vmax.f32 %v1089_v17, 0.0  ;;  %v1554_v22 = vmax.f32 %v1345_v18, 0.0  ;;  %v1091_v23 = vpop.f32.mrb[75].mxu0  ;;  %v1347_v24 = vpop.f32.mrb[75].mxu1 }
 0x1a9   :  { %v2718_v25 = vpack.c.bf16 %v1490_v21, %v1489_v19  ;;  %v2878_v26 = vpack.c.bf16 %v1554_v22, %v1553_v20 }
 0x1ab   :  { %2962 = vst [vmem:[%s3923_s2 + $0x90] sm:$0xff] %v2718_v25   ;;  %2994 = vst [vmem:[%s3923_s2 + $0x190] sm:$0xff] %v2878_v26  }
 0x1ac   :  { %v1094_v27 = vpop.f32.mrb[76].mxu0  ;;  %v1350_v28 = vpop.f32.mrb[76].mxu1 }
 0x1ad   :  { %v1096_v29 = vpop.f32.mrb[77].mxu0  ;;  %v1352_v30 = vpop.f32.mrb[77].mxu1  ;;  %v1491_v33 = vmax.f32 %v1094_v27, 0.0  ;;  %v1555_v34 = vmax.f32 %v1350_v28, 0.0 }
 0x1ae   :  { %v1097_v31 = vpop.f32.mrb[78].mxu0  ;;  %v1353_v32 = vpop.f32.mrb[78].mxu1 }
 0x1af   :  { %v1492_v35 = vmax.f32 %v1097_v31, 0.0  ;;  %v1556_v36 = vmax.f32 %v1353_v32, 0.0  ;;  %v1099_v37 = vpop.f32.mrb[79].mxu0  ;;  %v1355_v38 = vpop.f32.mrb[79].mxu1 }
 0x1b1   :  { %v2723_v39 = vpack.c.bf16 %v1492_v35, %v1491_v33  ;;  %v2883_v40 = vpack.c.bf16 %v1556_v36, %v1555_v34 }
 0x1b3   :  { %2963 = vst [vmem:[%s3923_s2 + $0x98] sm:$0xff] %v2723_v39   ;;  %2995 = vst [vmem:[%s3923_s2 + $0x198] sm:$0xff] %v2883_v40  }
 0x1b4   :  { %v1102_v41 = vpop.f32.mrb[80].mxu0  ;;  %v1358_v42 = vpop.f32.mrb[80].mxu1 }
 0x1b5   :  { %v1104_v43 = vpop.f32.mrb[81].mxu0  ;;  %v1360_v44 = vpop.f32.mrb[81].mxu1  ;;  %v1493_v47 = vmax.f32 %v1102_v41, 0.0  ;;  %v1557_v48 = vmax.f32 %v1358_v42, 0.0 }
 0x1b6   :  { %v1105_v45 = vpop.f32.mrb[82].mxu0  ;;  %v1361_v46 = vpop.f32.mrb[82].mxu1 }
 0x1b7   :  { %v1494_v49 = vmax.f32 %v1105_v45, 0.0  ;;  %v1558_v50 = vmax.f32 %v1361_v46, 0.0  ;;  %v1107_v51 = vpop.f32.mrb[83].mxu0  ;;  %v1363_v52 = vpop.f32.mrb[83].mxu1 }
 0x1b9   :  { %v2728_v53 = vpack.c.bf16 %v1494_v49, %v1493_v47  ;;  %v2888_v54 = vpack.c.bf16 %v1558_v50, %v1557_v48 }
 0x1bb   :  { %2964 = vst [vmem:[%s3923_s2 + $0xa0] sm:$0xff] %v2728_v53   ;;  %2996 = vst [vmem:[%s3923_s2 + $0x1a0] sm:$0xff] %v2888_v54  }
 0x1bc   :  { %v1110_v55 = vpop.f32.mrb[84].mxu0  ;;  %v1366_v56 = vpop.f32.mrb[84].mxu1 }
 0x1bd   :  { %v1112_v57 = vpop.f32.mrb[85].mxu0  ;;  %v1368_v58 = vpop.f32.mrb[85].mxu1  ;;  %v1495_v61 = vmax.f32 %v1110_v55, 0.0  ;;  %v1559_v62 = vmax.f32 %v1366_v56, 0.0 }
 0x1be   :  { %v1113_v59 = vpop.f32.mrb[86].mxu0  ;;  %v1369_v60 = vpop.f32.mrb[86].mxu1 }
 0x1bf   :  { %v1496_v63 = vmax.f32 %v1113_v59, 0.0  ;;  %v1560_v0 = vmax.f32 %v1369_v60, 0.0  ;;  %v1115_v1 = vpop.f32.mrb[87].mxu0  ;;  %v1371_v2 = vpop.f32.mrb[87].mxu1 }
 0x1c1   :  { %v2733_v3 = vpack.c.bf16 %v1496_v63, %v1495_v61  ;;  %v2893_v4 = vpack.c.bf16 %v1560_v0, %v1559_v62 }
 0x1c3   :  { %2965 = vst [vmem:[%s3923_s2 + $0xa8] sm:$0xff] %v2733_v3   ;;  %2997 = vst [vmem:[%s3923_s2 + $0x1a8] sm:$0xff] %v2893_v4  }
 0x1c4   :  { %v1118_v5 = vpop.f32.mrb[88].mxu0  ;;  %v1374_v6 = vpop.f32.mrb[88].mxu1 }
 0x1c5   :  { %v1120_v7 = vpop.f32.mrb[89].mxu0  ;;  %v1376_v8 = vpop.f32.mrb[89].mxu1  ;;  %v1497_v11 = vmax.f32 %v1118_v5, 0.0  ;;  %v1561_v12 = vmax.f32 %v1374_v6, 0.0 }
 0x1c6   :  { %v1121_v9 = vpop.f32.mrb[90].mxu0  ;;  %v1377_v10 = vpop.f32.mrb[90].mxu1 }
 0x1c7   :  { %v1498_v13 = vmax.f32 %v1121_v9, 0.0  ;;  %v1562_v14 = vmax.f32 %v1377_v10, 0.0  ;;  %v1123_v15 = vpop.f32.mrb[91].mxu0  ;;  %v1379_v16 = vpop.f32.mrb[91].mxu1 }
 0x1c9   :  { %v2738_v17 = vpack.c.bf16 %v1498_v13, %v1497_v11  ;;  %v2898_v18 = vpack.c.bf16 %v1562_v14, %v1561_v12 }
 0x1cb   :  { %2966 = vst [vmem:[%s3923_s2 + $0xb0] sm:$0xff] %v2738_v17   ;;  %2998 = vst [vmem:[%s3923_s2 + $0x1b0] sm:$0xff] %v2898_v18  }
 0x1cc   :  { %v1126_v19 = vpop.f32.mrb[92].mxu0  ;;  %v1382_v20 = vpop.f32.mrb[92].mxu1 }
 0x1cd   :  { %v1128_v21 = vpop.f32.mrb[93].mxu0  ;;  %v1384_v22 = vpop.f32.mrb[93].mxu1  ;;  %v1499_v25 = vmax.f32 %v1126_v19, 0.0  ;;  %v1563_v26 = vmax.f32 %v1382_v20, 0.0 }
 0x1ce   :  { %v1129_v23 = vpop.f32.mrb[94].mxu0  ;;  %v1385_v24 = vpop.f32.mrb[94].mxu1 }
 0x1cf   :  { %v1500_v27 = vmax.f32 %v1129_v23, 0.0  ;;  %v1564_v28 = vmax.f32 %v1385_v24, 0.0  ;;  %v1131_v29 = vpop.f32.mrb[95].mxu0  ;;  %v1387_v30 = vpop.f32.mrb[95].mxu1 }
 0x1d1   :  { %v2743_v31 = vpack.c.bf16 %v1500_v27, %v1499_v25  ;;  %v2903_v32 = vpack.c.bf16 %v1564_v28, %v1563_v26 }
 0x1d3   :  { %2967 = vst [vmem:[%s3923_s2 + $0xb8] sm:$0xff] %v2743_v31   ;;  %2999 = vst [vmem:[%s3923_s2 + $0x1b8] sm:$0xff] %v2903_v32  }
 0x1d4   :  { %v1134_v33 = vpop.f32.mrb[96].mxu0  ;;  %v1390_v34 = vpop.f32.mrb[96].mxu1 }
 0x1d5   :  { %v1136_v35 = vpop.f32.mrb[97].mxu0  ;;  %v1392_v36 = vpop.f32.mrb[97].mxu1  ;;  %v1501_v39 = vmax.f32 %v1134_v33, 0.0  ;;  %v1565_v40 = vmax.f32 %v1390_v34, 0.0 }
 0x1d6   :  { %v1137_v37 = vpop.f32.mrb[98].mxu0  ;;  %v1393_v38 = vpop.f32.mrb[98].mxu1 }
 0x1d7   :  { %v1502_v41 = vmax.f32 %v1137_v37, 0.0  ;;  %v1566_v42 = vmax.f32 %v1393_v38, 0.0  ;;  %v1139_v43 = vpop.f32.mrb[99].mxu0  ;;  %v1395_v44 = vpop.f32.mrb[99].mxu1 }
 0x1d9   :  { %v2748_v45 = vpack.c.bf16 %v1502_v41, %v1501_v39  ;;  %v2908_v46 = vpack.c.bf16 %v1566_v42, %v1565_v40 }
 0x1db   :  { %2968 = vst [vmem:[%s3923_s2 + $0xc0] sm:$0xff] %v2748_v45   ;;  %3000 = vst [vmem:[%s3923_s2 + $0x1c0] sm:$0xff] %v2908_v46  }
 0x1dc   :  { %v1142_v47 = vpop.f32.mrb[100].mxu0  ;;  %v1398_v48 = vpop.f32.mrb[100].mxu1 }
 0x1dd   :  { %v1144_v49 = vpop.f32.mrb[101].mxu0  ;;  %v1400_v50 = vpop.f32.mrb[101].mxu1  ;;  %v1503_v53 = vmax.f32 %v1142_v47, 0.0  ;;  %v1567_v54 = vmax.f32 %v1398_v48, 0.0 }
 0x1de   :  { %v1145_v51 = vpop.f32.mrb[102].mxu0  ;;  %v1401_v52 = vpop.f32.mrb[102].mxu1 }
 0x1df   :  { %v1504_v55 = vmax.f32 %v1145_v51, 0.0  ;;  %v1568_v56 = vmax.f32 %v1401_v52, 0.0  ;;  %v1147_v57 = vpop.f32.mrb[103].mxu0  ;;  %v1403_v58 = vpop.f32.mrb[103].mxu1 }
 0x1e1   :  { %v2753_v59 = vpack.c.bf16 %v1504_v55, %v1503_v53  ;;  %v2913_v60 = vpack.c.bf16 %v1568_v56, %v1567_v54 }
 0x1e3   :  { %2969 = vst [vmem:[%s3923_s2 + $0xc8] sm:$0xff] %v2753_v59   ;;  %3001 = vst [vmem:[%s3923_s2 + $0x1c8] sm:$0xff] %v2913_v60  }
 0x1e4   :  { %v1150_v61 = vpop.f32.mrb[104].mxu0  ;;  %v1406_v62 = vpop.f32.mrb[104].mxu1 }
 0x1e5   :  { %v1152_v63 = vpop.f32.mrb[105].mxu0  ;;  %v1408_v0 = vpop.f32.mrb[105].mxu1  ;;  %v1505_v3 = vmax.f32 %v1150_v61, 0.0  ;;  %v1569_v4 = vmax.f32 %v1406_v62, 0.0 }
 0x1e6   :  { %v1153_v1 = vpop.f32.mrb[106].mxu0  ;;  %v1409_v2 = vpop.f32.mrb[106].mxu1 }
 0x1e7   :  { %v1506_v5 = vmax.f32 %v1153_v1, 0.0  ;;  %v1570_v6 = vmax.f32 %v1409_v2, 0.0  ;;  %v1155_v7 = vpop.f32.mrb[107].mxu0  ;;  %v1411_v8 = vpop.f32.mrb[107].mxu1 }
 0x1e9   :  { %v2758_v9 = vpack.c.bf16 %v1506_v5, %v1505_v3  ;;  %v2918_v10 = vpack.c.bf16 %v1570_v6, %v1569_v4 }
 0x1eb   :  { %2970 = vst [vmem:[%s3923_s2 + $0xd0] sm:$0xff] %v2758_v9   ;;  %3002 = vst [vmem:[%s3923_s2 + $0x1d0] sm:$0xff] %v2918_v10  }
 0x1ec   :  { %v1158_v11 = vpop.f32.mrb[108].mxu0  ;;  %v1414_v12 = vpop.f32.mrb[108].mxu1 }
 0x1ed   :  { %v1160_v13 = vpop.f32.mrb[109].mxu0  ;;  %v1416_v14 = vpop.f32.mrb[109].mxu1  ;;  %v1507_v17 = vmax.f32 %v1158_v11, 0.0  ;;  %v1571_v18 = vmax.f32 %v1414_v12, 0.0 }
 0x1ee   :  { %v1161_v15 = vpop.f32.mrb[110].mxu0  ;;  %v1417_v16 = vpop.f32.mrb[110].mxu1 }
 0x1ef   :  { %v1508_v19 = vmax.f32 %v1161_v15, 0.0  ;;  %v1572_v20 = vmax.f32 %v1417_v16, 0.0  ;;  %v1163_v21 = vpop.f32.mrb[111].mxu0  ;;  %v1419_v22 = vpop.f32.mrb[111].mxu1 }
 0x1f1   :  { %v2763_v23 = vpack.c.bf16 %v1508_v19, %v1507_v17  ;;  %v2923_v24 = vpack.c.bf16 %v1572_v20, %v1571_v18 }
 0x1f3   :  { %2971 = vst [vmem:[%s3923_s2 + $0xd8] sm:$0xff] %v2763_v23   ;;  %3003 = vst [vmem:[%s3923_s2 + $0x1d8] sm:$0xff] %v2923_v24  }
 0x1f4   :  { %v1166_v25 = vpop.f32.mrb[112].mxu0  ;;  %v1422_v26 = vpop.f32.mrb[112].mxu1 }
 0x1f5   :  { %v1168_v27 = vpop.f32.mrb[113].mxu0  ;;  %v1424_v28 = vpop.f32.mrb[113].mxu1  ;;  %v1509_v31 = vmax.f32 %v1166_v25, 0.0  ;;  %v1573_v32 = vmax.f32 %v1422_v26, 0.0 }
 0x1f6   :  { %v1169_v29 = vpop.f32.mrb[114].mxu0  ;;  %v1425_v30 = vpop.f32.mrb[114].mxu1 }
 0x1f7   :  { %v1510_v33 = vmax.f32 %v1169_v29, 0.0  ;;  %v1574_v34 = vmax.f32 %v1425_v30, 0.0  ;;  %v1171_v35 = vpop.f32.mrb[115].mxu0  ;;  %v1427_v36 = vpop.f32.mrb[115].mxu1 }
 0x1f9   :  { %v2768_v37 = vpack.c.bf16 %v1510_v33, %v1509_v31  ;;  %v2928_v38 = vpack.c.bf16 %v1574_v34, %v1573_v32 }
 0x1fb   :  { %2972 = vst [vmem:[%s3923_s2 + $0xe0] sm:$0xff] %v2768_v37   ;;  %3004 = vst [vmem:[%s3923_s2 + $0x1e0] sm:$0xff] %v2928_v38  }
 0x1fc   :  { %v1174_v39 = vpop.f32.mrb[116].mxu0  ;;  %v1430_v40 = vpop.f32.mrb[116].mxu1 }
 0x1fd   :  { %v1176_v41 = vpop.f32.mrb[117].mxu0  ;;  %v1432_v42 = vpop.f32.mrb[117].mxu1  ;;  %v1511_v45 = vmax.f32 %v1174_v39, 0.0  ;;  %v1575_v46 = vmax.f32 %v1430_v40, 0.0 }
 0x1fe   :  { %v1177_v43 = vpop.f32.mrb[118].mxu0  ;;  %v1433_v44 = vpop.f32.mrb[118].mxu1 }
 0x1ff   :  { %v1512_v47 = vmax.f32 %v1177_v43, 0.0  ;;  %v1576_v48 = vmax.f32 %v1433_v44, 0.0  ;;  %v1179_v49 = vpop.f32.mrb[119].mxu0  ;;  %v1435_v50 = vpop.f32.mrb[119].mxu1 }
 0x201   :  { %v2773_v51 = vpack.c.bf16 %v1512_v47, %v1511_v45  ;;  %v2933_v52 = vpack.c.bf16 %v1576_v48, %v1575_v46 }
 0x203   :  { %2973 = vst [vmem:[%s3923_s2 + $0xe8] sm:$0xff] %v2773_v51   ;;  %3005 = vst [vmem:[%s3923_s2 + $0x1e8] sm:$0xff] %v2933_v52  }
 0x204   :  { %v1182_v53 = vpop.f32.mrb[120].mxu0  ;;  %v1438_v54 = vpop.f32.mrb[120].mxu1 }
 0x205   :  { %v1184_v55 = vpop.f32.mrb[121].mxu0  ;;  %v1440_v56 = vpop.f32.mrb[121].mxu1  ;;  %v1513_v59 = vmax.f32 %v1182_v53, 0.0  ;;  %v1577_v60 = vmax.f32 %v1438_v54, 0.0 }
 0x206   :  { %v1185_v57 = vpop.f32.mrb[122].mxu0  ;;  %v1441_v58 = vpop.f32.mrb[122].mxu1 }
 0x207   :  { %v1514_v61 = vmax.f32 %v1185_v57, 0.0  ;;  %v1578_v62 = vmax.f32 %v1441_v58, 0.0  ;;  %v1187_v63 = vpop.f32.mrb[123].mxu0  ;;  %v1443_v0 = vpop.f32.mrb[123].mxu1 }
 0x209   :  { %v2778_v1 = vpack.c.bf16 %v1514_v61, %v1513_v59  ;;  %v2938_v2 = vpack.c.bf16 %v1578_v62, %v1577_v60 }
 0x20b   :  { %2974 = vst [vmem:[%s3923_s2 + $0xf0] sm:$0xff] %v2778_v1   ;;  %3006 = vst [vmem:[%s3923_s2 + $0x1f0] sm:$0xff] %v2938_v2  }
 0x20c   :  { %v1190_v3 = vpop.f32.mrb[124].mxu0  ;;  %v1446_v4 = vpop.f32.mrb[124].mxu1 }
 0x20d   :  { %v1192_v5 = vpop.f32.mrb[125].mxu0  ;;  %v1448_v6 = vpop.f32.mrb[125].mxu1  ;;  %v1515_v9 = vmax.f32 %v1190_v3, 0.0  ;;  %v1579_v10 = vmax.f32 %v1446_v4, 0.0 }
 0x20e   :  { %v1193_v7 = vpop.f32.mrb[126].mxu0  ;;  %v1449_v8 = vpop.f32.mrb[126].mxu1 }
 0x20f   :  { %v1516_v11 = vmax.f32 %v1193_v7, 0.0  ;;  %v1580_v12 = vmax.f32 %v1449_v8, 0.0  ;;  %v1195_v13 = vpop.f32.mrb[127].mxu0  ;;  %v1451_v14 = vpop.f32.mrb[127].mxu1 }
 0x211   :  { %v2783_v15 = vpack.c.bf16 %v1516_v11, %v1515_v9  ;;  %v2943_v16 = vpack.c.bf16 %v1580_v12, %v1579_v10 }
 0x213   :  { %2975 = vst [vmem:[%s3923_s2 + $0xf8] sm:$0xff] %v2783_v15   ;;  %3007 = vst [vmem:[%s3923_s2 + $0x1f8] sm:$0xff] %v2943_v16  }

// kernel: squeeze.130
= control target key start
LH: loop header
LB: loop body
LE: loop exit
PB: predicated region body
PF: predicated region fallthrough
CT: control target
= control target key end

     0   :  { %s66_s8 = smov 116   ;;  %vm7_vm0 = vcmask 31744   ;;  %s67_s11 = smov 120   ;;  %s117_s0 = inlined_call_operand.vmem [shape: f32[32], index: 0, kind: input, shape index: {}]   ;;  %s118_s1 = inlined_call_operand.vmem [shape: f32[8,4], index: 1, kind: output, shape index: {}]  }
   0x1   :  { %v4_v0 = vld [vmem:[%s117_s0] sm:$0x1]  ;;  %s65_s0 = smov 124   ;;  %s68_s12 = smov 112  }
   0x2   :  { %5 = vst [vmem:[#allocation0] sm:$0x1] %v4_v0  ;;  %s69_s13 = smov 108   ;;  %s70_s14 = smov 104  }
   0x3   :  { %s71_s15 = smov 100  }
   0x9   :  { %v9_v1 = vld [vmem:[#allocation0] sm:$0x1]  }
   0xa   :  { %v21_v2 = vld [vmem:[#allocation0] sm:$0x1]   ;;  %10 = vrot.lane.b32.xlu0 %v9_v1, %s65_s0 }
   0xb   :  { %22 = vrot.lane.b32.xlu1 %v21_v2, %s66_s8  ;;  %v15_v3 = vld [vmem:[#allocation0] sm:$0x1]  }
   0xc   :  { %v27_v4 = vld [vmem:[#allocation0] sm:$0x1]  }
   0xd   :  { %v6_v5 = vld [vmem:[#allocation0] sm:$0x1]  }
   0xe   :  { %8 = vst.msk [vmem:[%s118_s1] sm:$0x1] %vm7_vm0, %v6_v5   ;;  %16 = vrot.lane.b32.xlu0 %v15_v3, %s67_s11  ;;  %v33_v6 = vld [vmem:[#allocation0] sm:$0x1]  }
   0xf   :  { %28 = vrot.lane.b32.xlu1 %v27_v4, %s68_s12  ;;  %v39_v7 = vld [vmem:[#allocation0] sm:$0x1]  }
  0x10   :  { %v45_v8 = vld [vmem:[#allocation0] sm:$0x1]  }
  0x12   :  { %34 = vrot.lane.b32.xlu0 %v33_v6, %s69_s13 }
  0x13   :  { %40 = vrot.lane.b32.xlu1 %v39_v7, %s70_s14 }
  0x16   :  { %46 = vrot.lane.b32.xlu0 %v45_v8, %s71_s15 }
  0x7c   :  { %v11_v9 = vpop.permute.xlu0 %10  }
  0x7d   :  { %v23_v10 = vpop.permute.xlu1 %22   ;;  %51 = vst.msk [vmem:[%s118_s1 + $0x1] sm:$0x1] %vm7_vm0, %v11_v9  }
  0x7e   :  { %53 = vst.msk [vmem:[%s118_s1 + $0x3] sm:$0x1] %vm7_vm0, %v23_v10  }
  0x80   :  { %v17_v11 = vpop.permute.xlu0 %16  }
  0x81   :  { %v29_v12 = vpop.permute.xlu1 %28   ;;  %52 = vst.msk [vmem:[%s118_s1 + $0x2] sm:$0x1] %vm7_vm0, %v17_v11  }
  0x82   :  { %54 = vst.msk [vmem:[%s118_s1 + $0x4] sm:$0x1] %vm7_vm0, %v29_v12  }
  0x84   :  { %v35_v13 = vpop.permute.xlu0 %34  }
  0x85   :  { %v41_v14 = vpop.permute.xlu1 %40   ;;  %55 = vst.msk [vmem:[%s118_s1 + $0x5] sm:$0x1] %vm7_vm0, %v35_v13  }
  0x86   :  { %56 = vst.msk [vmem:[%s118_s1 + $0x6] sm:$0x1] %vm7_vm0, %v41_v14  }
  0x88   :  { %v47_v15 = vpop.permute.xlu0 %46  }
  0x89   :  { %57 = vst.msk [vmem:[%s118_s1 + $0x7] sm:$0x1] %vm7_vm0, %v47_v15  }

// kernel: tile.18
= control target key start
LH: loop header
LB: loop body
LE: loop exit
PB: predicated region body
PF: predicated region fallthrough
CT: control target
= control target key end

     0   :  { %s22_s0 = inlined_call_operand.vmem [shape: f32[4], index: 0, kind: input, shape index: {}]   ;;  %s23_s1 = inlined_call_operand.vmem [shape: f32[8,4], index: 1, kind: output, shape index: {}]  }
   0x1   :  { %v4_v0 = vld [vmem:[%s22_s0] ss:$0 sm:$0xff] }
   0x2   :  { %5 = vst [vmem:[%s23_s1] sm:$0xff] %v4_v0 }

// kernel: tile.19
= control target key start
LH: loop header
LB: loop body
LE: loop exit
PB: predicated region body
PF: predicated region fallthrough
CT: control target
= control target key end

     0   :  { %s67_s10 = smov 28   ;;  %s68_s11 = smov 20   ;;  %vm3_vm0 = vcmask 31744   ;;  %vm9_vm1 = vcmask 261344   ;;  %vm15_vm2 = vcmask 228544   ;;  %vm21_vm3 = vcmask 195744   ;;  %s111_s0 = inlined_call_operand.vmem [shape: f32[8,4], index: 0, kind: input, shape index: {}]   ;;  %s112_s1 = inlined_call_operand.vmem [shape: f32[32], index: 1, kind: output, shape index: {}]  }
   0x1   :  { %v53_v0 = vld [vmem:[%s111_s0 + $0x7] sm:$0x1]   ;;  %v55_v1 = vld [vmem:[%s111_s0 + $0x5] sm:$0x1]   ;;  %v54_v2 = vld [vmem:[%s111_s0 + $0x6] sm:$0x1]  }
   0x2   :  { %7 = vrot.lane.b32.xlu0 %v53_v0, %s67_s10  ;;  %19 = vrot.lane.b32.xlu1 %v55_v1, %s68_s11  ;;  %v56_v3 = vld [vmem:[%s111_s0 + $0x4] sm:$0x1]   ;;  %v2_v4 = vld [vmem:[%s111_s0] sm:$0x1]   ;;  %s69_s18 = smov 24   ;;  %s70_s19 = smov 16  }
   0x3   :  { %4 = vst.msk [vmem:[#allocation0] sm:$0x1] %vm3_vm0, %v2_v4   ;;  %v57_v5 = vld [vmem:[%s111_s0 + $0x3] sm:$0x1]   ;;  %v58_v6 = vld [vmem:[%s111_s0 + $0x2] sm:$0x1]  }
   0x4   :  { %s71_s24 = smov 12   ;;  %s72_s25 = smov 8   ;;  %v59_v7 = vld [vmem:[%s111_s0 + $0x1] sm:$0x1]   ;;  %vm27_vm4 = vcmask 162944   ;;  %vm33_vm5 = vcmask 130144  }
   0x5   :  { %s73_s0 = smov 4   ;;  %vm39_vm6 = vcmask 97344   ;;  %vm45_vm7 = vcmask 64544  }
   0x6   :  { %13 = vrot.lane.b32.xlu0 %v54_v2, %s69_s18  ;;  %25 = vrot.lane.b32.xlu1 %v56_v3, %s70_s19 }
   0xa   :  { %31 = vrot.lane.b32.xlu0 %v57_v5, %s71_s24  ;;  %37 = vrot.lane.b32.xlu1 %v58_v6, %s72_s25 }
   0xe   :  { %43 = vrot.lane.b32.xlu0 %v59_v7, %s73_s0 }
  0x74   :  { %v8_v8 = vpop.permute.xlu0 %7   ;;  %v20_v9 = vpop.permute.xlu1 %19  }
  0x75   :  { %10 = vst.msk [vmem:[#allocation0] sm:$0x1] %vm9_vm1, %v8_v8  }
  0x78   :  { %v14_v10 = vpop.permute.xlu0 %13   ;;  %v26_v11 = vpop.permute.xlu1 %25  }
  0x79   :  { %16 = vst.msk [vmem:[#allocation0] sm:$0x1] %vm15_vm2, %v14_v10  }
  0x7a   :  { %22 = vst.msk [vmem:[#allocation0] sm:$0x1] %vm21_vm3, %v20_v9  }
  0x7b   :  { %28 = vst.msk [vmem:[#allocation0] sm:$0x1] %vm27_vm4, %v26_v11  }
  0x7c   :  { %v32_v12 = vpop.permute.xlu0 %31   ;;  %v38_v13 = vpop.permute.xlu1 %37  }
  0x7d   :  { %34 = vst.msk [vmem:[#allocation0] sm:$0x1] %vm33_vm5, %v32_v12  }
  0x7e   :  { %40 = vst.msk [vmem:[#allocation0] sm:$0x1] %vm39_vm6, %v38_v13  }
  0x80   :  { %v44_v14 = vpop.permute.xlu0 %43  }
  0x81   :  { %46 = vst.msk [vmem:[#allocation0] sm:$0x1] %vm45_vm7, %v44_v14  }
  0x88   :  { %v50_v15 = vld [vmem:[#allocation0] sm:$0x1] }
  0x89   :  { %52 = vst [vmem:[%s112_s1] sm:$0x1] %v50_v15 }

// kernel: unet_innermost_forward.4
= control target key start
LH: loop header
LB: loop body
LE: loop exit
PB: predicated region body
PF: predicated region fallthrough
CT: control target
= control target key end

     0   :  { %v3532_v0 = vmov 0   ;;  %vm2495_vm0 = vcmask 1040384   ;;  %s4603_s1 = inlined_call_operand.vmem [shape: bf16[256,128], index: 1, kind: input, shape index: {}]   ;;  %s4604_s0 = inlined_call_operand.vmem [shape: bf16[1024,256], index: 0, kind: input, shape index: {}]   ;;  %s4605_s2 = inlined_call_operand.vmem [shape: bf16[1024,128], index: 2, kind: output, shape index: {0}]   ;;  %s4606_s3 = inlined_call_operand.vmem [shape: f32[2,128], index: 3, kind: output, shape index: {1}]  }
   0x1   :  { %910 = vmatprep.subr.bf16.mxu0 %v3532_v0  ;;  %v3324_v1 = vld [vmem:[%s4603_s1] sm:$0xff]   ;;  %3290 = vmatprep.subr.bf16.mxu1 %v3532_v0  ;;  %v3325_v2 = vld [vmem:[%s4603_s1 + $0x8] sm:$0xff]   ;;  %v3326_v3 = vld [vmem:[%s4603_s1 + $0x10] sm:$0xff]  }
   0x2   :  { %911 = vmatpush1.bf16.msra.mxu0 %v3324_v1  ;;  %3306 = vmatpush1.bf16.msra.mxu1 %v3324_v1  ;;  %v3327_v4 = vld [vmem:[%s4603_s1 + $0x18] sm:$0xff]   ;;  %v3328_v5 = vld [vmem:[%s4603_s1 + $0x20] sm:$0xff]   ;;  %v3329_v7 = vld [vmem:[%s4603_s1 + $0x28] sm:$0xff]  }
   0x3   :  { %912 = vmatprep.subr.bf16.mxu0 %v3532_v0  ;;  %3291 = vmatprep.subr.bf16.mxu1 %v3532_v0  ;;  %v3342_v6 = vld [vmem:[%s4604_s0 + $0x4] ss:$8 sps:$4 sm:$0xff]   ;;  %v3330_v8 = vld [vmem:[%s4603_s1 + $0x30] sm:$0xff]   ;;  %v3331_v9 = vld [vmem:[%s4603_s1 + $0x38] sm:$0xff]  }
   0x4   :  { %942 = vmatprep.mubr.bf16.mxu0 %v3342_v6  ;;  %v3332_v10 = vld [vmem:[%s4603_s1 + $0x40] sm:$0xff]   ;;  %v3333_v11 = vld [vmem:[%s4603_s1 + $0x48] sm:$0xff]   ;;  %v3334_v12 = vld [vmem:[%s4603_s1 + $0x50] sm:$0xff]  }
   0x5   :  { %v3335_v13 = vld [vmem:[%s4603_s1 + $0x58] sm:$0xff]   ;;  %v3336_v14 = vld [vmem:[%s4603_s1 + $0x60] sm:$0xff]   ;;  %v3337_v15 = vld [vmem:[%s4603_s1 + $0x68] sm:$0xff]  }
   0x6   :  { %913 = vmatpush1.bf16.msra.mxu0 %v3325_v2  ;;  %3307 = vmatpush1.bf16.msra.mxu1 %v3325_v2  ;;  %v3338_v16 = vld [vmem:[%s4603_s1 + $0x70] sm:$0xff]   ;;  %v3390_v17 = vld [vmem:[%s4604_s0 + $0x204] ss:$8 sps:$4 sm:$0xff]   ;;  %v3339_v18 = vld [vmem:[%s4603_s1 + $0x78] sm:$0xff]  }
   0x7   :  { %914 = vmatprep.subr.bf16.mxu0 %v3532_v0  ;;  %3292 = vmatprep.subr.bf16.mxu1 %v3532_v0  ;;  %v3340_v19 = vld [vmem:[%s4604_s0] ss:$8 sps:$4 sm:$0xff]   ;;  %v3343_v21 = vld [vmem:[%s4604_s0 + $0x14] ss:$8 sps:$4 sm:$0xff]   ;;  %v3345_v23 = vld [vmem:[%s4604_s0 + $0x10] ss:$8 sps:$4 sm:$0xff]  }
   0x8   :  { %v3388_v20 = vld [vmem:[%s4604_s0 + $0x200] ss:$8 sps:$4 sm:$0xff]   ;;  %1198 = vmatprep.mubr.bf16.mxu1 %v3390_v17  ;;  %v3394_v22 = vld [vmem:[%s4604_s0 + $0x214] ss:$8 sps:$4 sm:$0xff]   ;;  %v3396_v24 = vld [vmem:[%s4604_s0 + $0x210] ss:$8 sps:$4 sm:$0xff]  }
   0x9   :  { %v3346_v25 = vld [vmem:[%s4604_s0 + $0x24] ss:$8 sps:$4 sm:$0xff]   ;;  %v3348_v27 = vld [vmem:[%s4604_s0 + $0x20] ss:$8 sps:$4 sm:$0xff]   ;;  %v3349_v29 = vld [vmem:[%s4604_s0 + $0x34] ss:$8 sps:$4 sm:$0xff]  }
   0xa   :  { %915 = vmatpush1.bf16.msra.mxu0 %v3326_v3  ;;  %3308 = vmatpush1.bf16.msra.mxu1 %v3326_v3  ;;  %v3400_v26 = vld [vmem:[%s4604_s0 + $0x224] ss:$8 sps:$4 sm:$0xff]   ;;  %v3402_v28 = vld [vmem:[%s4604_s0 + $0x220] ss:$8 sps:$4 sm:$0xff]   ;;  %v3406_v30 = vld [vmem:[%s4604_s0 + $0x234] ss:$8 sps:$4 sm:$0xff]  }
   0xb   :  { %916 = vmatprep.subr.bf16.mxu0 %v3532_v0  ;;  %3293 = vmatprep.subr.bf16.mxu1 %v3532_v0  ;;  %v3351_v31 = vld [vmem:[%s4604_s0 + $0x30] ss:$8 sps:$4 sm:$0xff]   ;;  %v3352_v33 = vld [vmem:[%s4604_s0 + $0x44] ss:$8 sps:$4 sm:$0xff]   ;;  %v3354_v35 = vld [vmem:[%s4604_s0 + $0x40] ss:$8 sps:$4 sm:$0xff]  }
   0xc   :  { %v3408_v32 = vld [vmem:[%s4604_s0 + $0x230] ss:$8 sps:$4 sm:$0xff]   ;;  %v3412_v34 = vld [vmem:[%s4604_s0 + $0x244] ss:$8 sps:$4 sm:$0xff]   ;;  %v3414_v36 = vld [vmem:[%s4604_s0 + $0x240] ss:$8 sps:$4 sm:$0xff]  }
   0xd   :  { %v3355_v37 = vld [vmem:[%s4604_s0 + $0x54] ss:$8 sps:$4 sm:$0xff]   ;;  %v3357_v39 = vld [vmem:[%s4604_s0 + $0x50] ss:$8 sps:$4 sm:$0xff]   ;;  %v3358_v41 = vld [vmem:[%s4604_s0 + $0x64] ss:$8 sps:$4 sm:$0xff]  }
   0xe   :  { %917 = vmatpush1.bf16.msra.mxu0 %v3327_v4  ;;  %3309 = vmatpush1.bf16.msra.mxu1 %v3327_v4  ;;  %v3418_v38 = vld [vmem:[%s4604_s0 + $0x254] ss:$8 sps:$4 sm:$0xff]   ;;  %v3420_v40 = vld [vmem:[%s4604_s0 + $0x250] ss:$8 sps:$4 sm:$0xff]   ;;  %v3424_v42 = vld [vmem:[%s4604_s0 + $0x264] ss:$8 sps:$4 sm:$0xff]  }
   0xf   :  { %918 = vmatprep.subr.bf16.mxu0 %v3532_v0  ;;  %3294 = vmatprep.subr.bf16.mxu1 %v3532_v0  ;;  %v3360_v43 = vld [vmem:[%s4604_s0 + $0x60] ss:$8 sps:$4 sm:$0xff]   ;;  %v3361_v45 = vld [vmem:[%s4604_s0 + $0x74] ss:$8 sps:$4 sm:$0xff]   ;;  %v3363_v47 = vld [vmem:[%s4604_s0 + $0x70] ss:$8 sps:$4 sm:$0xff]  }
  0x10   :  { %v3426_v44 = vld [vmem:[%s4604_s0 + $0x260] ss:$8 sps:$4 sm:$0xff]   ;;  %v3430_v46 = vld [vmem:[%s4604_s0 + $0x274] ss:$8 sps:$4 sm:$0xff]   ;;  %v3432_v48 = vld [vmem:[%s4604_s0 + $0x270] ss:$8 sps:$4 sm:$0xff]  }
  0x11   :  { %v3364_v49 = vld [vmem:[%s4604_s0 + $0x84] ss:$8 sps:$4 sm:$0xff]   ;;  %v3366_v51 = vld [vmem:[%s4604_s0 + $0x80] ss:$8 sps:$4 sm:$0xff]   ;;  %v3367_v53 = vld [vmem:[%s4604_s0 + $0x94] ss:$8 sps:$4 sm:$0xff]  }
  0x12   :  { %919 = vmatpush1.bf16.msra.mxu0 %v3328_v5  ;;  %3310 = vmatpush1.bf16.msra.mxu1 %v3328_v5  ;;  %v3436_v50 = vld [vmem:[%s4604_s0 + $0x284] ss:$8 sps:$4 sm:$0xff]   ;;  %v3438_v52 = vld [vmem:[%s4604_s0 + $0x280] ss:$8 sps:$4 sm:$0xff]   ;;  %v3442_v54 = vld [vmem:[%s4604_s0 + $0x294] ss:$8 sps:$4 sm:$0xff]  }
  0x13   :  { %920 = vmatprep.subr.bf16.mxu0 %v3532_v0  ;;  %3295 = vmatprep.subr.bf16.mxu1 %v3532_v0  ;;  %v3369_v55 = vld [vmem:[%s4604_s0 + $0x90] ss:$8 sps:$4 sm:$0xff]   ;;  %v3370_v57 = vld [vmem:[%s4604_s0 + $0xa4] ss:$8 sps:$4 sm:$0xff]   ;;  %v3372_v59 = vld [vmem:[%s4604_s0 + $0xa0] ss:$8 sps:$4 sm:$0xff]  }
  0x14   :  { %v3444_v56 = vld [vmem:[%s4604_s0 + $0x290] ss:$8 sps:$4 sm:$0xff]   ;;  %v3448_v58 = vld [vmem:[%s4604_s0 + $0x2a4] ss:$8 sps:$4 sm:$0xff]   ;;  %v3450_v60 = vld [vmem:[%s4604_s0 + $0x2a0] ss:$8 sps:$4 sm:$0xff]  }
  0x15   :  { %v3373_v61 = vld [vmem:[%s4604_s0 + $0xb4] ss:$8 sps:$4 sm:$0xff]   ;;  %v3375_v63 = vld [vmem:[%s4604_s0 + $0xb0] ss:$8 sps:$4 sm:$0xff]   ;;  %v3376_v1 = vld [vmem:[%s4604_s0 + $0xc4] ss:$8 sps:$4 sm:$0xff]  }
  0x16   :  { %921 = vmatpush1.bf16.msra.mxu0 %v3329_v7  ;;  %3311 = vmatpush1.bf16.msra.mxu1 %v3329_v7  ;;  %v3454_v62 = vld [vmem:[%s4604_s0 + $0x2b4] ss:$8 sps:$4 sm:$0xff]   ;;  %v3460_v2 = vld [vmem:[%s4604_s0 + $0x2c4] ss:$8 sps:$4 sm:$0xff]   ;;  %v3378_v3 = vld [vmem:[%s4604_s0 + $0xc0] ss:$8 sps:$4 sm:$0xff]  }
  0x17   :  { %922 = vmatprep.subr.bf16.mxu0 %v3532_v0  ;;  %3296 = vmatprep.subr.bf16.mxu1 %v3532_v0  ;;  %v3462_v4 = vld [vmem:[%s4604_s0 + $0x2c0] ss:$8 sps:$4 sm:$0xff]   ;;  %v3379_v5 = vld [vmem:[%s4604_s0 + $0xd4] ss:$8 sps:$4 sm:$0xff]   ;;  %v3381_v7 = vld [vmem:[%s4604_s0 + $0xd0] ss:$8 sps:$4 sm:$0xff]  }
  0x18   :  { %v3466_v6 = vld [vmem:[%s4604_s0 + $0x2d4] ss:$8 sps:$4 sm:$0xff]   ;;  %v3391_v17 = vld [vmem:[%s4604_s0 + $0x104] ss:$8 sps:$4 sm:$0xff]  }
  0x1a   :  { %923 = vmatpush1.bf16.msra.mxu0 %v3330_v8  ;;  %3312 = vmatpush1.bf16.msra.mxu1 %v3330_v8  ;;  %v3468_v8 = vld [vmem:[%s4604_s0 + $0x2d0] ss:$8 sps:$4 sm:$0xff]  }
  0x1b   :  { %924 = vmatprep.subr.bf16.mxu0 %v3532_v0  ;;  %3297 = vmatprep.subr.bf16.mxu1 %v3532_v0 }
  0x1e   :  { %925 = vmatpush1.bf16.msra.mxu0 %v3331_v9  ;;  %3313 = vmatpush1.bf16.msra.mxu1 %v3331_v9  ;;  %v3382_v9 = vld [vmem:[%s4604_s0 + $0xe4] ss:$8 sps:$4 sm:$0xff]  }
  0x1f   :  { %926 = vmatprep.subr.bf16.mxu0 %v3532_v0  ;;  %3298 = vmatprep.subr.bf16.mxu1 %v3532_v0 }
  0x22   :  { %927 = vmatpush1.bf16.msra.mxu0 %v3332_v10  ;;  %3314 = vmatpush1.bf16.msra.mxu1 %v3332_v10  ;;  %v3472_v10 = vld [vmem:[%s4604_s0 + $0x2e4] ss:$8 sps:$4 sm:$0xff]  }
  0x23   :  { %928 = vmatprep.subr.bf16.mxu0 %v3532_v0  ;;  %3299 = vmatprep.subr.bf16.mxu1 %v3532_v0 }
  0x26   :  { %929 = vmatpush1.bf16.msra.mxu0 %v3333_v11  ;;  %3315 = vmatpush1.bf16.msra.mxu1 %v3333_v11  ;;  %v3384_v11 = vld [vmem:[%s4604_s0 + $0xe0] ss:$8 sps:$4 sm:$0xff]  }
  0x27   :  { %930 = vmatprep.subr.bf16.mxu0 %v3532_v0  ;;  %3300 = vmatprep.subr.bf16.mxu1 %v3532_v0 }
  0x2a   :  { %931 = vmatpush1.bf16.msra.mxu0 %v3334_v12  ;;  %3316 = vmatpush1.bf16.msra.mxu1 %v3334_v12  ;;  %v3474_v12 = vld [vmem:[%s4604_s0 + $0x2e0] ss:$8 sps:$4 sm:$0xff]  }
  0x2b   :  { %932 = vmatprep.subr.bf16.mxu0 %v3532_v0  ;;  %3301 = vmatprep.subr.bf16.mxu1 %v3532_v0 }
  0x2e   :  { %933 = vmatpush1.bf16.msra.mxu0 %v3335_v13  ;;  %3317 = vmatpush1.bf16.msra.mxu1 %v3335_v13  ;;  %v3385_v13 = vld [vmem:[%s4604_s0 + $0xf4] ss:$8 sps:$4 sm:$0xff]  }
  0x2f   :  { %934 = vmatprep.subr.bf16.mxu0 %v3532_v0  ;;  %3302 = vmatprep.subr.bf16.mxu1 %v3532_v0 }
  0x32   :  { %935 = vmatpush1.bf16.msra.mxu0 %v3336_v14  ;;  %3318 = vmatpush1.bf16.msra.mxu1 %v3336_v14  ;;  %v3478_v14 = vld [vmem:[%s4604_s0 + $0x2f4] ss:$8 sps:$4 sm:$0xff]  }
  0x33   :  { %936 = vmatprep.subr.bf16.mxu0 %v3532_v0  ;;  %3303 = vmatprep.subr.bf16.mxu1 %v3532_v0 }
  0x36   :  { %937 = vmatpush1.bf16.msra.mxu0 %v3337_v15  ;;  %3319 = vmatpush1.bf16.msra.mxu1 %v3337_v15  ;;  %v3387_v15 = vld [vmem:[%s4604_s0 + $0xf0] ss:$8 sps:$4 sm:$0xff]  }
  0x37   :  { %938 = vmatprep.subr.bf16.mxu0 %v3532_v0  ;;  %3304 = vmatprep.subr.bf16.mxu1 %v3532_v0 }
  0x3a   :  { %939 = vmatpush1.bf16.msra.mxu0 %v3338_v16  ;;  %3320 = vmatpush1.bf16.msra.mxu1 %v3338_v16  ;;  %v3480_v16 = vld [vmem:[%s4604_s0 + $0x2f0] ss:$8 sps:$4 sm:$0xff]  }
  0x3b   :  { %940 = vmatprep.subr.bf16.mxu0 %v3532_v0  ;;  %3305 = vmatprep.subr.bf16.mxu1 %v3532_v0  ;;  %v3456_v0 = vld [vmem:[%s4604_s0 + $0x2b0] ss:$8 sps:$4 sm:$0xff]  }
  0x3e   :  { %941 = vmatpush1.bf16.msra.mxu0 %v3339_v18  ;;  %3321 = vmatpush1.bf16.msra.mxu1 %v3339_v18  ;;  %v3484_v18 = vld [vmem:[%s4604_s0 + $0x304] ss:$8 sps:$4 sm:$0xff]  }
  0x41   :  { %943 = vmatmul.mubr.bf16.vlgmr.msra.gmra.mrb[0].mxu0 %v3340_v19  ;;  %1199 = vmatmul.mubr.bf16.vlgmr.msra.gmra.mrb[0].mxu1 %v3388_v20  ;;  %v3393_v19 = vld [vmem:[%s4604_s0 + $0x100] ss:$8 sps:$4 sm:$0xff]  }
  0x42   :  { %950 = vmatprep.mubr.bf16.mxu0 %v3343_v21  ;;  %1206 = vmatprep.mubr.bf16.mxu1 %v3394_v22  ;;  %v3486_v20 = vld [vmem:[%s4604_s0 + $0x300] ss:$8 sps:$4 sm:$0xff]   ;;  %v3397_v21 = vld [vmem:[%s4604_s0 + $0x114] ss:$8 sps:$4 sm:$0xff]  }
  0x43   :  { %v3487_v22 = vld [vmem:[%s4604_s0 + $0x314] ss:$8 sps:$4 sm:$0xff]  }
  0x49   :  { %951 = vmatmul.mubr.bf16.gmra.mrb[4].mxu0 %v3345_v23  ;;  %1207 = vmatmul.mubr.bf16.gmra.mrb[4].mxu1 %v3396_v24  ;;  %v3399_v23 = vld [vmem:[%s4604_s0 + $0x110] ss:$8 sps:$4 sm:$0xff]  }
  0x4a   :  { %958 = vmatprep.mubr.bf16.mxu0 %v3346_v25  ;;  %1214 = vmatprep.mubr.bf16.mxu1 %v3400_v26  ;;  %v3489_v24 = vld [vmem:[%s4604_s0 + $0x310] ss:$8 sps:$4 sm:$0xff]   ;;  %v3403_v25 = vld [vmem:[%s4604_s0 + $0x124] ss:$8 sps:$4 sm:$0xff]  }
  0x4b   :  { %v3490_v26 = vld [vmem:[%s4604_s0 + $0x324] ss:$8 sps:$4 sm:$0xff]  }
  0x51   :  { %959 = vmatmul.mubr.bf16.gmra.mrb[8].mxu0 %v3348_v27  ;;  %1215 = vmatmul.mubr.bf16.gmra.mrb[8].mxu1 %v3402_v28  ;;  %v3405_v27 = vld [vmem:[%s4604_s0 + $0x120] ss:$8 sps:$4 sm:$0xff]  }
  0x52   :  { %966 = vmatprep.mubr.bf16.mxu0 %v3349_v29  ;;  %1222 = vmatprep.mubr.bf16.mxu1 %v3406_v30  ;;  %v3492_v28 = vld [vmem:[%s4604_s0 + $0x320] ss:$8 sps:$4 sm:$0xff]   ;;  %v3409_v29 = vld [vmem:[%s4604_s0 + $0x134] ss:$8 sps:$4 sm:$0xff]  }
  0x53   :  { %v3493_v30 = vld [vmem:[%s4604_s0 + $0x334] ss:$8 sps:$4 sm:$0xff]  }
  0x59   :  { %967 = vmatmul.mubr.bf16.gmra.mrb[12].mxu0 %v3351_v31  ;;  %1223 = vmatmul.mubr.bf16.gmra.mrb[12].mxu1 %v3408_v32  ;;  %v3411_v31 = vld [vmem:[%s4604_s0 + $0x130] ss:$8 sps:$4 sm:$0xff]  }
  0x5a   :  { %974 = vmatprep.mubr.bf16.mxu0 %v3352_v33  ;;  %1230 = vmatprep.mubr.bf16.mxu1 %v3412_v34  ;;  %v3495_v32 = vld [vmem:[%s4604_s0 + $0x330] ss:$8 sps:$4 sm:$0xff]   ;;  %v3415_v33 = vld [vmem:[%s4604_s0 + $0x144] ss:$8 sps:$4 sm:$0xff]  }
  0x5b   :  { %v3496_v34 = vld [vmem:[%s4604_s0 + $0x344] ss:$8 sps:$4 sm:$0xff]  }
  0x61   :  { %975 = vmatmul.mubr.bf16.gmra.mrb[16].mxu0 %v3354_v35  ;;  %1231 = vmatmul.mubr.bf16.gmra.mrb[16].mxu1 %v3414_v36  ;;  %v3417_v35 = vld [vmem:[%s4604_s0 + $0x140] ss:$8 sps:$4 sm:$0xff]  }
  0x62   :  { %982 = vmatprep.mubr.bf16.mxu0 %v3355_v37  ;;  %1238 = vmatprep.mubr.bf16.mxu1 %v3418_v38  ;;  %v3498_v36 = vld [vmem:[%s4604_s0 + $0x340] ss:$8 sps:$4 sm:$0xff]   ;;  %v3421_v37 = vld [vmem:[%s4604_s0 + $0x154] ss:$8 sps:$4 sm:$0xff]  }
  0x63   :  { %v3499_v38 = vld [vmem:[%s4604_s0 + $0x354] ss:$8 sps:$4 sm:$0xff]  }
  0x69   :  { %983 = vmatmul.mubr.bf16.gmra.mrb[20].mxu0 %v3357_v39  ;;  %1239 = vmatmul.mubr.bf16.gmra.mrb[20].mxu1 %v3420_v40  ;;  %v3423_v39 = vld [vmem:[%s4604_s0 + $0x150] ss:$8 sps:$4 sm:$0xff]  }
  0x6a   :  { %990 = vmatprep.mubr.bf16.mxu0 %v3358_v41  ;;  %1246 = vmatprep.mubr.bf16.mxu1 %v3424_v42  ;;  %v3501_v40 = vld [vmem:[%s4604_s0 + $0x350] ss:$8 sps:$4 sm:$0xff]   ;;  %v3427_v41 = vld [vmem:[%s4604_s0 + $0x164] ss:$8 sps:$4 sm:$0xff]  }
  0x6b   :  { %v3502_v42 = vld [vmem:[%s4604_s0 + $0x364] ss:$8 sps:$4 sm:$0xff]  }
  0x71   :  { %991 = vmatmul.mubr.bf16.gmra.mrb[24].mxu0 %v3360_v43  ;;  %1247 = vmatmul.mubr.bf16.gmra.mrb[24].mxu1 %v3426_v44  ;;  %v3429_v43 = vld [vmem:[%s4604_s0 + $0x160] ss:$8 sps:$4 sm:$0xff]  }
  0x72   :  { %998 = vmatprep.mubr.bf16.mxu0 %v3361_v45  ;;  %1254 = vmatprep.mubr.bf16.mxu1 %v3430_v46  ;;  %v3504_v44 = vld [vmem:[%s4604_s0 + $0x360] ss:$8 sps:$4 sm:$0xff]   ;;  %v3433_v45 = vld [vmem:[%s4604_s0 + $0x174] ss:$8 sps:$4 sm:$0xff]  }
  0x73   :  { %v3505_v46 = vld [vmem:[%s4604_s0 + $0x374] ss:$8 sps:$4 sm:$0xff]  }
  0x79   :  { %999 = vmatmul.mubr.bf16.gmra.mrb[28].mxu0 %v3363_v47  ;;  %1255 = vmatmul.mubr.bf16.gmra.mrb[28].mxu1 %v3432_v48  ;;  %v3435_v47 = vld [vmem:[%s4604_s0 + $0x170] ss:$8 sps:$4 sm:$0xff]  }
  0x7a   :  { %1006 = vmatprep.mubr.bf16.mxu0 %v3364_v49  ;;  %1262 = vmatprep.mubr.bf16.mxu1 %v3436_v50  ;;  %v3507_v48 = vld [vmem:[%s4604_s0 + $0x370] ss:$8 sps:$4 sm:$0xff]   ;;  %v3439_v49 = vld [vmem:[%s4604_s0 + $0x184] ss:$8 sps:$4 sm:$0xff]  }
  0x7b   :  { %v3508_v50 = vld [vmem:[%s4604_s0 + $0x384] ss:$8 sps:$4 sm:$0xff]  }
  0x81   :  { %1007 = vmatmul.mubr.bf16.gmra.mrb[32].mxu0 %v3366_v51  ;;  %1263 = vmatmul.mubr.bf16.gmra.mrb[32].mxu1 %v3438_v52  ;;  %v3441_v51 = vld [vmem:[%s4604_s0 + $0x180] ss:$8 sps:$4 sm:$0xff]  }
  0x82   :  { %1014 = vmatprep.mubr.bf16.mxu0 %v3367_v53  ;;  %1270 = vmatprep.mubr.bf16.mxu1 %v3442_v54  ;;  %v3510_v52 = vld [vmem:[%s4604_s0 + $0x380] ss:$8 sps:$4 sm:$0xff]   ;;  %v3445_v53 = vld [vmem:[%s4604_s0 + $0x194] ss:$8 sps:$4 sm:$0xff]  }
  0x83   :  { %v3511_v54 = vld [vmem:[%s4604_s0 + $0x394] ss:$8 sps:$4 sm:$0xff]  }
  0x89   :  { %1015 = vmatmul.mubr.bf16.gmra.mrb[36].mxu0 %v3369_v55  ;;  %1271 = vmatmul.mubr.bf16.gmra.mrb[36].mxu1 %v3444_v56  ;;  %v3447_v55 = vld [vmem:[%s4604_s0 + $0x190] ss:$8 sps:$4 sm:$0xff]  }
  0x8a   :  { %1022 = vmatprep.mubr.bf16.mxu0 %v3370_v57  ;;  %1278 = vmatprep.mubr.bf16.mxu1 %v3448_v58  ;;  %v3513_v56 = vld [vmem:[%s4604_s0 + $0x390] ss:$8 sps:$4 sm:$0xff]   ;;  %v3451_v57 = vld [vmem:[%s4604_s0 + $0x1a4] ss:$8 sps:$4 sm:$0xff]  }
  0x8b   :  { %v3514_v58 = vld [vmem:[%s4604_s0 + $0x3a4] ss:$8 sps:$4 sm:$0xff]  }
  0x91   :  { %1023 = vmatmul.mubr.bf16.gmra.mrb[40].mxu0 %v3372_v59  ;;  %1279 = vmatmul.mubr.bf16.gmra.mrb[40].mxu1 %v3450_v60  ;;  %v3453_v59 = vld [vmem:[%s4604_s0 + $0x1a0] ss:$8 sps:$4 sm:$0xff]  }
  0x92   :  { %1030 = vmatprep.mubr.bf16.mxu0 %v3373_v61  ;;  %1286 = vmatprep.mubr.bf16.mxu1 %v3454_v62  ;;  %v3516_v60 = vld [vmem:[%s4604_s0 + $0x3a0] ss:$8 sps:$4 sm:$0xff]   ;;  %v3457_v61 = vld [vmem:[%s4604_s0 + $0x1b4] ss:$8 sps:$4 sm:$0xff]  }
  0x93   :  { %v3517_v62 = vld [vmem:[%s4604_s0 + $0x3b4] ss:$8 sps:$4 sm:$0xff]  }
  0x99   :  { %1031 = vmatmul.mubr.bf16.gmra.mrb[44].mxu0 %v3375_v63  ;;  %1287 = vmatmul.mubr.bf16.gmra.mrb[44].mxu1 %v3456_v0 }
  0x9a   :  { %1038 = vmatprep.mubr.bf16.mxu0 %v3376_v1  ;;  %1294 = vmatprep.mubr.bf16.mxu1 %v3460_v2  ;;  %v3459_v2 = vld [vmem:[%s4604_s0 + $0x1b0] ss:$8 sps:$4 sm:$0xff]  }
  0xa1   :  { %1039 = vmatmul.mubr.bf16.gmra.mrb[48].mxu0 %v3378_v3  ;;  %1295 = vmatmul.mubr.bf16.gmra.mrb[48].mxu1 %v3462_v4  ;;  %v3519_v4 = vld [vmem:[%s4604_s0 + $0x3b0] ss:$8 sps:$4 sm:$0xff]  }
  0xa2   :  { %1046 = vmatprep.mubr.bf16.mxu0 %v3379_v5  ;;  %1302 = vmatprep.mubr.bf16.mxu1 %v3466_v6 }
  0xa9   :  { %1047 = vmatmul.mubr.bf16.gmra.mrb[52].mxu0 %v3381_v7  ;;  %1303 = vmatmul.mubr.bf16.gmra.mrb[52].mxu1 %v3468_v8  ;;  %v3463_v7 = vld [vmem:[%s4604_s0 + $0x1c4] ss:$8 sps:$4 sm:$0xff]  }
  0xaa   :  { %1054 = vmatprep.mubr.bf16.mxu0 %v3382_v9  ;;  %1310 = vmatprep.mubr.bf16.mxu1 %v3472_v10 }
  0xb1   :  { %1055 = vmatmul.mubr.bf16.gmra.mrb[56].mxu0 %v3384_v11  ;;  %1311 = vmatmul.mubr.bf16.gmra.mrb[56].mxu1 %v3474_v12 }
  0xb2   :  { %1062 = vmatprep.mubr.bf16.mxu0 %v3385_v13  ;;  %1318 = vmatprep.mubr.bf16.mxu1 %v3478_v14 }
  0xb9   :  { %1063 = vmatmul.mubr.bf16.gmra.mrb[60].mxu0 %v3387_v15  ;;  %1319 = vmatmul.mubr.bf16.gmra.mrb[60].mxu1 %v3480_v16  ;;  %v3520_v16 = vld [vmem:[%s4604_s0 + $0x3c4] ss:$8 sps:$4 sm:$0xff]  }
  0xba   :  { %1070 = vmatprep.mubr.bf16.mxu0 %v3391_v17  ;;  %1326 = vmatprep.mubr.bf16.mxu1 %v3484_v18 }
  0xc1   :  { %1071 = vmatmul.mubr.bf16.gmra.mrb[64].mxu0 %v3393_v19  ;;  %1327 = vmatmul.mubr.bf16.gmra.mrb[64].mxu1 %v3486_v20 }
  0xc2   :  { %1078 = vmatprep.mubr.bf16.mxu0 %v3397_v21  ;;  %1334 = vmatprep.mubr.bf16.mxu1 %v3487_v22  ;;  %v3465_v22 = vld [vmem:[%s4604_s0 + $0x1c0] ss:$8 sps:$4 sm:$0xff]  }
  0xc9   :  { %1079 = vmatmul.mubr.bf16.gmra.mrb[68].mxu0 %v3399_v23  ;;  %1335 = vmatmul.mubr.bf16.gmra.mrb[68].mxu1 %v3489_v24  ;;  %v3522_v24 = vld [vmem:[%s4604_s0 + $0x3c0] ss:$8 sps:$4 sm:$0xff]  }
  0xca   :  { %1086 = vmatprep.mubr.bf16.mxu0 %v3403_v25  ;;  %1342 = vmatprep.mubr.bf16.mxu1 %v3490_v26  ;;  %v3469_v26 = vld [vmem:[%s4604_s0 + $0x1d4] ss:$8 sps:$4 sm:$0xff]  }
  0xd1   :  { %1087 = vmatmul.mubr.bf16.gmra.mrb[72].mxu0 %v3405_v27  ;;  %1343 = vmatmul.mubr.bf16.gmra.mrb[72].mxu1 %v3492_v28 }
  0xd2   :  { %1094 = vmatprep.mubr.bf16.mxu0 %v3409_v29  ;;  %1350 = vmatprep.mubr.bf16.mxu1 %v3493_v30 }
  0xd9   :  { %1095 = vmatmul.mubr.bf16.gmra.mrb[76].mxu0 %v3411_v31  ;;  %1351 = vmatmul.mubr.bf16.gmra.mrb[76].mxu1 %v3495_v32 }
  0xda   :  { %1102 = vmatprep.mubr.bf16.mxu0 %v3415_v33  ;;  %1358 = vmatprep.mubr.bf16.mxu1 %v3496_v34 }
  0xe1   :  { %1103 = vmatmul.mubr.bf16.gmra.mrb[80].mxu0 %v3417_v35  ;;  %1359 = vmatmul.mubr.bf16.gmra.mrb[80].mxu1 %v3498_v36  ;;  %v3523_v36 = vld [vmem:[%s4604_s0 + $0x3d4] ss:$8 sps:$4 sm:$0xff]  }
  0xe2   :  { %1110 = vmatprep.mubr.bf16.mxu0 %v3421_v37  ;;  %1366 = vmatprep.mubr.bf16.mxu1 %v3499_v38 }
  0xe9   :  { %1111 = vmatmul.mubr.bf16.gmra.mrb[84].mxu0 %v3423_v39  ;;  %1367 = vmatmul.mubr.bf16.gmra.mrb[84].mxu1 %v3501_v40 }
  0xea   :  { %1118 = vmatprep.mubr.bf16.mxu0 %v3427_v41  ;;  %1374 = vmatprep.mubr.bf16.mxu1 %v3502_v42  ;;  %v3471_v42 = vld [vmem:[%s4604_s0 + $0x1d0] ss:$8 sps:$4 sm:$0xff]  }
  0xf1   :  { %1119 = vmatmul.mubr.bf16.gmra.mrb[88].mxu0 %v3429_v43  ;;  %1375 = vmatmul.mubr.bf16.gmra.mrb[88].mxu1 %v3504_v44  ;;  %v3525_v44 = vld [vmem:[%s4604_s0 + $0x3d0] ss:$8 sps:$4 sm:$0xff]  }
  0xf2   :  { %1126 = vmatprep.mubr.bf16.mxu0 %v3433_v45  ;;  %1382 = vmatprep.mubr.bf16.mxu1 %v3505_v46  ;;  %v3475_v46 = vld [vmem:[%s4604_s0 + $0x1e4] ss:$8 sps:$4 sm:$0xff]  }
  0xf9   :  { %1127 = vmatmul.mubr.bf16.gmra.mrb[92].mxu0 %v3435_v47  ;;  %1383 = vmatmul.mubr.bf16.gmra.mrb[92].mxu1 %v3507_v48 }
  0xfa   :  { %1134 = vmatprep.mubr.bf16.mxu0 %v3439_v49  ;;  %1390 = vmatprep.mubr.bf16.mxu1 %v3508_v50 }
 0x101   :  { %1135 = vmatmul.mubr.bf16.gmra.mrb[96].mxu0 %v3441_v51  ;;  %1391 = vmatmul.mubr.bf16.gmra.mrb[96].mxu1 %v3510_v52 }
 0x102   :  { %1142 = vmatprep.mubr.bf16.mxu0 %v3445_v53  ;;  %1398 = vmatprep.mubr.bf16.mxu1 %v3511_v54 }
 0x109   :  { %1143 = vmatmul.mubr.bf16.gmra.mrb[100].mxu0 %v3447_v55  ;;  %1399 = vmatmul.mubr.bf16.gmra.mrb[100].mxu1 %v3513_v56  ;;  %v3526_v56 = vld [vmem:[%s4604_s0 + $0x3e4] ss:$8 sps:$4 sm:$0xff]  }
 0x10a   :  { %1150 = vmatprep.mubr.bf16.mxu0 %v3451_v57  ;;  %1406 = vmatprep.mubr.bf16.mxu1 %v3514_v58 }
 0x111   :  { %1151 = vmatmul.mubr.bf16.gmra.mrb[104].mxu0 %v3453_v59  ;;  %1407 = vmatmul.mubr.bf16.gmra.mrb[104].mxu1 %v3516_v60 }
 0x112   :  { %1158 = vmatprep.mubr.bf16.mxu0 %v3457_v61  ;;  %1414 = vmatprep.mubr.bf16.mxu1 %v3517_v62  ;;  %v3477_v62 = vld [vmem:[%s4604_s0 + $0x1e0] ss:$8 sps:$4 sm:$0xff]  }
 0x114   :  { %v944_v63 = vpop.f32.mrb[0].mxu0  ;;  %v3964_v0 = vpop.f32.mrb[0].mxu1 }
 0x115   :  { %v946_v1 = vpop.f32.mrb[1].mxu0  ;;  %v1202_v3 = vpop.f32.mrb[1].mxu1  ;;  %v2234_v5 = vmul.f32 %v944_v63, %v944_v63 }
 0x116   :  { %v947_v6 = vpop.f32.mrb[2].mxu0  ;;  %v3975_v8 = vpop.f32.mrb[2].mxu1  ;;  %v3528_v1 = vld [vmem:[%s4604_s0 + $0x3e0] ss:$8 sps:$4 sm:$0xff]   ;;  %v3481_v3 = vld [vmem:[%s4604_s0 + $0x1f4] ss:$8 sps:$4 sm:$0xff]  }
 0x117   :  { %v2910_v9 = vpack.c.bf16 %v947_v6, %v944_v63  ;;  %v2101_v10 = vadd.f32 %v947_v6, %v944_v63  ;;  %v2235_v11 = vmul.f32 %v947_v6, %v947_v6  ;;  %v949_v12 = vpop.f32.mrb[3].mxu0  ;;  %v3070_v13 = vpack.c.bf16 %v3975_v8, %v3964_v0  ;;  %v1205_v14 = vpop.f32.mrb[3].mxu1 }
 0x118   :  { %v3529_v14 = vld [vmem:[%s4604_s0 + $0x3f4] ss:$8 sps:$4 sm:$0xff]  }
 0x119   :  { %2911 = vst [vmem:[%s4605_s2] sm:$0xff] %v2910_v9   ;;  %v2362_v15 = vadd.f32 %v2235_v11, %v2234_v5  ;;  %1159 = vmatmul.mubr.bf16.gmra.mrb[108].mxu0 %v3459_v2  ;;  %3258 = vst [vmem:[%s4605_s2 + $0x100] sm:$0xff] %v3070_v13   ;;  %1415 = vmatmul.mubr.bf16.gmra.mrb[108].mxu1 %v3519_v4 }
 0x11a   :  { %1166 = vmatprep.mubr.bf16.mxu0 %v3463_v7  ;;  %1422 = vmatprep.mubr.bf16.mxu1 %v3520_v16 }
 0x11c   :  { %v952_v17 = vpop.f32.mrb[4].mxu0  ;;  %v3988_v18 = vpop.f32.mrb[4].mxu1 }
 0x11d   :  { %v2102_v19 = vadd.f32 %v2101_v10, %v952_v17  ;;  %v2236_v20 = vmul.f32 %v952_v17, %v952_v17  ;;  %v954_v21 = vpop.f32.mrb[5].mxu0  ;;  %v1210_v23 = vpop.f32.mrb[5].mxu1 }
 0x11e   :  { %v955_v25 = vpop.f32.mrb[6].mxu0  ;;  %v3999_v27 = vpop.f32.mrb[6].mxu1  ;;  %v3483_v21 = vld [vmem:[%s4604_s0 + $0x1f0] ss:$8 sps:$4 sm:$0xff]  }
 0x11f   :  { %v2363_v28 = vadd.f32 %v2362_v15, %v2236_v20  ;;  %v2915_v29 = vpack.c.bf16 %v955_v25, %v952_v17  ;;  %v2103_v30 = vadd.f32 %v2102_v19, %v955_v25  ;;  %v2237_v31 = vmul.f32 %v955_v25, %v955_v25  ;;  %v957_v32 = vpop.f32.mrb[7].mxu0  ;;  %v1213_v33 = vpop.f32.mrb[7].mxu1  ;;  %v3531_v23 = vld [vmem:[%s4604_s0 + $0x3f0] ss:$8 sps:$4 sm:$0xff]  }
 0x120   :  { %v3075_v34 = vpack.c.bf16 %v3999_v27, %v3988_v18 }
 0x121   :  { %3227 = vst [vmem:[%s4605_s2 + $0x8] sm:$0xff] %v2915_v29   ;;  %v2364_v35 = vadd.f32 %v2363_v28, %v2237_v31  ;;  %1167 = vmatmul.mubr.bf16.gmra.mrb[112].mxu0 %v3465_v22  ;;  %1423 = vmatmul.mubr.bf16.gmra.mrb[112].mxu1 %v3522_v24 }
 0x122   :  { %1174 = vmatprep.mubr.bf16.mxu0 %v3469_v26  ;;  %3259 = vst [vmem:[%s4605_s2 + $0x108] sm:$0xff] %v3075_v34   ;;  %1430 = vmatprep.mubr.bf16.mxu1 %v3523_v36 }
 0x124   :  { %v960_v37 = vpop.f32.mrb[8].mxu0  ;;  %v4012_v38 = vpop.f32.mrb[8].mxu1 }
 0x125   :  { %v2104_v39 = vadd.f32 %v2103_v30, %v960_v37  ;;  %v2238_v40 = vmul.f32 %v960_v37, %v960_v37  ;;  %v962_v41 = vpop.f32.mrb[9].mxu0  ;;  %v1218_v43 = vpop.f32.mrb[9].mxu1 }
 0x126   :  { %v963_v45 = vpop.f32.mrb[10].mxu0  ;;  %v4023_v47 = vpop.f32.mrb[10].mxu1 }
 0x127   :  { %v2365_v48 = vadd.f32 %v2364_v35, %v2238_v40  ;;  %v2920_v49 = vpack.c.bf16 %v963_v45, %v960_v37  ;;  %v2105_v50 = vadd.f32 %v2104_v39, %v963_v45  ;;  %v2239_v51 = vmul.f32 %v963_v45, %v963_v45  ;;  %v965_v52 = vpop.f32.mrb[11].mxu0  ;;  %v1221_v53 = vpop.f32.mrb[11].mxu1 }
 0x128   :  { %v3080_v54 = vpack.c.bf16 %v4023_v47, %v4012_v38 }
 0x129   :  { %3228 = vst [vmem:[%s4605_s2 + $0x10] sm:$0xff] %v2920_v49   ;;  %v2366_v55 = vadd.f32 %v2365_v48, %v2239_v51  ;;  %1175 = vmatmul.mubr.bf16.gmra.mrb[116].mxu0 %v3471_v42  ;;  %1431 = vmatmul.mubr.bf16.gmra.mrb[116].mxu1 %v3525_v44 }
 0x12a   :  { %1182 = vmatprep.mubr.bf16.mxu0 %v3475_v46  ;;  %3260 = vst [vmem:[%s4605_s2 + $0x110] sm:$0xff] %v3080_v54   ;;  %1438 = vmatprep.mubr.bf16.mxu1 %v3526_v56 }
 0x12c   :  { %v968_v57 = vpop.f32.mrb[12].mxu0  ;;  %v4036_v58 = vpop.f32.mrb[12].mxu1 }
 0x12d   :  { %v2106_v59 = vadd.f32 %v2105_v50, %v968_v57  ;;  %v2240_v60 = vmul.f32 %v968_v57, %v968_v57  ;;  %v970_v61 = vpop.f32.mrb[13].mxu0  ;;  %v1226_v63 = vpop.f32.mrb[13].mxu1 }
 0x12e   :  { %v971_v2 = vpop.f32.mrb[14].mxu0  ;;  %v4047_v4 = vpop.f32.mrb[14].mxu1 }
 0x12f   :  { %v2367_v5 = vadd.f32 %v2366_v55, %v2240_v60  ;;  %v2925_v6 = vpack.c.bf16 %v971_v2, %v968_v57  ;;  %v2107_v7 = vadd.f32 %v2106_v59, %v971_v2  ;;  %v2241_v9 = vmul.f32 %v971_v2, %v971_v2  ;;  %v973_v10 = vpop.f32.mrb[15].mxu0  ;;  %v1229_v11 = vpop.f32.mrb[15].mxu1 }
 0x130   :  { %v3085_v12 = vpack.c.bf16 %v4047_v4, %v4036_v58 }
 0x131   :  { %3229 = vst [vmem:[%s4605_s2 + $0x18] sm:$0xff] %v2925_v6   ;;  %v2368_v13 = vadd.f32 %v2367_v5, %v2241_v9  ;;  %1183 = vmatmul.mubr.bf16.gmra.mrb[120].mxu0 %v3477_v62  ;;  %1439 = vmatmul.mubr.bf16.gmra.mrb[120].mxu1 %v3528_v1 }
 0x132   :  { %1190 = vmatprep.mubr.bf16.mxu0 %v3481_v3  ;;  %3261 = vst [vmem:[%s4605_s2 + $0x118] sm:$0xff] %v3085_v12   ;;  %1446 = vmatprep.mubr.bf16.mxu1 %v3529_v14 }
 0x134   :  { %v976_v15 = vpop.f32.mrb[16].mxu0  ;;  %v4060_v16 = vpop.f32.mrb[16].mxu1 }
 0x135   :  { %v2108_v17 = vadd.f32 %v2107_v7, %v976_v15  ;;  %v2242_v19 = vmul.f32 %v976_v15, %v976_v15  ;;  %v978_v20 = vpop.f32.mrb[17].mxu0  ;;  %v1234_v22 = vpop.f32.mrb[17].mxu1 }
 0x136   :  { %v979_v24 = vpop.f32.mrb[18].mxu0  ;;  %v4068_v25 = vpop.f32.mrb[18].mxu1 }
 0x137   :  { %v2369_v26 = vadd.f32 %v2368_v13, %v2242_v19  ;;  %v2930_v28 = vpack.c.bf16 %v979_v24, %v976_v15  ;;  %v2109_v29 = vadd.f32 %v2108_v17, %v979_v24  ;;  %v2243_v30 = vmul.f32 %v979_v24, %v979_v24  ;;  %v981_v31 = vpop.f32.mrb[19].mxu0  ;;  %v1237_v32 = vpop.f32.mrb[19].mxu1 }
 0x138   :  { %v3090_v33 = vpack.c.bf16 %v4068_v25, %v4060_v16 }
 0x139   :  { %3230 = vst [vmem:[%s4605_s2 + $0x20] sm:$0xff] %v2930_v28   ;;  %v2370_v34 = vadd.f32 %v2369_v26, %v2243_v30  ;;  %1191 = vmatmul.mubr.bf16.gmra.mrb[124].mxu0 %v3483_v21  ;;  %1447 = vmatmul.mubr.bf16.gmra.mrb[124].mxu1 %v3531_v23 }
 0x13a   :  { %3262 = vst [vmem:[%s4605_s2 + $0x120] sm:$0xff] %v3090_v33  }
 0x13c   :  { %v984_v35 = vpop.f32.mrb[20].mxu0  ;;  %v4078_v36 = vpop.f32.mrb[20].mxu1 }
 0x13d   :  { %v2110_v37 = vadd.f32 %v2109_v29, %v984_v35  ;;  %v2244_v39 = vmul.f32 %v984_v35, %v984_v35  ;;  %v986_v40 = vpop.f32.mrb[21].mxu0  ;;  %v1242_v41 = vpop.f32.mrb[21].mxu1 }
 0x13e   :  { %v987_v42 = vpop.f32.mrb[22].mxu0  ;;  %v4080_v43 = vpop.f32.mrb[22].mxu1 }
 0x13f   :  { %v2371_v44 = vadd.f32 %v2370_v34, %v2244_v39  ;;  %v2935_v45 = vpack.c.bf16 %v987_v42, %v984_v35  ;;  %v2111_v46 = vadd.f32 %v2110_v37, %v987_v42  ;;  %v2245_v48 = vmul.f32 %v987_v42, %v987_v42  ;;  %v989_v49 = vpop.f32.mrb[23].mxu0  ;;  %v1245_v50 = vpop.f32.mrb[23].mxu1 }
 0x140   :  { %v3095_v51 = vpack.c.bf16 %v4080_v43, %v4078_v36 }
 0x141   :  { %3231 = vst [vmem:[%s4605_s2 + $0x28] sm:$0xff] %v2935_v45   ;;  %v2372_v52 = vadd.f32 %v2371_v44, %v2245_v48 }
 0x142   :  { %3263 = vst [vmem:[%s4605_s2 + $0x128] sm:$0xff] %v3095_v51  }
 0x144   :  { %v992_v53 = vpop.f32.mrb[24].mxu0  ;;  %v4090_v54 = vpop.f32.mrb[24].mxu1 }
 0x145   :  { %v2112_v55 = vadd.f32 %v2111_v46, %v992_v53  ;;  %v2246_v56 = vmul.f32 %v992_v53, %v992_v53  ;;  %v994_v57 = vpop.f32.mrb[25].mxu0  ;;  %v1250_v59 = vpop.f32.mrb[25].mxu1 }
 0x146   :  { %v995_v60 = vpop.f32.mrb[26].mxu0  ;;  %v4092_v61 = vpop.f32.mrb[26].mxu1 }
 0x147   :  { %v2373_v62 = vadd.f32 %v2372_v52, %v2246_v56  ;;  %v2940_v63 = vpack.c.bf16 %v995_v60, %v992_v53  ;;  %v2113_v1 = vadd.f32 %v2112_v55, %v995_v60  ;;  %v2247_v2 = vmul.f32 %v995_v60, %v995_v60  ;;  %v997_v3 = vpop.f32.mrb[27].mxu0  ;;  %v1253_v5 = vpop.f32.mrb[27].mxu1 }
 0x148   :  { %v3100_v6 = vpack.c.bf16 %v4092_v61, %v4090_v54 }
 0x149   :  { %3232 = vst [vmem:[%s4605_s2 + $0x30] sm:$0xff] %v2940_v63   ;;  %v2374_v7 = vadd.f32 %v2373_v62, %v2247_v2 }
 0x14a   :  { %3264 = vst [vmem:[%s4605_s2 + $0x130] sm:$0xff] %v3100_v6  }
 0x14c   :  { %v1000_v9 = vpop.f32.mrb[28].mxu0  ;;  %v4102_v10 = vpop.f32.mrb[28].mxu1 }
 0x14d   :  { %v2114_v11 = vadd.f32 %v2113_v1, %v1000_v9  ;;  %v2248_v12 = vmul.f32 %v1000_v9, %v1000_v9  ;;  %v1002_v13 = vpop.f32.mrb[29].mxu0  ;;  %v1258_v14 = vpop.f32.mrb[29].mxu1 }
 0x14e   :  { %v1003_v15 = vpop.f32.mrb[30].mxu0  ;;  %v4104_v17 = vpop.f32.mrb[30].mxu1 }
 0x14f   :  { %v2375_v19 = vadd.f32 %v2374_v7, %v2248_v12  ;;  %v2945_v20 = vpack.c.bf16 %v1003_v15, %v1000_v9  ;;  %v2115_v21 = vadd.f32 %v2114_v11, %v1003_v15  ;;  %v2249_v22 = vmul.f32 %v1003_v15, %v1003_v15  ;;  %v1005_v23 = vpop.f32.mrb[31].mxu0  ;;  %v1261_v24 = vpop.f32.mrb[31].mxu1 }
 0x150   :  { %v3105_v26 = vpack.c.bf16 %v4104_v17, %v4102_v10 }
 0x151   :  { %3233 = vst [vmem:[%s4605_s2 + $0x38] sm:$0xff] %v2945_v20   ;;  %v2376_v28 = vadd.f32 %v2375_v19, %v2249_v22 }
 0x152   :  { %3265 = vst [vmem:[%s4605_s2 + $0x138] sm:$0xff] %v3105_v26  }
 0x154   :  { %v1008_v29 = vpop.f32.mrb[32].mxu0  ;;  %v4114_v30 = vpop.f32.mrb[32].mxu1 }
 0x155   :  { %v2116_v31 = vadd.f32 %v2115_v21, %v1008_v29  ;;  %v2250_v32 = vmul.f32 %v1008_v29, %v1008_v29  ;;  %v1010_v33 = vpop.f32.mrb[33].mxu0  ;;  %v1266_v34 = vpop.f32.mrb[33].mxu1 }
 0x156   :  { %v1011_v35 = vpop.f32.mrb[34].mxu0  ;;  %v4116_v37 = vpop.f32.mrb[34].mxu1 }
 0x157   :  { %v2377_v39 = vadd.f32 %v2376_v28, %v2250_v32  ;;  %v2950_v40 = vpack.c.bf16 %v1011_v35, %v1008_v29  ;;  %v2117_v41 = vadd.f32 %v2116_v31, %v1011_v35  ;;  %v2251_v42 = vmul.f32 %v1011_v35, %v1011_v35  ;;  %v1013_v44 = vpop.f32.mrb[35].mxu0  ;;  %v1269_v45 = vpop.f32.mrb[35].mxu1 }
 0x158   :  { %v3110_v46 = vpack.c.bf16 %v4116_v37, %v4114_v30 }
 0x159   :  { %3234 = vst [vmem:[%s4605_s2 + $0x40] sm:$0xff] %v2950_v40   ;;  %v2378_v48 = vadd.f32 %v2377_v39, %v2251_v42 }
 0x15a   :  { %3266 = vst [vmem:[%s4605_s2 + $0x140] sm:$0xff] %v3110_v46  }
 0x15c   :  { %v1016_v49 = vpop.f32.mrb[36].mxu0  ;;  %v4126_v50 = vpop.f32.mrb[36].mxu1 }
 0x15d   :  { %v2118_v51 = vadd.f32 %v2117_v41, %v1016_v49  ;;  %v2252_v52 = vmul.f32 %v1016_v49, %v1016_v49  ;;  %v1018_v53 = vpop.f32.mrb[37].mxu0  ;;  %v1274_v55 = vpop.f32.mrb[37].mxu1 }
 0x15e   :  { %v1019_v56 = vpop.f32.mrb[38].mxu0  ;;  %v4128_v57 = vpop.f32.mrb[38].mxu1 }
 0x15f   :  { %v2379_v59 = vadd.f32 %v2378_v48, %v2252_v52  ;;  %v2955_v60 = vpack.c.bf16 %v1019_v56, %v1016_v49  ;;  %v2119_v62 = vadd.f32 %v2118_v51, %v1019_v56  ;;  %v2253_v63 = vmul.f32 %v1019_v56, %v1019_v56  ;;  %v1021_v1 = vpop.f32.mrb[39].mxu0  ;;  %v1277_v2 = vpop.f32.mrb[39].mxu1 }
 0x160   :  { %v3115_v3 = vpack.c.bf16 %v4128_v57, %v4126_v50 }
 0x161   :  { %3235 = vst [vmem:[%s4605_s2 + $0x48] sm:$0xff] %v2955_v60   ;;  %v2380_v5 = vadd.f32 %v2379_v59, %v2253_v63 }
 0x162   :  { %3267 = vst [vmem:[%s4605_s2 + $0x148] sm:$0xff] %v3115_v3  }
 0x164   :  { %v1024_v6 = vpop.f32.mrb[40].mxu0  ;;  %v4138_v7 = vpop.f32.mrb[40].mxu1 }
 0x165   :  { %v2120_v9 = vadd.f32 %v2119_v62, %v1024_v6  ;;  %v2254_v11 = vmul.f32 %v1024_v6, %v1024_v6  ;;  %v1026_v12 = vpop.f32.mrb[41].mxu0  ;;  %v1282_v13 = vpop.f32.mrb[41].mxu1 }
 0x166   :  { %v1027_v14 = vpop.f32.mrb[42].mxu0  ;;  %v4140_v15 = vpop.f32.mrb[42].mxu1 }
 0x167   :  { %v2381_v19 = vadd.f32 %v2380_v5, %v2254_v11  ;;  %v2960_v20 = vpack.c.bf16 %v1027_v14, %v1024_v6  ;;  %v2121_v21 = vadd.f32 %v2120_v9, %v1027_v14  ;;  %v2255_v22 = vmul.f32 %v1027_v14, %v1027_v14  ;;  %v1029_v23 = vpop.f32.mrb[43].mxu0  ;;  %v1285_v24 = vpop.f32.mrb[43].mxu1 }
 0x168   :  { %v3120_v26 = vpack.c.bf16 %v4140_v15, %v4138_v7 }
 0x169   :  { %3236 = vst [vmem:[%s4605_s2 + $0x50] sm:$0xff] %v2960_v20   ;;  %v2382_v28 = vadd.f32 %v2381_v19, %v2255_v22 }
 0x16a   :  { %3268 = vst [vmem:[%s4605_s2 + $0x150] sm:$0xff] %v3120_v26  }
 0x16c   :  { %v1032_v29 = vpop.f32.mrb[44].mxu0  ;;  %v4150_v31 = vpop.f32.mrb[44].mxu1 }
 0x16d   :  { %v2122_v32 = vadd.f32 %v2121_v21, %v1032_v29  ;;  %v2256_v33 = vmul.f32 %v1032_v29, %v1032_v29  ;;  %v1034_v34 = vpop.f32.mrb[45].mxu0  ;;  %v1290_v35 = vpop.f32.mrb[45].mxu1 }
 0x16e   :  { %v1035_v39 = vpop.f32.mrb[46].mxu0  ;;  %v4152_v40 = vpop.f32.mrb[46].mxu1 }
 0x16f   :  { %v2383_v41 = vadd.f32 %v2382_v28, %v2256_v33  ;;  %v2965_v42 = vpack.c.bf16 %v1035_v39, %v1032_v29  ;;  %v2123_v44 = vadd.f32 %v2122_v32, %v1035_v39  ;;  %v2257_v45 = vmul.f32 %v1035_v39, %v1035_v39  ;;  %v1037_v46 = vpop.f32.mrb[47].mxu0  ;;  %v1293_v48 = vpop.f32.mrb[47].mxu1 }
 0x170   :  { %v3125_v49 = vpack.c.bf16 %v4152_v40, %v4150_v31 }
 0x171   :  { %3237 = vst [vmem:[%s4605_s2 + $0x58] sm:$0xff] %v2965_v42   ;;  %v2384_v51 = vadd.f32 %v2383_v41, %v2257_v45 }
 0x172   :  { %3269 = vst [vmem:[%s4605_s2 + $0x158] sm:$0xff] %v3125_v49  }
 0x174   :  { %v1040_v52 = vpop.f32.mrb[48].mxu0  ;;  %v4162_v53 = vpop.f32.mrb[48].mxu1 }
 0x175   :  { %v2124_v55 = vadd.f32 %v2123_v44, %v1040_v52  ;;  %v2258_v56 = vmul.f32 %v1040_v52, %v1040_v52  ;;  %v1042_v59 = vpop.f32.mrb[49].mxu0  ;;  %v1298_v60 = vpop.f32.mrb[49].mxu1 }
 0x176   :  { %v1043_v62 = vpop.f32.mrb[50].mxu0  ;;  %v4164_v63 = vpop.f32.mrb[50].mxu1 }
 0x177   :  { %v2385_v1 = vadd.f32 %v2384_v51, %v2258_v56  ;;  %v2970_v2 = vpack.c.bf16 %v1043_v62, %v1040_v52  ;;  %v2125_v3 = vadd.f32 %v2124_v55, %v1043_v62  ;;  %v2259_v5 = vmul.f32 %v1043_v62, %v1043_v62  ;;  %v1045_v6 = vpop.f32.mrb[51].mxu0  ;;  %v1301_v9 = vpop.f32.mrb[51].mxu1 }
 0x178   :  { %v3130_v11 = vpack.c.bf16 %v4164_v63, %v4162_v53 }
 0x179   :  { %3238 = vst [vmem:[%s4605_s2 + $0x60] sm:$0xff] %v2970_v2   ;;  %v2386_v12 = vadd.f32 %v2385_v1, %v2259_v5 }
 0x17a   :  { %3270 = vst [vmem:[%s4605_s2 + $0x160] sm:$0xff] %v3130_v11  }
 0x17c   :  { %v1048_v13 = vpop.f32.mrb[52].mxu0  ;;  %v4174_v14 = vpop.f32.mrb[52].mxu1 }
 0x17d   :  { %v2126_v19 = vadd.f32 %v2125_v3, %v1048_v13  ;;  %v2260_v20 = vmul.f32 %v1048_v13, %v1048_v13  ;;  %v1050_v21 = vpop.f32.mrb[53].mxu0  ;;  %v1306_v22 = vpop.f32.mrb[53].mxu1 }
 0x17e   :  { %v1051_v23 = vpop.f32.mrb[54].mxu0  ;;  %v4176_v24 = vpop.f32.mrb[54].mxu1 }
 0x17f   :  { %v2387_v26 = vadd.f32 %v2386_v12, %v2260_v20  ;;  %v2975_v28 = vpack.c.bf16 %v1051_v23, %v1048_v13  ;;  %v2127_v29 = vadd.f32 %v2126_v19, %v1051_v23  ;;  %v2261_v32 = vmul.f32 %v1051_v23, %v1051_v23  ;;  %v1053_v33 = vpop.f32.mrb[55].mxu0  ;;  %v1309_v34 = vpop.f32.mrb[55].mxu1 }
 0x180   :  { %v3135_v35 = vpack.c.bf16 %v4176_v24, %v4174_v14 }
 0x181   :  { %3239 = vst [vmem:[%s4605_s2 + $0x68] sm:$0xff] %v2975_v28   ;;  %v2388_v39 = vadd.f32 %v2387_v26, %v2261_v32 }
 0x182   :  { %3271 = vst [vmem:[%s4605_s2 + $0x168] sm:$0xff] %v3135_v35  }
 0x184   :  { %v1056_v41 = vpop.f32.mrb[56].mxu0  ;;  %v4186_v42 = vpop.f32.mrb[56].mxu1 }
 0x185   :  { %v2128_v44 = vadd.f32 %v2127_v29, %v1056_v41  ;;  %v2262_v45 = vmul.f32 %v1056_v41, %v1056_v41  ;;  %v1058_v46 = vpop.f32.mrb[57].mxu0  ;;  %v1314_v48 = vpop.f32.mrb[57].mxu1 }
 0x186   :  { %v1059_v49 = vpop.f32.mrb[58].mxu0  ;;  %v4188_v51 = vpop.f32.mrb[58].mxu1 }
 0x187   :  { %v2389_v52 = vadd.f32 %v2388_v39, %v2262_v45  ;;  %v2980_v55 = vpack.c.bf16 %v1059_v49, %v1056_v41  ;;  %v2129_v56 = vadd.f32 %v2128_v44, %v1059_v49  ;;  %v2263_v59 = vmul.f32 %v1059_v49, %v1059_v49  ;;  %v1061_v60 = vpop.f32.mrb[59].mxu0  ;;  %v1317_v62 = vpop.f32.mrb[59].mxu1 }
 0x188   :  { %v3140_v1 = vpack.c.bf16 %v4188_v51, %v4186_v42 }
 0x189   :  { %3240 = vst [vmem:[%s4605_s2 + $0x70] sm:$0xff] %v2980_v55   ;;  %v2390_v2 = vadd.f32 %v2389_v52, %v2263_v59 }
 0x18a   :  { %3272 = vst [vmem:[%s4605_s2 + $0x170] sm:$0xff] %v3140_v1  }
 0x18c   :  { %v1064_v3 = vpop.f32.mrb[60].mxu0  ;;  %v4198_v5 = vpop.f32.mrb[60].mxu1 }
 0x18d   :  { %v2130_v6 = vadd.f32 %v2129_v56, %v1064_v3  ;;  %v2264_v9 = vmul.f32 %v1064_v3, %v1064_v3  ;;  %v1066_v11 = vpop.f32.mrb[61].mxu0  ;;  %v1322_v12 = vpop.f32.mrb[61].mxu1 }
 0x18e   :  { %v1067_v13 = vpop.f32.mrb[62].mxu0  ;;  %v4200_v19 = vpop.f32.mrb[62].mxu1 }
 0x18f   :  { %v2391_v20 = vadd.f32 %v2390_v2, %v2264_v9  ;;  %v2985_v21 = vpack.c.bf16 %v1067_v13, %v1064_v3  ;;  %v2131_v22 = vadd.f32 %v2130_v6, %v1067_v13  ;;  %v2265_v23 = vmul.f32 %v1067_v13, %v1067_v13  ;;  %v1069_v26 = vpop.f32.mrb[63].mxu0  ;;  %v1325_v28 = vpop.f32.mrb[63].mxu1 }
 0x190   :  { %v3145_v29 = vpack.c.bf16 %v4200_v19, %v4198_v5 }
 0x191   :  { %3241 = vst [vmem:[%s4605_s2 + $0x78] sm:$0xff] %v2985_v21   ;;  %v2392_v32 = vadd.f32 %v2391_v20, %v2265_v23 }
 0x192   :  { %3273 = vst [vmem:[%s4605_s2 + $0x178] sm:$0xff] %v3145_v29  }
 0x194   :  { %v1072_v33 = vpop.f32.mrb[64].mxu0  ;;  %v4210_v34 = vpop.f32.mrb[64].mxu1 }
 0x195   :  { %v2132_v35 = vadd.f32 %v2131_v22, %v1072_v33  ;;  %v2266_v39 = vmul.f32 %v1072_v33, %v1072_v33  ;;  %v1074_v41 = vpop.f32.mrb[65].mxu0  ;;  %v1330_v44 = vpop.f32.mrb[65].mxu1 }
 0x196   :  { %v1075_v45 = vpop.f32.mrb[66].mxu0  ;;  %v4212_v46 = vpop.f32.mrb[66].mxu1 }
 0x197   :  { %v2393_v48 = vadd.f32 %v2392_v32, %v2266_v39  ;;  %v2990_v49 = vpack.c.bf16 %v1075_v45, %v1072_v33  ;;  %v2133_v52 = vadd.f32 %v2132_v35, %v1075_v45  ;;  %v2267_v55 = vmul.f32 %v1075_v45, %v1075_v45  ;;  %v1077_v56 = vpop.f32.mrb[67].mxu0  ;;  %v1333_v59 = vpop.f32.mrb[67].mxu1 }
 0x198   :  { %v3150_v60 = vpack.c.bf16 %v4212_v46, %v4210_v34 }
 0x199   :  { %3242 = vst [vmem:[%s4605_s2 + $0x80] sm:$0xff] %v2990_v49   ;;  %v2394_v62 = vadd.f32 %v2393_v48, %v2267_v55 }
 0x19a   :  { %3274 = vst [vmem:[%s4605_s2 + $0x180] sm:$0xff] %v3150_v60  }
 0x19c   :  { %v1080_v1 = vpop.f32.mrb[68].mxu0  ;;  %v4222_v2 = vpop.f32.mrb[68].mxu1 }
 0x19d   :  { %v2134_v3 = vadd.f32 %v2133_v52, %v1080_v1  ;;  %v2268_v6 = vmul.f32 %v1080_v1, %v1080_v1  ;;  %v1082_v9 = vpop.f32.mrb[69].mxu0  ;;  %v1338_v11 = vpop.f32.mrb[69].mxu1 }
 0x19e   :  { %v1083_v12 = vpop.f32.mrb[70].mxu0  ;;  %v4224_v13 = vpop.f32.mrb[70].mxu1 }
 0x19f   :  { %v2395_v20 = vadd.f32 %v2394_v62, %v2268_v6  ;;  %v2995_v21 = vpack.c.bf16 %v1083_v12, %v1080_v1  ;;  %v2135_v22 = vadd.f32 %v2134_v3, %v1083_v12  ;;  %v2269_v23 = vmul.f32 %v1083_v12, %v1083_v12  ;;  %v1085_v26 = vpop.f32.mrb[71].mxu0  ;;  %v1341_v28 = vpop.f32.mrb[71].mxu1 }
 0x1a0   :  { %v3155_v29 = vpack.c.bf16 %v4224_v13, %v4222_v2 }
 0x1a1   :  { %3243 = vst [vmem:[%s4605_s2 + $0x88] sm:$0xff] %v2995_v21   ;;  %v2396_v32 = vadd.f32 %v2395_v20, %v2269_v23 }
 0x1a2   :  { %3275 = vst [vmem:[%s4605_s2 + $0x188] sm:$0xff] %v3155_v29  }
 0x1a4   :  { %v1088_v33 = vpop.f32.mrb[72].mxu0  ;;  %v4234_v35 = vpop.f32.mrb[72].mxu1 }
 0x1a5   :  { %v2136_v39 = vadd.f32 %v2135_v22, %v1088_v33  ;;  %v2270_v41 = vmul.f32 %v1088_v33, %v1088_v33  ;;  %v1090_v44 = vpop.f32.mrb[73].mxu0  ;;  %v1346_v45 = vpop.f32.mrb[73].mxu1 }
 0x1a6   :  { %v1091_v48 = vpop.f32.mrb[74].mxu0  ;;  %v4236_v49 = vpop.f32.mrb[74].mxu1 }
 0x1a7   :  { %v2397_v52 = vadd.f32 %v2396_v32, %v2270_v41  ;;  %v3000_v55 = vpack.c.bf16 %v1091_v48, %v1088_v33  ;;  %v2137_v56 = vadd.f32 %v2136_v39, %v1091_v48  ;;  %v2271_v59 = vmul.f32 %v1091_v48, %v1091_v48  ;;  %v1093_v60 = vpop.f32.mrb[75].mxu0  ;;  %v1349_v62 = vpop.f32.mrb[75].mxu1 }
 0x1a8   :  { %v3160_v1 = vpack.c.bf16 %v4236_v49, %v4234_v35 }
 0x1a9   :  { %3244 = vst [vmem:[%s4605_s2 + $0x90] sm:$0xff] %v3000_v55   ;;  %v2398_v3 = vadd.f32 %v2397_v52, %v2271_v59 }
 0x1aa   :  { %3276 = vst [vmem:[%s4605_s2 + $0x190] sm:$0xff] %v3160_v1  }
 0x1ac   :  { %v1096_v6 = vpop.f32.mrb[76].mxu0  ;;  %v4246_v9 = vpop.f32.mrb[76].mxu1 }
 0x1ad   :  { %v2138_v11 = vadd.f32 %v2137_v56, %v1096_v6  ;;  %v2272_v12 = vmul.f32 %v1096_v6, %v1096_v6  ;;  %v1098_v20 = vpop.f32.mrb[77].mxu0  ;;  %v1354_v21 = vpop.f32.mrb[77].mxu1 }
 0x1ae   :  { %v1099_v22 = vpop.f32.mrb[78].mxu0  ;;  %v4248_v23 = vpop.f32.mrb[78].mxu1 }
 0x1af   :  { %v2399_v26 = vadd.f32 %v2398_v3, %v2272_v12  ;;  %v3005_v28 = vpack.c.bf16 %v1099_v22, %v1096_v6  ;;  %v2139_v29 = vadd.f32 %v2138_v11, %v1099_v22  ;;  %v2273_v32 = vmul.f32 %v1099_v22, %v1099_v22  ;;  %v1101_v33 = vpop.f32.mrb[79].mxu0  ;;  %v1357_v39 = vpop.f32.mrb[79].mxu1 }
 0x1b0   :  { %v3165_v41 = vpack.c.bf16 %v4248_v23, %v4246_v9 }
 0x1b1   :  { %3245 = vst [vmem:[%s4605_s2 + $0x98] sm:$0xff] %v3005_v28   ;;  %v2400_v44 = vadd.f32 %v2399_v26, %v2273_v32 }
 0x1b2   :  { %3277 = vst [vmem:[%s4605_s2 + $0x198] sm:$0xff] %v3165_v41  }
 0x1b4   :  { %v1104_v45 = vpop.f32.mrb[80].mxu0  ;;  %v4258_v48 = vpop.f32.mrb[80].mxu1 }
 0x1b5   :  { %v2140_v52 = vadd.f32 %v2139_v29, %v1104_v45  ;;  %v2274_v55 = vmul.f32 %v1104_v45, %v1104_v45  ;;  %v1106_v56 = vpop.f32.mrb[81].mxu0  ;;  %v1362_v59 = vpop.f32.mrb[81].mxu1 }
 0x1b6   :  { %v1107_v60 = vpop.f32.mrb[82].mxu0  ;;  %v4260_v62 = vpop.f32.mrb[82].mxu1 }
 0x1b7   :  { %v2401_v1 = vadd.f32 %v2400_v44, %v2274_v55  ;;  %v3010_v3 = vpack.c.bf16 %v1107_v60, %v1104_v45  ;;  %v2141_v6 = vadd.f32 %v2140_v52, %v1107_v60  ;;  %v2275_v11 = vmul.f32 %v1107_v60, %v1107_v60  ;;  %v1109_v12 = vpop.f32.mrb[83].mxu0  ;;  %v1365_v20 = vpop.f32.mrb[83].mxu1 }
 0x1b8   :  { %v3170_v21 = vpack.c.bf16 %v4260_v62, %v4258_v48 }
 0x1b9   :  { %3246 = vst [vmem:[%s4605_s2 + $0xa0] sm:$0xff] %v3010_v3   ;;  %v2402_v22 = vadd.f32 %v2401_v1, %v2275_v11 }
 0x1ba   :  { %3278 = vst [vmem:[%s4605_s2 + $0x1a0] sm:$0xff] %v3170_v21  }
 0x1bc   :  { %v1112_v26 = vpop.f32.mrb[84].mxu0  ;;  %v4270_v28 = vpop.f32.mrb[84].mxu1 }
 0x1bd   :  { %v2142_v29 = vadd.f32 %v2141_v6, %v1112_v26  ;;  %v2276_v32 = vmul.f32 %v1112_v26, %v1112_v26  ;;  %v1114_v33 = vpop.f32.mrb[85].mxu0  ;;  %v1370_v39 = vpop.f32.mrb[85].mxu1 }
 0x1be   :  { %v1115_v41 = vpop.f32.mrb[86].mxu0  ;;  %v4272_v44 = vpop.f32.mrb[86].mxu1 }
 0x1bf   :  { %v2403_v45 = vadd.f32 %v2402_v22, %v2276_v32  ;;  %v3015_v52 = vpack.c.bf16 %v1115_v41, %v1112_v26  ;;  %v2143_v55 = vadd.f32 %v2142_v29, %v1115_v41  ;;  %v2277_v56 = vmul.f32 %v1115_v41, %v1115_v41  ;;  %v1117_v59 = vpop.f32.mrb[87].mxu0  ;;  %v1373_v60 = vpop.f32.mrb[87].mxu1 }
 0x1c0   :  { %v3175_v1 = vpack.c.bf16 %v4272_v44, %v4270_v28 }
 0x1c1   :  { %3247 = vst [vmem:[%s4605_s2 + $0xa8] sm:$0xff] %v3015_v52   ;;  %v2404_v3 = vadd.f32 %v2403_v45, %v2277_v56 }
 0x1c2   :  { %3279 = vst [vmem:[%s4605_s2 + $0x1a8] sm:$0xff] %v3175_v1  }
 0x1c4   :  { %v1120_v6 = vpop.f32.mrb[88].mxu0  ;;  %v4282_v11 = vpop.f32.mrb[88].mxu1 }
 0x1c5   :  { %v2144_v12 = vadd.f32 %v2143_v55, %v1120_v6  ;;  %v2278_v20 = vmul.f32 %v1120_v6, %v1120_v6  ;;  %v1122_v21 = vpop.f32.mrb[89].mxu0  ;;  %v1378_v22 = vpop.f32.mrb[89].mxu1 }
 0x1c6   :  { %v1123_v26 = vpop.f32.mrb[90].mxu0  ;;  %v4284_v29 = vpop.f32.mrb[90].mxu1 }
 0x1c7   :  { %v2405_v32 = vadd.f32 %v2404_v3, %v2278_v20  ;;  %v3020_v33 = vpack.c.bf16 %v1123_v26, %v1120_v6  ;;  %v2145_v39 = vadd.f32 %v2144_v12, %v1123_v26  ;;  %v2279_v41 = vmul.f32 %v1123_v26, %v1123_v26  ;;  %v1125_v52 = vpop.f32.mrb[91].mxu0  ;;  %v1381_v45 = vpop.f32.mrb[91].mxu1 }
 0x1c8   :  { %v3180_v56 = vpack.c.bf16 %v4284_v29, %v4282_v11 }
 0x1c9   :  { %3248 = vst [vmem:[%s4605_s2 + $0xb0] sm:$0xff] %v3020_v33   ;;  %v2406_v55 = vadd.f32 %v2405_v32, %v2279_v41 }
 0x1ca   :  { %3280 = vst [vmem:[%s4605_s2 + $0x1b0] sm:$0xff] %v3180_v56  }
 0x1cc   :  { %v1128_v59 = vpop.f32.mrb[92].mxu0  ;;  %v4294_v60 = vpop.f32.mrb[92].mxu1 }
 0x1cd   :  { %4639 = vst [vmem:[#allocation2_spill] sm:$0xff] %v4294_v60  ;;  %v2146_v1 = vadd.f32 %v2145_v39, %v1128_v59  ;;  %v2280_v3 = vmul.f32 %v1128_v59, %v1128_v59  ;;  %v1130_v6 = vpop.f32.mrb[93].mxu0  ;;  %v1386_v12 = vpop.f32.mrb[93].mxu1 }
 0x1ce   :  { %v1131_v20 = vpop.f32.mrb[94].mxu0  ;;  %v4296_v21 = vpop.f32.mrb[94].mxu1 }
 0x1cf   :  { %4640 = vst [vmem:[#allocation3_spill] sm:$0xff] %v4296_v21  ;;  %v2407_v22 = vadd.f32 %v2406_v55, %v2280_v3  ;;  %v3025_v26 = vpack.c.bf16 %v1131_v20, %v1128_v59  ;;  %v2147_v52 = vadd.f32 %v2146_v1, %v1131_v20  ;;  %v2281_v45 = vmul.f32 %v1131_v20, %v1131_v20  ;;  %v1133_v33 = vpop.f32.mrb[95].mxu0  ;;  %v1389_v32 = vpop.f32.mrb[95].mxu1 }
 0x1d0   :  { %v3185_v41 = vpack.c.bf16 %v4296_v21, %v4294_v60 }
 0x1d1   :  { %3249 = vst [vmem:[%s4605_s2 + $0xb8] sm:$0xff] %v3025_v26   ;;  %v2408_v39 = vadd.f32 %v2407_v22, %v2281_v45 }
 0x1d2   :  { %3281 = vst [vmem:[%s4605_s2 + $0x1b8] sm:$0xff] %v3185_v41  }
 0x1d4   :  { %v1136_v56 = vpop.f32.mrb[96].mxu0  ;;  %v4306_v6 = vpop.f32.mrb[96].mxu1 }
 0x1d5   :  { %4641 = vst [vmem:[#allocation4_spill] sm:$0xff] %v4306_v6  ;;  %v2148_v55 = vadd.f32 %v2147_v52, %v1136_v56  ;;  %v2282_v59 = vmul.f32 %v1136_v56, %v1136_v56  ;;  %v1138_v1 = vpop.f32.mrb[97].mxu0  ;;  %v1394_v3 = vpop.f32.mrb[97].mxu1 }
 0x1d6   :  { %v1139_v12 = vpop.f32.mrb[98].mxu0  ;;  %v4308_v20 = vpop.f32.mrb[98].mxu1 }
 0x1d7   :  { %4642 = vst [vmem:[#allocation5_spill] sm:$0xff] %v4308_v20  ;;  %v2409_v33 = vadd.f32 %v2408_v39, %v2282_v59  ;;  %v3030_v32 = vpack.c.bf16 %v1139_v12, %v1136_v56  ;;  %v2149_v21 = vadd.f32 %v2148_v55, %v1139_v12  ;;  %v2283_v60 = vmul.f32 %v1139_v12, %v1139_v12  ;;  %v1141_v26 = vpop.f32.mrb[99].mxu0  ;;  %v1397_v22 = vpop.f32.mrb[99].mxu1 }
 0x1d8   :  { %v3190_v45 = vpack.c.bf16 %v4308_v20, %v4306_v6 }
 0x1d9   :  { %3250 = vst [vmem:[%s4605_s2 + $0xc0] sm:$0xff] %v3030_v32   ;;  %v2410_v52 = vadd.f32 %v2409_v33, %v2283_v60 }
 0x1da   :  { %3282 = vst [vmem:[%s4605_s2 + $0x1c0] sm:$0xff] %v3190_v45  }
 0x1dc   :  { %v1144_v41 = vpop.f32.mrb[100].mxu0  ;;  %v4318_v1 = vpop.f32.mrb[100].mxu1 }
 0x1dd   :  { %4643 = vst [vmem:[#allocation6_spill] sm:$0xff] %v4318_v1  ;;  %v2150_v39 = vadd.f32 %v2149_v21, %v1144_v41  ;;  %v2284_v56 = vmul.f32 %v1144_v41, %v1144_v41  ;;  %v1146_v55 = vpop.f32.mrb[101].mxu0  ;;  %v1402_v59 = vpop.f32.mrb[101].mxu1 }
 0x1de   :  { %v1147_v3 = vpop.f32.mrb[102].mxu0  ;;  %v4320_v12 = vpop.f32.mrb[102].mxu1 }
 0x1df   :  { %4644 = vst [vmem:[#allocation7_spill] sm:$0xff] %v4320_v12  ;;  %v2411_v26 = vadd.f32 %v2410_v52, %v2284_v56  ;;  %v3035_v22 = vpack.c.bf16 %v1147_v3, %v1144_v41  ;;  %v2151_v20 = vadd.f32 %v2150_v39, %v1147_v3  ;;  %v2285_v6 = vmul.f32 %v1147_v3, %v1147_v3  ;;  %v1149_v32 = vpop.f32.mrb[103].mxu0  ;;  %v1405_v60 = vpop.f32.mrb[103].mxu1 }
 0x1e0   :  { %v3195_v33 = vpack.c.bf16 %v4320_v12, %v4318_v1 }
 0x1e1   :  { %3251 = vst [vmem:[%s4605_s2 + $0xc8] sm:$0xff] %v3035_v22   ;;  %v2412_v21 = vadd.f32 %v2411_v26, %v2285_v6 }
 0x1e2   :  { %3283 = vst [vmem:[%s4605_s2 + $0x1c8] sm:$0xff] %v3195_v33  }
 0x1e4   :  { %v1152_v45 = vpop.f32.mrb[104].mxu0  ;;  %v4330_v55 = vpop.f32.mrb[104].mxu1 }
 0x1e5   :  { %4645 = vst [vmem:[#allocation8_spill] sm:$0xff] %v4330_v55  ;;  %v2152_v52 = vadd.f32 %v2151_v20, %v1152_v45  ;;  %v2286_v41 = vmul.f32 %v1152_v45, %v1152_v45  ;;  %v1154_v39 = vpop.f32.mrb[105].mxu0  ;;  %v1410_v56 = vpop.f32.mrb[105].mxu1 }
 0x1e6   :  { %v1155_v59 = vpop.f32.mrb[106].mxu0  ;;  %v4332_v3 = vpop.f32.mrb[106].mxu1 }
 0x1e7   :  { %4646 = vst [vmem:[#allocation9_spill] sm:$0xff] %v4332_v3  ;;  %v2413_v32 = vadd.f32 %v2412_v21, %v2286_v41  ;;  %v3040_v60 = vpack.c.bf16 %v1155_v59, %v1152_v45  ;;  %v2153_v12 = vadd.f32 %v2152_v52, %v1155_v59  ;;  %v2287_v1 = vmul.f32 %v1155_v59, %v1155_v59  ;;  %v1157_v22 = vpop.f32.mrb[107].mxu0  ;;  %v1413_v6 = vpop.f32.mrb[107].mxu1 }
 0x1e8   :  { %v3200_v26 = vpack.c.bf16 %v4332_v3, %v4330_v55 }
 0x1e9   :  { %3252 = vst [vmem:[%s4605_s2 + $0xd0] sm:$0xff] %v3040_v60   ;;  %v2414_v20 = vadd.f32 %v2413_v32, %v2287_v1 }
 0x1ea   :  { %3284 = vst [vmem:[%s4605_s2 + $0x1d0] sm:$0xff] %v3200_v26  }
 0x1ec   :  { %v1160_v33 = vpop.f32.mrb[108].mxu0  ;;  %v4342_v39 = vpop.f32.mrb[108].mxu1 }
 0x1ed   :  { %4647 = vst [vmem:[#allocation10_spill] sm:$0xff] %v4342_v39  ;;  %v2154_v21 = vadd.f32 %v2153_v12, %v1160_v33  ;;  %v2288_v45 = vmul.f32 %v1160_v33, %v1160_v33  ;;  %v1162_v52 = vpop.f32.mrb[109].mxu0  ;;  %v1418_v41 = vpop.f32.mrb[109].mxu1 }
 0x1ee   :  { %v1163_v56 = vpop.f32.mrb[110].mxu0  ;;  %v4344_v59 = vpop.f32.mrb[110].mxu1 }
 0x1ef   :  { %4648 = vst [vmem:[#allocation11_spill] sm:$0xff] %v4344_v59  ;;  %v2415_v22 = vadd.f32 %v2414_v20, %v2288_v45  ;;  %v3045_v6 = vpack.c.bf16 %v1163_v56, %v1160_v33  ;;  %v2155_v3 = vadd.f32 %v2154_v21, %v1163_v56  ;;  %v2289_v55 = vmul.f32 %v1163_v56, %v1163_v56  ;;  %v1165_v60 = vpop.f32.mrb[111].mxu0  ;;  %v1421_v1 = vpop.f32.mrb[111].mxu1 }
 0x1f0   :  { %v3205_v32 = vpack.c.bf16 %v4344_v59, %v4342_v39 }
 0x1f1   :  { %3253 = vst [vmem:[%s4605_s2 + $0xd8] sm:$0xff] %v3045_v6   ;;  %v2416_v12 = vadd.f32 %v2415_v22, %v2289_v55 }
 0x1f2   :  { %3285 = vst [vmem:[%s4605_s2 + $0x1d8] sm:$0xff] %v3205_v32  }
 0x1f4   :  { %v1168_v26 = vpop.f32.mrb[112].mxu0  ;;  %v4354_v52 = vpop.f32.mrb[112].mxu1 }
 0x1f5   :  { %4649 = vst [vmem:[#allocation12_spill] sm:$0xff] %v4354_v52  ;;  %v2156_v20 = vadd.f32 %v2155_v3, %v1168_v26  ;;  %v2290_v33 = vmul.f32 %v1168_v26, %v1168_v26  ;;  %v1170_v21 = vpop.f32.mrb[113].mxu0  ;;  %v1426_v45 = vpop.f32.mrb[113].mxu1 }
 0x1f6   :  { %v1171_v41 = vpop.f32.mrb[114].mxu0  ;;  %v4356_v56 = vpop.f32.mrb[114].mxu1 }
 0x1f7   :  { %4650 = vst [vmem:[#allocation13_spill] sm:$0xff] %v4356_v56  ;;  %v2417_v60 = vadd.f32 %v2416_v12, %v2290_v33  ;;  %v3050_v1 = vpack.c.bf16 %v1171_v41, %v1168_v26  ;;  %v2157_v59 = vadd.f32 %v2156_v20, %v1171_v41  ;;  %v2291_v39 = vmul.f32 %v1171_v41, %v1171_v41  ;;  %v1173_v6 = vpop.f32.mrb[115].mxu0  ;;  %v1429_v55 = vpop.f32.mrb[115].mxu1 }
 0x1f8   :  { %v3210_v22 = vpack.c.bf16 %v4356_v56, %v4354_v52 }
 0x1f9   :  { %3254 = vst [vmem:[%s4605_s2 + $0xe0] sm:$0xff] %v3050_v1   ;;  %v2418_v3 = vadd.f32 %v2417_v60, %v2291_v39 }
 0x1fa   :  { %3286 = vst [vmem:[%s4605_s2 + $0x1e0] sm:$0xff] %v3210_v22  }
 0x1fc   :  { %v1176_v32 = vpop.f32.mrb[116].mxu0  ;;  %v4366_v21 = vpop.f32.mrb[116].mxu1 }
 0x1fd   :  { %4651 = vst [vmem:[#allocation14_spill] sm:$0xff] %v4366_v21  ;;  %v2158_v12 = vadd.f32 %v2157_v59, %v1176_v32  ;;  %v2292_v26 = vmul.f32 %v1176_v32, %v1176_v32  ;;  %v1178_v20 = vpop.f32.mrb[117].mxu0  ;;  %v1434_v33 = vpop.f32.mrb[117].mxu1 }
 0x1fe   :  { %v1179_v45 = vpop.f32.mrb[118].mxu0  ;;  %v4368_v41 = vpop.f32.mrb[118].mxu1 }
 0x1ff   :  { %4652 = vst [vmem:[#allocation15_spill] sm:$0xff] %v4368_v41  ;;  %v2419_v6 = vadd.f32 %v2418_v3, %v2292_v26  ;;  %v3055_v55 = vpack.c.bf16 %v1179_v45, %v1176_v32  ;;  %v2159_v56 = vadd.f32 %v2158_v12, %v1179_v45  ;;  %v2293_v52 = vmul.f32 %v1179_v45, %v1179_v45  ;;  %v1181_v1 = vpop.f32.mrb[119].mxu0  ;;  %v1437_v39 = vpop.f32.mrb[119].mxu1 }
 0x200   :  { %v3215_v60 = vpack.c.bf16 %v4368_v41, %v4366_v21 }
 0x201   :  { %3255 = vst [vmem:[%s4605_s2 + $0xe8] sm:$0xff] %v3055_v55   ;;  %v2420_v59 = vadd.f32 %v2419_v6, %v2293_v52 }
 0x202   :  { %3287 = vst [vmem:[%s4605_s2 + $0x1e8] sm:$0xff] %v3215_v60  }
 0x204   :  { %v1184_v22 = vpop.f32.mrb[120].mxu0  ;;  %v4378_v20 = vpop.f32.mrb[120].mxu1 }
 0x205   :  { %4653 = vst [vmem:[#allocation16_spill] sm:$0xff] %v4378_v20  ;;  %v2160_v3 = vadd.f32 %v2159_v56, %v1184_v22  ;;  %v2294_v32 = vmul.f32 %v1184_v22, %v1184_v22  ;;  %v1186_v12 = vpop.f32.mrb[121].mxu0  ;;  %v1442_v26 = vpop.f32.mrb[121].mxu1 }
 0x206   :  { %v1187_v33 = vpop.f32.mrb[122].mxu0  ;;  %v4380_v45 = vpop.f32.mrb[122].mxu1 }
 0x207   :  { %4654 = vst [vmem:[#allocation17_spill] sm:$0xff] %v4380_v45  ;;  %v2421_v1 = vadd.f32 %v2420_v59, %v2294_v32  ;;  %v3060_v39 = vpack.c.bf16 %v1187_v33, %v1184_v22  ;;  %v2161_v41 = vadd.f32 %v2160_v3, %v1187_v33  ;;  %v2295_v21 = vmul.f32 %v1187_v33, %v1187_v33  ;;  %v1189_v55 = vpop.f32.mrb[123].mxu0  ;;  %v1445_v52 = vpop.f32.mrb[123].mxu1 }
 0x208   :  { %v3220_v6 = vpack.c.bf16 %v4380_v45, %v4378_v20 }
 0x209   :  { %3256 = vst [vmem:[%s4605_s2 + $0xf0] sm:$0xff] %v3060_v39   ;;  %v2422_v56 = vadd.f32 %v2421_v1, %v2295_v21 }
 0x20a   :  { %3288 = vst [vmem:[%s4605_s2 + $0x1f0] sm:$0xff] %v3220_v6   ;;  %v2298_v6 = vmul.f32 %v3964_v0, %v3964_v0 }
 0x20c   :  { %v1192_v60 = vpop.f32.mrb[124].mxu0  ;;  %v4390_v12 = vpop.f32.mrb[124].mxu1 }
 0x20d   :  { %v2162_v59 = vadd.f32 %v2161_v41, %v1192_v60  ;;  %v2296_v22 = vmul.f32 %v1192_v60, %v1192_v60  ;;  %v1194_v3 = vpop.f32.mrb[125].mxu0  ;;  %v1450_v32 = vpop.f32.mrb[125].mxu1 }
 0x20e   :  { %v1195_v26 = vpop.f32.mrb[126].mxu0  ;;  %v4392_v33 = vpop.f32.mrb[126].mxu1  ;;  %v3533_v32 = vmov 0.0  }
 0x20f   :  { %v2423_v55 = vadd.f32 %v2422_v56, %v2296_v22  ;;  %v3065_v52 = vpack.c.bf16 %v1195_v26, %v1192_v60  ;;  %v2163_v45 = vadd.f32 %v2162_v59, %v1195_v26  ;;  %v2297_v20 = vmul.f32 %v1195_v26, %v1195_v26  ;;  %v1197_v39 = vpop.f32.mrb[127].mxu0  ;;  %v1453_v21 = vpop.f32.mrb[127].mxu1  ;;  %2099 = vst [vmem:[%s4606_s3] sm:$0x3] %v3533_v32 }
 0x210   :  { %v3225_v1 = vpack.c.bf16 %v4392_v33, %v4390_v12  ;;  %v2299_v56 = vmul.f32 %v3975_v8, %v3975_v8  ;;  %v2300_v22 = vmul.f32 %v3988_v18, %v3988_v18 }
 0x211   :  { %3257 = vst [vmem:[%s4605_s2 + $0xf8] sm:$0xff] %v3065_v52   ;;  %v2164_v41 = vadd.f32 %v2163_v45, %v3964_v0  ;;  %v2424_v3 = vadd.f32 %v2423_v55, %v2297_v20  ;;  %v2301_v45 = vmul.f32 %v3999_v27, %v3999_v27  ;;  %v2302_v52 = vmul.f32 %v4012_v38, %v4012_v38 }
 0x212   :  { %3289 = vst [vmem:[%s4605_s2 + $0x1f8] sm:$0xff] %v3225_v1  }
 0x213   :  { %v2165_v60 = vadd.f32 %v2164_v41, %v3975_v8  ;;  %v2425_v59 = vadd.f32 %v2424_v3, %v2298_v6  ;;  %v2303_v8 = vmul.f32 %v4023_v47, %v4023_v47 }
 0x215   :  { %v2166_v0 = vadd.f32 %v2165_v60, %v3988_v18  ;;  %v2426_v20 = vadd.f32 %v2425_v59, %v2299_v56  ;;  %v2304_v18 = vmul.f32 %v4036_v58, %v4036_v58 }
 0x217   :  { %v2167_v26 = vadd.f32 %v2166_v0, %v3999_v27  ;;  %v2427_v55 = vadd.f32 %v2426_v20, %v2300_v22  ;;  %v2305_v27 = vmul.f32 %v4047_v4, %v4047_v4 }
 0x219   :  { %v2168_v39 = vadd.f32 %v2167_v26, %v4012_v38  ;;  %v2428_v21 = vadd.f32 %v2427_v55, %v2301_v45  ;;  %v2306_v38 = vmul.f32 %v4060_v16, %v4060_v16 }
 0x21b   :  { %v2169_v1 = vadd.f32 %v2168_v39, %v4023_v47  ;;  %v2429_v6 = vadd.f32 %v2428_v21, %v2302_v52  ;;  %v2307_v47 = vmul.f32 %v4068_v25, %v4068_v25 }
 0x21d   :  { %v2170_v41 = vadd.f32 %v2169_v1, %v4036_v58  ;;  %v2430_v3 = vadd.f32 %v2429_v6, %v2303_v8  ;;  %v2308_v58 = vmul.f32 %v4078_v36, %v4078_v36 }
 0x21f   :  { %v2171_v32 = vadd.f32 %v2170_v41, %v4047_v4  ;;  %v2431_v56 = vadd.f32 %v2430_v3, %v2304_v18  ;;  %v2309_v4 = vmul.f32 %v4080_v43, %v4080_v43 }
 0x221   :  { %v2172_v60 = vadd.f32 %v2171_v32, %v4060_v16  ;;  %v2432_v59 = vadd.f32 %v2431_v56, %v2305_v27  ;;  %v2310_v16 = vmul.f32 %v4090_v54, %v4090_v54 }
 0x223   :  { %v2173_v22 = vadd.f32 %v2172_v60, %v4068_v25  ;;  %v2433_v0 = vadd.f32 %v2432_v59, %v2306_v38  ;;  %v2311_v25 = vmul.f32 %v4092_v61, %v4092_v61 }
 0x225   :  { %v2174_v20 = vadd.f32 %v2173_v22, %v4078_v36  ;;  %v2434_v45 = vadd.f32 %v2433_v0, %v2307_v47  ;;  %v2312_v36 = vmul.f32 %v4102_v10, %v4102_v10 }
 0x227   :  { %v2175_v26 = vadd.f32 %v2174_v20, %v4080_v43  ;;  %v2435_v55 = vadd.f32 %v2434_v45, %v2308_v58  ;;  %v2313_v43 = vmul.f32 %v4104_v17, %v4104_v17 }
 0x229   :  { %v2176_v52 = vadd.f32 %v2175_v26, %v4090_v54  ;;  %v2436_v39 = vadd.f32 %v2435_v55, %v2309_v4  ;;  %v2314_v54 = vmul.f32 %v4114_v30, %v4114_v30 }
 0x22b   :  { %v2177_v21 = vadd.f32 %v2176_v52, %v4092_v61  ;;  %v2437_v8 = vadd.f32 %v2436_v39, %v2310_v16  ;;  %v2315_v61 = vmul.f32 %v4116_v37, %v4116_v37 }
 0x22d   :  { %v2178_v1 = vadd.f32 %v2177_v21, %v4102_v10  ;;  %v2438_v6 = vadd.f32 %v2437_v8, %v2311_v25  ;;  %v2316_v10 = vmul.f32 %v4126_v50, %v4126_v50 }
 0x22f   :  { %v2179_v18 = vadd.f32 %v2178_v1, %v4104_v17  ;;  %v2439_v41 = vadd.f32 %v2438_v6, %v2312_v36  ;;  %v2317_v17 = vmul.f32 %v4128_v57, %v4128_v57 }
 0x231   :  { %v2180_v3 = vadd.f32 %v2179_v18, %v4114_v30  ;;  %v2440_v27 = vadd.f32 %v2439_v41, %v2313_v43  ;;  %v2318_v30 = vmul.f32 %v4138_v7, %v4138_v7 }
 0x233   :  { %v2441_v32 = vadd.f32 %v2440_v27, %v2314_v54  ;;  %v2181_v56 = vadd.f32 %v2180_v3, %v4116_v37  ;;  %v2319_v37 = vmul.f32 %v4140_v15, %v4140_v15 }
 0x235   :  { %v2182_v38 = vadd.f32 %v2181_v56, %v4126_v50  ;;  %v2442_v60 = vadd.f32 %v2441_v32, %v2315_v61  ;;  %v2320_v50 = vmul.f32 %v4150_v31, %v4150_v31  ;;  %v2330_v32 = vmul.f32 %v4210_v34, %v4210_v34 }
 0x237   :  { %v2183_v59 = vadd.f32 %v2182_v38, %v4128_v57  ;;  %v2443_v47 = vadd.f32 %v2442_v60, %v2316_v10  ;;  %v2321_v57 = vmul.f32 %v4152_v40, %v4152_v40  ;;  %v2331_v38 = vmul.f32 %v4212_v46, %v4212_v46 }
 0x239   :  { %v2184_v22 = vadd.f32 %v2183_v59, %v4138_v7  ;;  %v2444_v0 = vadd.f32 %v2443_v47, %v2317_v17  ;;  %v2322_v7 = vmul.f32 %v4162_v53, %v4162_v53  ;;  %v2332_v17 = vmul.f32 %v4222_v2, %v4222_v2 }
 0x23a   :  { %v2333_v47 = vmul.f32 %v4224_v13, %v4224_v13 }
 0x23b   :  { %v2185_v58 = vadd.f32 %v2184_v22, %v4140_v15  ;;  %v2445_v20 = vadd.f32 %v2444_v0, %v2318_v30  ;;  %v2323_v15 = vmul.f32 %v4164_v63, %v4164_v63  ;;  %v2334_v22 = vmul.f32 %v4234_v35, %v4234_v35 }
 0x23d   :  { %v2186_v45 = vadd.f32 %v2185_v58, %v4150_v31  ;;  %v2446_v4 = vadd.f32 %v2445_v20, %v2319_v37  ;;  %v2324_v31 = vmul.f32 %v4174_v14, %v4174_v14  ;;  %v2335_v37 = vmul.f32 %v4236_v49, %v4236_v49 }
 0x23e   :  { %v2336_v20 = vmul.f32 %v4246_v9, %v4246_v9 }
 0x23f   :  { %v2187_v26 = vadd.f32 %v2186_v45, %v4152_v40  ;;  %v2447_v55 = vadd.f32 %v2446_v4, %v2320_v50  ;;  %v2325_v40 = vmul.f32 %v4176_v24, %v4176_v24  ;;  %v2337_v45 = vmul.f32 %v4248_v23, %v4248_v23 }
 0x241   :  { %v2188_v16 = vadd.f32 %v2187_v26, %v4162_v53  ;;  %v2448_v52 = vadd.f32 %v2447_v55, %v2321_v57  ;;  %v2326_v53 = vmul.f32 %v4186_v42, %v4186_v42  ;;  %v2338_v57 = vmul.f32 %v4258_v48, %v4258_v48 }
 0x242   :  { %v2339_v55 = vmul.f32 %v4260_v62, %v4260_v62 }
 0x243   :  { %v2189_v39 = vadd.f32 %v2188_v16, %v4164_v63  ;;  %v2449_v25 = vadd.f32 %v2448_v52, %v2322_v7  ;;  %v2327_v63 = vmul.f32 %v4188_v51, %v4188_v51  ;;  %v2340_v16 = vmul.f32 %v4270_v28, %v4270_v28 }
 0x245   :  { %v2190_v21 = vadd.f32 %v2189_v39, %v4174_v14  ;;  %v2450_v8 = vadd.f32 %v2449_v25, %v2323_v15  ;;  %v2328_v14 = vmul.f32 %v4198_v5, %v4198_v5  ;;  %v2341_v15 = vmul.f32 %v4272_v44, %v4272_v44 }
 0x246   :  { %v2342_v25 = vmul.f32 %v4282_v11, %v4282_v11 }
 0x247   :  { %v2191_v36 = vadd.f32 %v2190_v21, %v4176_v24  ;;  %v2451_v1 = vadd.f32 %v2450_v8, %v2324_v31  ;;  %v2329_v24 = vmul.f32 %v4200_v19, %v4200_v19  ;;  %v2343_v21 = vmul.f32 %v4284_v29, %v4284_v29 }
 0x249   :  { %v2192_v6 = vadd.f32 %v2191_v36, %v4186_v42  ;;  %v2452_v43 = vadd.f32 %v2451_v1, %v2325_v40 }
 0x24b   :  { %v2193_v18 = vadd.f32 %v2192_v6, %v4188_v51  ;;  %v2453_v41 = vadd.f32 %v2452_v43, %v2326_v53 }
 0x24d   :  { %v2194_v54 = vadd.f32 %v2193_v18, %v4198_v5  ;;  %v2454_v3 = vadd.f32 %v2453_v41, %v2327_v63 }
 0x24f   :  { %v2195_v27 = vadd.f32 %v2194_v54, %v4200_v19  ;;  %v2455_v61 = vadd.f32 %v2454_v3, %v2328_v14 }
 0x251   :  { %v2196_v42 = vadd.f32 %v2195_v27, %v4210_v34  ;;  %v2456_v56 = vadd.f32 %v2455_v61, %v2329_v24  ;;  %v4659_v24 = vld [vmem:[#allocation6_spill] sm:$0xff] }
 0x252   :  { %v2348_v61 = vmul.f32 %v4659_v24, %v4659_v24 }
 0x253   :  { %v2457_v51 = vadd.f32 %v2456_v56, %v2330_v32  ;;  %v2197_v10 = vadd.f32 %v2196_v42, %v4212_v46  ;;  %v4660_v32 = vld [vmem:[#allocation7_spill] sm:$0xff] }
 0x255   :  { %v2458_v5 = vadd.f32 %v2457_v51, %v2331_v38  ;;  %v2198_v60 = vadd.f32 %v2197_v10, %v4222_v2  ;;  %v2349_v51 = vmul.f32 %v4660_v32, %v4660_v32  ;;  %v4661_v38 = vld [vmem:[#allocation8_spill] sm:$0xff] }
 0x257   :  { %v2459_v19 = vadd.f32 %v2458_v5, %v2332_v17  ;;  %v2199_v59 = vadd.f32 %v2198_v60, %v4224_v13  ;;  %v2350_v60 = vmul.f32 %v4661_v38, %v4661_v38 }
 0x259   :  { %v2460_v34 = vadd.f32 %v2459_v19, %v2333_v47  ;;  %v2200_v30 = vadd.f32 %v2199_v59, %v4234_v35  ;;  %v4662_v19 = vld [vmem:[#allocation9_spill] sm:$0xff] }
 0x25a   :  { %v2351_v47 = vmul.f32 %v4662_v19, %v4662_v19 }
 0x25b   :  { %v2461_v0 = vadd.f32 %v2460_v34, %v2334_v22  ;;  %v2201_v46 = vadd.f32 %v2200_v30, %v4236_v49  ;;  %v4663_v30 = vld [vmem:[#allocation10_spill] sm:$0xff] }
 0x25d   :  { %v2462_v58 = vadd.f32 %v2461_v0, %v2335_v37  ;;  %v2202_v2 = vadd.f32 %v2201_v46, %v4246_v9  ;;  %v2352_v0 = vmul.f32 %v4663_v30, %v4663_v30  ;;  %v4664_v37 = vld [vmem:[#allocation11_spill] sm:$0xff] }
 0x25f   :  { %v2463_v50 = vadd.f32 %v2462_v58, %v2336_v20  ;;  %v2203_v13 = vadd.f32 %v2202_v2, %v4248_v23  ;;  %v2353_v2 = vmul.f32 %v4664_v37, %v4664_v37 }
 0x261   :  { %v2464_v4 = vadd.f32 %v2463_v50, %v2337_v45  ;;  %v2204_v35 = vadd.f32 %v2203_v13, %v4258_v48  ;;  %v4665_v50 = vld [vmem:[#allocation12_spill] sm:$0xff] }
 0x262   :  { %v2354_v45 = vmul.f32 %v4665_v50, %v4665_v50 }
 0x263   :  { %v2465_v26 = vadd.f32 %v2464_v4, %v2338_v57  ;;  %v2205_v49 = vadd.f32 %v2204_v35, %v4260_v62  ;;  %v4666_v35 = vld [vmem:[#allocation13_spill] sm:$0xff] }
 0x265   :  { %v2466_v7 = vadd.f32 %v2465_v26, %v2339_v55  ;;  %v2206_v9 = vadd.f32 %v2205_v49, %v4270_v28  ;;  %v4655_v28 = vld [vmem:[#allocation2_spill] sm:$0xff]  ;;  %v2355_v26 = vmul.f32 %v4666_v35, %v4666_v35 }
 0x266   :  { %v2344_v36 = vmul.f32 %v4655_v28, %v4655_v28  ;;  %v4667_v55 = vld [vmem:[#allocation14_spill] sm:$0xff] }
 0x267   :  { %v2467_v52 = vadd.f32 %v2466_v7, %v2340_v16  ;;  %v2207_v23 = vadd.f32 %v2206_v9, %v4272_v44  ;;  %v4656_v44 = vld [vmem:[#allocation3_spill] sm:$0xff]  ;;  %v2356_v9 = vmul.f32 %v4667_v55, %v4667_v55 }
 0x268   :  { %v2345_v6 = vmul.f32 %v4656_v44, %v4656_v44 }
 0x269   :  { %v2468_v39 = vadd.f32 %v2467_v52, %v2341_v15  ;;  %v2208_v48 = vadd.f32 %v2207_v23, %v4282_v11  ;;  %v4657_v11 = vld [vmem:[#allocation4_spill] sm:$0xff]  ;;  %v4668_v52 = vld [vmem:[#allocation15_spill] sm:$0xff] }
 0x26a   :  { %v2346_v18 = vmul.f32 %v4657_v11, %v4657_v11  ;;  %v2357_v15 = vmul.f32 %v4668_v52, %v4668_v52 }
 0x26b   :  { %v2469_v31 = vadd.f32 %v2468_v39, %v2342_v25  ;;  %v2209_v62 = vadd.f32 %v2208_v48, %v4284_v29  ;;  %v4658_v29 = vld [vmem:[#allocation5_spill] sm:$0xff]  ;;  %v4669_v48 = vld [vmem:[#allocation16_spill] sm:$0xff] }
 0x26c   :  { %v2347_v54 = vmul.f32 %v4658_v29, %v4658_v29 }
 0x26d   :  { %v2470_v8 = vadd.f32 %v2469_v31, %v2343_v21  ;;  %v2210_v40 = vadd.f32 %v2209_v62, %v4655_v28  ;;  %v2358_v31 = vmul.f32 %v4669_v48, %v4669_v48  ;;  %v4670_v21 = vld [vmem:[#allocation17_spill] sm:$0xff] }
 0x26e   :  { %v2359_v28 = vmul.f32 %v4670_v21, %v4670_v21 }
 0x26f   :  { %v2471_v1 = vadd.f32 %v2470_v8, %v2344_v36  ;;  %v2211_v53 = vadd.f32 %v2210_v40, %v4656_v44  ;;  %v2360_v40 = vmul.f32 %v4390_v12, %v4390_v12 }
 0x271   :  { %v2472_v43 = vadd.f32 %v2471_v1, %v2345_v6  ;;  %v2212_v63 = vadd.f32 %v2211_v53, %v4657_v11  ;;  %v2361_v6 = vmul.f32 %v4392_v33, %v4392_v33 }
 0x273   :  { %v2473_v41 = vadd.f32 %v2472_v43, %v2346_v18  ;;  %v2213_v14 = vadd.f32 %v2212_v63, %v4658_v29 }
 0x275   :  { %v2474_v3 = vadd.f32 %v2473_v41, %v2347_v54  ;;  %v2214_v27 = vadd.f32 %v2213_v14, %v4659_v24 }
 0x277   :  { %v2475_v42 = vadd.f32 %v2474_v3, %v2348_v61  ;;  %v2215_v56 = vadd.f32 %v2214_v27, %v4660_v32 }
 0x279   :  { %v2476_v10 = vadd.f32 %v2475_v42, %v2349_v51  ;;  %v2216_v5 = vadd.f32 %v2215_v56, %v4661_v38 }
 0x27b   :  { %v2477_v17 = vadd.f32 %v2476_v10, %v2350_v60  ;;  %v2217_v59 = vadd.f32 %v2216_v5, %v4662_v19 }
 0x27d   :  { %v2478_v34 = vadd.f32 %v2477_v17, %v2351_v47  ;;  %v2218_v22 = vadd.f32 %v2217_v59, %v4663_v30 }
 0x27f   :  { %v2479_v46 = vadd.f32 %v2478_v34, %v2352_v0  ;;  %v2219_v58 = vadd.f32 %v2218_v22, %v4664_v37 }
 0x281   :  { %v2480_v20 = vadd.f32 %v2479_v46, %v2353_v2  ;;  %v2220_v13 = vadd.f32 %v2219_v58, %v4665_v50 }
 0x283   :  { %v2481_v4 = vadd.f32 %v2480_v20, %v2354_v45  ;;  %v2221_v57 = vadd.f32 %v2220_v13, %v4666_v35 }
 0x285   :  { %v2482_v49 = vadd.f32 %v2481_v4, %v2355_v26  ;;  %v2222_v7 = vadd.f32 %v2221_v57, %v4667_v55 }
 0x287   :  { %v2483_v16 = vadd.f32 %v2482_v49, %v2356_v9  ;;  %v2223_v23 = vadd.f32 %v2222_v7, %v4668_v52 }
 0x289   :  { %v2484_v39 = vadd.f32 %v2483_v16, %v2357_v15  ;;  %v2224_v25 = vadd.f32 %v2223_v23, %v4669_v48 }
 0x28b   :  { %v2485_v62 = vadd.f32 %v2484_v39, %v2358_v31  ;;  %v2225_v8 = vadd.f32 %v2224_v25, %v4670_v21 }
 0x28d   :  { %v2486_v36 = vadd.f32 %v2485_v62, %v2359_v28  ;;  %v2226_v1 = vadd.f32 %v2225_v8, %v4390_v12  ;;  %v2100_v12 = vld [vmem:[%s4606_s3] sm:$0x3] }
 0x28f   :  { %v2487_v44 = vadd.f32 %v2486_v36, %v2360_v40  ;;  %v2227_v53 = vadd.f32 %v2226_v1, %v4392_v33 }
 0x291   :  { %v2228_v43 = vrot.slane %v2227_v53, 4  ;;  %v2488_v11 = vadd.f32 %v2487_v44, %v2361_v6 }
 0x293   :  { %v2229_v63 = vadd.f32 %v2228_v43, %v2227_v53  ;;  %v2489_v18 = vrot.slane %v2488_v11, 4 }
 0x295   :  { %v2230_v41 = vrot.slane %v2229_v63, 2  ;;  %v2490_v29 = vadd.f32 %v2489_v18, %v2488_v11 }
 0x297   :  { %v2231_v14 = vadd.f32 %v2230_v41, %v2229_v63  ;;  %v2491_v54 = vrot.slane %v2490_v29, 2 }
 0x299   :  { %v2232_v3 = vrot.slane %v2231_v14, 1  ;;  %v2492_v24 = vadd.f32 %v2491_v54, %v2490_v29 }
 0x29b   :  { %v2493_v27 = vrot.slane %v2492_v24, 1  ;;  %v2233_v61 = vadd.f32 %v2232_v3, %v2231_v14 }
 0x29d   :  { %v2494_v42 = vadd.f32 %v2493_v27, %v2492_v24 }
 0x29f   :  { %v2496_v32 = vsel %vm2495_vm0, %v2233_v61, %v2494_v42 }
 0x2a0   :  { %v2497_v33 = vadd.f32 %v2496_v32, %v2100_v12 }
 0x2a2   :  { %2498 = vst [vmem:[%s4606_s3] sm:$0x3] %v2497_v33 }

// kernel: unet_innermost_forward.5
= control target key start
LH: loop header
LB: loop body
LE: loop exit
PB: predicated region body
PF: predicated region fallthrough
CT: control target
= control target key end

     0   :  { %s1831_s0 = inlined_call_operand.vmem [shape: bf16[1024,128], index: 0, kind: input, shape index: {}]   ;;  %s1832_s1 = inlined_call_operand.vmem [shape: f32[1,128], index: 1, kind: input, shape index: {}]   ;;  %s1833_s2 = inlined_call_operand.vmem [shape: f32[1,128], index: 2, kind: input, shape index: {}]   ;;  %s1834_s3 = inlined_call_operand.vmem [shape: f32[1024,128], index: 3, kind: output, shape index: {}]  }
   0x1   :  { %v675_v0 = vld [vmem:[%s1831_s0] sm:$0xff]   ;;  %v930_v4 = vld [vmem:[%s1831_s0 + $0x8] sm:$0xff]   ;;  %v931_v5 = vld [vmem:[%s1831_s0 + $0x10] sm:$0xff]  }
   0x2   :  { %v1021_v1 = vld [vmem:[%s1832_s1] ss:$0 sm:$0xff]  ;;  %v676_v2 = vunpack.c.l.bf16 %v675_v0  ;;  %v677_v3 = vunpack.c.h.bf16 %v675_v0  ;;  %v932_v6 = vld [vmem:[%s1831_s0 + $0x18] sm:$0xff]   ;;  %v680_v8 = vunpack.c.l.bf16 %v930_v4  ;;  %v681_v9 = vunpack.c.h.bf16 %v930_v4  ;;  %v934_v25 = vld [vmem:[%s1831_s0 + $0x28] sm:$0xff]  }
   0x3   :  { %v1035_v7 = vld [vmem:[%s1833_s2] ss:$0 sm:$0xff]  ;;  %v684_v10 = vunpack.c.l.bf16 %v931_v5  ;;  %v685_v11 = vunpack.c.h.bf16 %v931_v5  ;;  %v688_v14 = vunpack.c.l.bf16 %v932_v6  ;;  %v689_v15 = vunpack.c.h.bf16 %v932_v6  ;;  %v935_v26 = vld [vmem:[%s1831_s0 + $0x30] sm:$0xff]   ;;  %v936_v31 = vld [vmem:[%s1831_s0 + $0x38] sm:$0xff]  }
   0x4   :  { %v277_v12 = vmul.f32 %v676_v2, %v1021_v1  ;;  %v278_v13 = vmul.f32 %v677_v3, %v1021_v1  ;;  %v279_v16 = vmul.f32 %v680_v8, %v1021_v1  ;;  %v280_v17 = vmul.f32 %v681_v9, %v1021_v1  ;;  %v933_v20 = vld [vmem:[%s1831_s0 + $0x20] sm:$0xff]   ;;  %v938_v53 = vld [vmem:[%s1831_s0 + $0x48] sm:$0xff]   ;;  %v939_v54 = vld [vmem:[%s1831_s0 + $0x50] sm:$0xff]  }
   0x5   :  { %v281_v18 = vmul.f32 %v684_v10, %v1021_v1  ;;  %v282_v19 = vmul.f32 %v685_v11, %v1021_v1  ;;  %v283_v23 = vmul.f32 %v688_v14, %v1021_v1  ;;  %v284_v24 = vmul.f32 %v689_v15, %v1021_v1  ;;  %v937_v48 = vld [vmem:[%s1831_s0 + $0x40] sm:$0xff]   ;;  %v940_v59 = vld [vmem:[%s1831_s0 + $0x58] sm:$0xff]  }
   0x6   :  { %v412_v21 = vadd.f32 %v1035_v7, %v277_v12  ;;  %v413_v22 = vadd.f32 %v1035_v7, %v278_v13  ;;  %v414_v27 = vadd.f32 %v1035_v7, %v279_v16  ;;  %v415_v28 = vadd.f32 %v1035_v7, %v280_v17  ;;  %v941_v14 = vld [vmem:[%s1831_s0 + $0x60] sm:$0xff]  }
   0x7   :  { %v416_v29 = vadd.f32 %v1035_v7, %v281_v18  ;;  %v417_v30 = vadd.f32 %v1035_v7, %v282_v19  ;;  %v418_v32 = vadd.f32 %v1035_v7, %v283_v23  ;;  %v419_v33 = vadd.f32 %v1035_v7, %v284_v24  ;;  %v942_v19 = vld [vmem:[%s1831_s0 + $0x68] sm:$0xff]  }
   0x8   :  { %540 = vst [vmem:[%s1834_s3] sm:$0xff] %v412_v21  ;;  %541 = vst [vmem:[%s1834_s3 + $0x8] sm:$0xff] %v413_v22  ;;  %v692_v34 = vunpack.c.l.bf16 %v933_v20  ;;  %v693_v35 = vunpack.c.h.bf16 %v933_v20  ;;  %v696_v36 = vunpack.c.l.bf16 %v934_v25  ;;  %v697_v37 = vunpack.c.h.bf16 %v934_v25  ;;  %v943_v20 = vld [vmem:[%s1831_s0 + $0x70] sm:$0xff]   ;;  %v944_v25 = vld [vmem:[%s1831_s0 + $0x78] sm:$0xff]  }
   0x9   :  { %542 = vst [vmem:[%s1834_s3 + $0x10] sm:$0xff] %v414_v27  ;;  %543 = vst [vmem:[%s1834_s3 + $0x18] sm:$0xff] %v415_v28  ;;  %v700_v38 = vunpack.c.l.bf16 %v935_v26  ;;  %v701_v39 = vunpack.c.h.bf16 %v935_v26  ;;  %v704_v42 = vunpack.c.l.bf16 %v936_v31  ;;  %v705_v43 = vunpack.c.h.bf16 %v936_v31 }
   0xa   :  { %544 = vst [vmem:[%s1834_s3 + $0x20] sm:$0xff] %v416_v29  ;;  %545 = vst [vmem:[%s1834_s3 + $0x28] sm:$0xff] %v417_v30  ;;  %v285_v40 = vmul.f32 %v692_v34, %v1021_v1  ;;  %v286_v41 = vmul.f32 %v693_v35, %v1021_v1  ;;  %v287_v44 = vmul.f32 %v696_v36, %v1021_v1  ;;  %v708_v62 = vunpack.c.l.bf16 %v937_v48 }
   0xb   :  { %546 = vst [vmem:[%s1834_s3 + $0x30] sm:$0xff] %v418_v32  ;;  %547 = vst [vmem:[%s1834_s3 + $0x38] sm:$0xff] %v419_v33  ;;  %v288_v45 = vmul.f32 %v697_v37, %v1021_v1  ;;  %v289_v46 = vmul.f32 %v700_v38, %v1021_v1  ;;  %v290_v47 = vmul.f32 %v701_v39, %v1021_v1  ;;  %v709_v63 = vunpack.c.h.bf16 %v937_v48  ;;  %v947_v48 = vld [vmem:[%s1831_s0 + $0x90] sm:$0xff]  }
   0xc   :  { %v420_v49 = vadd.f32 %v1035_v7, %v285_v40  ;;  %v421_v50 = vadd.f32 %v1035_v7, %v286_v41  ;;  %v291_v51 = vmul.f32 %v704_v42, %v1021_v1  ;;  %v292_v52 = vmul.f32 %v705_v43, %v1021_v1  ;;  %v945_v42 = vld [vmem:[%s1831_s0 + $0x80] sm:$0xff]  }
   0xd   :  { %v422_v55 = vadd.f32 %v1035_v7, %v287_v44  ;;  %v423_v56 = vadd.f32 %v1035_v7, %v288_v45  ;;  %v424_v57 = vadd.f32 %v1035_v7, %v289_v46  ;;  %v425_v58 = vadd.f32 %v1035_v7, %v290_v47  ;;  %v946_v47 = vld [vmem:[%s1831_s0 + $0x88] sm:$0xff]  }
   0xe   :  { %548 = vst [vmem:[%s1834_s3 + $0x40] sm:$0xff] %v420_v49  ;;  %549 = vst [vmem:[%s1834_s3 + $0x48] sm:$0xff] %v421_v50  ;;  %v426_v60 = vadd.f32 %v1035_v7, %v291_v51  ;;  %v427_v61 = vadd.f32 %v1035_v7, %v292_v52  ;;  %v712_v0 = vunpack.c.l.bf16 %v938_v53  ;;  %v713_v2 = vunpack.c.h.bf16 %v938_v53  ;;  %v948_v53 = vld [vmem:[%s1831_s0 + $0x98] sm:$0xff]  }
   0xf   :  { %550 = vst [vmem:[%s1834_s3 + $0x50] sm:$0xff] %v422_v55  ;;  %551 = vst [vmem:[%s1834_s3 + $0x58] sm:$0xff] %v423_v56  ;;  %v716_v3 = vunpack.c.l.bf16 %v939_v54  ;;  %v717_v4 = vunpack.c.h.bf16 %v939_v54  ;;  %v293_v5 = vmul.f32 %v708_v62, %v1021_v1  ;;  %v294_v6 = vmul.f32 %v709_v63, %v1021_v1 }
  0x10   :  { %552 = vst [vmem:[%s1834_s3 + $0x60] sm:$0xff] %v424_v57  ;;  %553 = vst [vmem:[%s1834_s3 + $0x68] sm:$0xff] %v425_v58  ;;  %v720_v8 = vunpack.c.l.bf16 %v940_v59  ;;  %v721_v9 = vunpack.c.h.bf16 %v940_v59  ;;  %v295_v10 = vmul.f32 %v712_v0, %v1021_v1  ;;  %v296_v11 = vmul.f32 %v713_v2, %v1021_v1 }
  0x11   :  { %554 = vst [vmem:[%s1834_s3 + $0x70] sm:$0xff] %v426_v60  ;;  %555 = vst [vmem:[%s1834_s3 + $0x78] sm:$0xff] %v427_v61  ;;  %v297_v12 = vmul.f32 %v716_v3, %v1021_v1  ;;  %v298_v13 = vmul.f32 %v717_v4, %v1021_v1  ;;  %v428_v15 = vadd.f32 %v1035_v7, %v293_v5  ;;  %v724_v28 = vunpack.c.l.bf16 %v941_v14 }
  0x12   :  { %v429_v16 = vadd.f32 %v1035_v7, %v294_v6  ;;  %v299_v17 = vmul.f32 %v720_v8, %v1021_v1  ;;  %v300_v18 = vmul.f32 %v721_v9, %v1021_v1  ;;  %v430_v21 = vadd.f32 %v1035_v7, %v295_v10  ;;  %v949_v8 = vld [vmem:[%s1831_s0 + $0xa0] sm:$0xff]  }
  0x13   :  { %v431_v22 = vadd.f32 %v1035_v7, %v296_v11  ;;  %v432_v23 = vadd.f32 %v1035_v7, %v297_v12  ;;  %v433_v24 = vadd.f32 %v1035_v7, %v298_v13  ;;  %556 = vst [vmem:[%s1834_s3 + $0x80] sm:$0xff] %v428_v15  ;;  %v725_v29 = vunpack.c.h.bf16 %v941_v14  ;;  %v950_v13 = vld [vmem:[%s1831_s0 + $0xa8] sm:$0xff]   ;;  %v951_v14 = vld [vmem:[%s1831_s0 + $0xb0] sm:$0xff]  }
  0x14   :  { %557 = vst [vmem:[%s1834_s3 + $0x88] sm:$0xff] %v429_v16  ;;  %v434_v26 = vadd.f32 %v1035_v7, %v299_v17  ;;  %v435_v27 = vadd.f32 %v1035_v7, %v300_v18  ;;  %558 = vst [vmem:[%s1834_s3 + $0x90] sm:$0xff] %v430_v21  ;;  %v728_v30 = vunpack.c.l.bf16 %v942_v19  ;;  %v729_v31 = vunpack.c.h.bf16 %v942_v19  ;;  %v952_v19 = vld [vmem:[%s1831_s0 + $0xb8] sm:$0xff]  }
  0x15   :  { %559 = vst [vmem:[%s1834_s3 + $0x98] sm:$0xff] %v431_v22  ;;  %560 = vst [vmem:[%s1834_s3 + $0xa0] sm:$0xff] %v432_v23  ;;  %v732_v32 = vunpack.c.l.bf16 %v943_v20  ;;  %v733_v33 = vunpack.c.h.bf16 %v943_v20  ;;  %v301_v34 = vmul.f32 %v724_v28, %v1021_v1  ;;  %v302_v35 = vmul.f32 %v725_v29, %v1021_v1 }
  0x16   :  { %561 = vst [vmem:[%s1834_s3 + $0xa8] sm:$0xff] %v433_v24  ;;  %562 = vst [vmem:[%s1834_s3 + $0xb0] sm:$0xff] %v434_v26  ;;  %v736_v36 = vunpack.c.l.bf16 %v944_v25  ;;  %v737_v37 = vunpack.c.h.bf16 %v944_v25  ;;  %v303_v38 = vmul.f32 %v728_v30, %v1021_v1  ;;  %v304_v39 = vmul.f32 %v729_v31, %v1021_v1 }
  0x17   :  { %563 = vst [vmem:[%s1834_s3 + $0xb8] sm:$0xff] %v435_v27  ;;  %v305_v40 = vmul.f32 %v732_v32, %v1021_v1  ;;  %v306_v41 = vmul.f32 %v733_v33, %v1021_v1  ;;  %v436_v43 = vadd.f32 %v1035_v7, %v301_v34  ;;  %v437_v44 = vadd.f32 %v1035_v7, %v302_v35 }
  0x18   :  { %v307_v45 = vmul.f32 %v736_v36, %v1021_v1  ;;  %v308_v46 = vmul.f32 %v737_v37, %v1021_v1  ;;  %v438_v49 = vadd.f32 %v1035_v7, %v303_v38  ;;  %v439_v50 = vadd.f32 %v1035_v7, %v304_v39  ;;  %v953_v36 = vld [vmem:[%s1831_s0 + $0xc0] sm:$0xff]  }
  0x19   :  { %v440_v51 = vadd.f32 %v1035_v7, %v305_v40  ;;  %v441_v52 = vadd.f32 %v1035_v7, %v306_v41  ;;  %564 = vst [vmem:[%s1834_s3 + $0xc0] sm:$0xff] %v436_v43  ;;  %565 = vst [vmem:[%s1834_s3 + $0xc8] sm:$0xff] %v437_v44  ;;  %v740_v56 = vunpack.c.l.bf16 %v945_v42  ;;  %v741_v57 = vunpack.c.h.bf16 %v945_v42  ;;  %v954_v41 = vld [vmem:[%s1831_s0 + $0xc8] sm:$0xff]   ;;  %v955_v42 = vld [vmem:[%s1831_s0 + $0xd0] sm:$0xff]  }
  0x1a   :  { %v442_v54 = vadd.f32 %v1035_v7, %v307_v45  ;;  %v443_v55 = vadd.f32 %v1035_v7, %v308_v46  ;;  %566 = vst [vmem:[%s1834_s3 + $0xd0] sm:$0xff] %v438_v49  ;;  %567 = vst [vmem:[%s1834_s3 + $0xd8] sm:$0xff] %v439_v50  ;;  %v744_v58 = vunpack.c.l.bf16 %v946_v47  ;;  %v745_v59 = vunpack.c.h.bf16 %v946_v47  ;;  %v956_v47 = vld [vmem:[%s1831_s0 + $0xd8] sm:$0xff]  }
  0x1b   :  { %568 = vst [vmem:[%s1834_s3 + $0xe0] sm:$0xff] %v440_v51  ;;  %569 = vst [vmem:[%s1834_s3 + $0xe8] sm:$0xff] %v441_v52  ;;  %v748_v60 = vunpack.c.l.bf16 %v947_v48  ;;  %v749_v61 = vunpack.c.h.bf16 %v947_v48  ;;  %v309_v62 = vmul.f32 %v740_v56, %v1021_v1  ;;  %v310_v63 = vmul.f32 %v741_v57, %v1021_v1 }
  0x1c   :  { %570 = vst [vmem:[%s1834_s3 + $0xf0] sm:$0xff] %v442_v54  ;;  %571 = vst [vmem:[%s1834_s3 + $0xf8] sm:$0xff] %v443_v55  ;;  %v752_v0 = vunpack.c.l.bf16 %v948_v53  ;;  %v753_v2 = vunpack.c.h.bf16 %v948_v53  ;;  %v311_v3 = vmul.f32 %v744_v58, %v1021_v1  ;;  %v312_v4 = vmul.f32 %v745_v59, %v1021_v1 }
  0x1d   :  { %v313_v5 = vmul.f32 %v748_v60, %v1021_v1  ;;  %v314_v6 = vmul.f32 %v749_v61, %v1021_v1  ;;  %v444_v9 = vadd.f32 %v1035_v7, %v309_v62  ;;  %v445_v10 = vadd.f32 %v1035_v7, %v310_v63 }
  0x1e   :  { %v315_v11 = vmul.f32 %v752_v0, %v1021_v1  ;;  %v316_v12 = vmul.f32 %v753_v2, %v1021_v1  ;;  %v446_v15 = vadd.f32 %v1035_v7, %v311_v3  ;;  %v447_v16 = vadd.f32 %v1035_v7, %v312_v4  ;;  %v957_v0 = vld [vmem:[%s1831_s0 + $0xe0] sm:$0xff]  }
  0x1f   :  { %v448_v17 = vadd.f32 %v1035_v7, %v313_v5  ;;  %v449_v18 = vadd.f32 %v1035_v7, %v314_v6  ;;  %572 = vst [vmem:[%s1834_s3 + $0x100] sm:$0xff] %v444_v9  ;;  %573 = vst [vmem:[%s1834_s3 + $0x108] sm:$0xff] %v445_v10  ;;  %v756_v22 = vunpack.c.l.bf16 %v949_v8  ;;  %v757_v23 = vunpack.c.h.bf16 %v949_v8  ;;  %v958_v6 = vld [vmem:[%s1831_s0 + $0xe8] sm:$0xff]   ;;  %v959_v8 = vld [vmem:[%s1831_s0 + $0xf0] sm:$0xff]  }
  0x20   :  { %v450_v20 = vadd.f32 %v1035_v7, %v315_v11  ;;  %v451_v21 = vadd.f32 %v1035_v7, %v316_v12  ;;  %574 = vst [vmem:[%s1834_s3 + $0x110] sm:$0xff] %v446_v15  ;;  %575 = vst [vmem:[%s1834_s3 + $0x118] sm:$0xff] %v447_v16  ;;  %v760_v24 = vunpack.c.l.bf16 %v950_v13  ;;  %v761_v25 = vunpack.c.h.bf16 %v950_v13  ;;  %v960_v13 = vld [vmem:[%s1831_s0 + $0xf8] sm:$0xff]  }
  0x21   :  { %576 = vst [vmem:[%s1834_s3 + $0x120] sm:$0xff] %v448_v17  ;;  %577 = vst [vmem:[%s1834_s3 + $0x128] sm:$0xff] %v449_v18  ;;  %v764_v26 = vunpack.c.l.bf16 %v951_v14  ;;  %v765_v27 = vunpack.c.h.bf16 %v951_v14  ;;  %v317_v28 = vmul.f32 %v756_v22, %v1021_v1  ;;  %v318_v29 = vmul.f32 %v757_v23, %v1021_v1 }
  0x22   :  { %578 = vst [vmem:[%s1834_s3 + $0x130] sm:$0xff] %v450_v20  ;;  %579 = vst [vmem:[%s1834_s3 + $0x138] sm:$0xff] %v451_v21  ;;  %v768_v30 = vunpack.c.l.bf16 %v952_v19  ;;  %v769_v31 = vunpack.c.h.bf16 %v952_v19  ;;  %v319_v32 = vmul.f32 %v760_v24, %v1021_v1  ;;  %v320_v33 = vmul.f32 %v761_v25, %v1021_v1 }
  0x23   :  { %v321_v34 = vmul.f32 %v764_v26, %v1021_v1  ;;  %v322_v35 = vmul.f32 %v765_v27, %v1021_v1  ;;  %v452_v37 = vadd.f32 %v1035_v7, %v317_v28  ;;  %v453_v38 = vadd.f32 %v1035_v7, %v318_v29 }
  0x24   :  { %v323_v39 = vmul.f32 %v768_v30, %v1021_v1  ;;  %v324_v40 = vmul.f32 %v769_v31, %v1021_v1  ;;  %v454_v43 = vadd.f32 %v1035_v7, %v319_v32  ;;  %v455_v44 = vadd.f32 %v1035_v7, %v320_v33  ;;  %v961_v30 = vld [vmem:[%s1831_s0 + $0x100] sm:$0xff]  }
  0x25   :  { %v456_v45 = vadd.f32 %v1035_v7, %v321_v34  ;;  %v457_v46 = vadd.f32 %v1035_v7, %v322_v35  ;;  %580 = vst [vmem:[%s1834_s3 + $0x140] sm:$0xff] %v452_v37  ;;  %581 = vst [vmem:[%s1834_s3 + $0x148] sm:$0xff] %v453_v38  ;;  %v772_v50 = vunpack.c.l.bf16 %v953_v36  ;;  %v773_v51 = vunpack.c.h.bf16 %v953_v36  ;;  %v962_v35 = vld [vmem:[%s1831_s0 + $0x108] sm:$0xff]   ;;  %v963_v36 = vld [vmem:[%s1831_s0 + $0x110] sm:$0xff]  }
  0x26   :  { %v458_v48 = vadd.f32 %v1035_v7, %v323_v39  ;;  %v459_v49 = vadd.f32 %v1035_v7, %v324_v40  ;;  %582 = vst [vmem:[%s1834_s3 + $0x150] sm:$0xff] %v454_v43  ;;  %583 = vst [vmem:[%s1834_s3 + $0x158] sm:$0xff] %v455_v44  ;;  %v776_v52 = vunpack.c.l.bf16 %v954_v41  ;;  %v777_v53 = vunpack.c.h.bf16 %v954_v41  ;;  %v964_v41 = vld [vmem:[%s1831_s0 + $0x118] sm:$0xff]  }
  0x27   :  { %584 = vst [vmem:[%s1834_s3 + $0x160] sm:$0xff] %v456_v45  ;;  %585 = vst [vmem:[%s1834_s3 + $0x168] sm:$0xff] %v457_v46  ;;  %v780_v54 = vunpack.c.l.bf16 %v955_v42  ;;  %v781_v55 = vunpack.c.h.bf16 %v955_v42  ;;  %v325_v56 = vmul.f32 %v772_v50, %v1021_v1  ;;  %v326_v57 = vmul.f32 %v773_v51, %v1021_v1 }
  0x28   :  { %586 = vst [vmem:[%s1834_s3 + $0x170] sm:$0xff] %v458_v48  ;;  %587 = vst [vmem:[%s1834_s3 + $0x178] sm:$0xff] %v459_v49  ;;  %v784_v58 = vunpack.c.l.bf16 %v956_v47  ;;  %v785_v59 = vunpack.c.h.bf16 %v956_v47  ;;  %v327_v60 = vmul.f32 %v776_v52, %v1021_v1  ;;  %v328_v61 = vmul.f32 %v777_v53, %v1021_v1 }
  0x29   :  { %v329_v62 = vmul.f32 %v780_v54, %v1021_v1  ;;  %v330_v63 = vmul.f32 %v781_v55, %v1021_v1  ;;  %v460_v2 = vadd.f32 %v1035_v7, %v325_v56  ;;  %v461_v3 = vadd.f32 %v1035_v7, %v326_v57 }
  0x2a   :  { %v331_v4 = vmul.f32 %v784_v58, %v1021_v1  ;;  %v332_v5 = vmul.f32 %v785_v59, %v1021_v1  ;;  %v462_v9 = vadd.f32 %v1035_v7, %v327_v60  ;;  %v463_v10 = vadd.f32 %v1035_v7, %v328_v61  ;;  %v965_v58 = vld [vmem:[%s1831_s0 + $0x120] sm:$0xff]  }
  0x2b   :  { %v464_v11 = vadd.f32 %v1035_v7, %v329_v62  ;;  %v465_v12 = vadd.f32 %v1035_v7, %v330_v63  ;;  %588 = vst [vmem:[%s1834_s3 + $0x180] sm:$0xff] %v460_v2  ;;  %589 = vst [vmem:[%s1834_s3 + $0x188] sm:$0xff] %v461_v3  ;;  %v788_v16 = vunpack.c.l.bf16 %v957_v0  ;;  %v789_v17 = vunpack.c.h.bf16 %v957_v0  ;;  %v966_v63 = vld [vmem:[%s1831_s0 + $0x128] sm:$0xff]   ;;  %v967_v0 = vld [vmem:[%s1831_s0 + $0x130] sm:$0xff]  }
  0x2c   :  { %v466_v14 = vadd.f32 %v1035_v7, %v331_v4  ;;  %v467_v15 = vadd.f32 %v1035_v7, %v332_v5  ;;  %590 = vst [vmem:[%s1834_s3 + $0x190] sm:$0xff] %v462_v9  ;;  %591 = vst [vmem:[%s1834_s3 + $0x198] sm:$0xff] %v463_v10  ;;  %v792_v18 = vunpack.c.l.bf16 %v958_v6  ;;  %v793_v19 = vunpack.c.h.bf16 %v958_v6  ;;  %v968_v6 = vld [vmem:[%s1831_s0 + $0x138] sm:$0xff]  }
  0x2d   :  { %592 = vst [vmem:[%s1834_s3 + $0x1a0] sm:$0xff] %v464_v11  ;;  %593 = vst [vmem:[%s1834_s3 + $0x1a8] sm:$0xff] %v465_v12  ;;  %v796_v20 = vunpack.c.l.bf16 %v959_v8  ;;  %v797_v21 = vunpack.c.h.bf16 %v959_v8  ;;  %v333_v22 = vmul.f32 %v788_v16, %v1021_v1  ;;  %v334_v23 = vmul.f32 %v789_v17, %v1021_v1 }
  0x2e   :  { %594 = vst [vmem:[%s1834_s3 + $0x1b0] sm:$0xff] %v466_v14  ;;  %595 = vst [vmem:[%s1834_s3 + $0x1b8] sm:$0xff] %v467_v15  ;;  %v800_v24 = vunpack.c.l.bf16 %v960_v13  ;;  %v801_v25 = vunpack.c.h.bf16 %v960_v13  ;;  %v335_v26 = vmul.f32 %v792_v18, %v1021_v1  ;;  %v336_v27 = vmul.f32 %v793_v19, %v1021_v1 }
  0x2f   :  { %v337_v28 = vmul.f32 %v796_v20, %v1021_v1  ;;  %v338_v29 = vmul.f32 %v797_v21, %v1021_v1  ;;  %v468_v31 = vadd.f32 %v1035_v7, %v333_v22  ;;  %v469_v32 = vadd.f32 %v1035_v7, %v334_v23 }
  0x30   :  { %v339_v33 = vmul.f32 %v800_v24, %v1021_v1  ;;  %v340_v34 = vmul.f32 %v801_v25, %v1021_v1  ;;  %v470_v37 = vadd.f32 %v1035_v7, %v335_v26  ;;  %v471_v38 = vadd.f32 %v1035_v7, %v336_v27  ;;  %v969_v24 = vld [vmem:[%s1831_s0 + $0x140] sm:$0xff]  }
  0x31   :  { %v472_v39 = vadd.f32 %v1035_v7, %v337_v28  ;;  %v473_v40 = vadd.f32 %v1035_v7, %v338_v29  ;;  %596 = vst [vmem:[%s1834_s3 + $0x1c0] sm:$0xff] %v468_v31  ;;  %597 = vst [vmem:[%s1834_s3 + $0x1c8] sm:$0xff] %v469_v32  ;;  %v804_v44 = vunpack.c.l.bf16 %v961_v30  ;;  %v805_v45 = vunpack.c.h.bf16 %v961_v30  ;;  %v970_v29 = vld [vmem:[%s1831_s0 + $0x148] sm:$0xff]   ;;  %v971_v30 = vld [vmem:[%s1831_s0 + $0x150] sm:$0xff]  }
  0x32   :  { %v474_v42 = vadd.f32 %v1035_v7, %v339_v33  ;;  %v475_v43 = vadd.f32 %v1035_v7, %v340_v34  ;;  %598 = vst [vmem:[%s1834_s3 + $0x1d0] sm:$0xff] %v470_v37  ;;  %599 = vst [vmem:[%s1834_s3 + $0x1d8] sm:$0xff] %v471_v38  ;;  %v808_v46 = vunpack.c.l.bf16 %v962_v35  ;;  %v809_v47 = vunpack.c.h.bf16 %v962_v35  ;;  %v972_v35 = vld [vmem:[%s1831_s0 + $0x158] sm:$0xff]  }
  0x33   :  { %600 = vst [vmem:[%s1834_s3 + $0x1e0] sm:$0xff] %v472_v39  ;;  %601 = vst [vmem:[%s1834_s3 + $0x1e8] sm:$0xff] %v473_v40  ;;  %v812_v48 = vunpack.c.l.bf16 %v963_v36  ;;  %v813_v49 = vunpack.c.h.bf16 %v963_v36  ;;  %v341_v50 = vmul.f32 %v804_v44, %v1021_v1  ;;  %v342_v51 = vmul.f32 %v805_v45, %v1021_v1 }
  0x34   :  { %602 = vst [vmem:[%s1834_s3 + $0x1f0] sm:$0xff] %v474_v42  ;;  %603 = vst [vmem:[%s1834_s3 + $0x1f8] sm:$0xff] %v475_v43  ;;  %v816_v52 = vunpack.c.l.bf16 %v964_v41  ;;  %v817_v53 = vunpack.c.h.bf16 %v964_v41  ;;  %v343_v54 = vmul.f32 %v808_v46, %v1021_v1  ;;  %v344_v55 = vmul.f32 %v809_v47, %v1021_v1 }
  0x35   :  { %v345_v56 = vmul.f32 %v812_v48, %v1021_v1  ;;  %v346_v57 = vmul.f32 %v813_v49, %v1021_v1  ;;  %v476_v59 = vadd.f32 %v1035_v7, %v341_v50  ;;  %v477_v60 = vadd.f32 %v1035_v7, %v342_v51 }
  0x36   :  { %v347_v61 = vmul.f32 %v816_v52, %v1021_v1  ;;  %v348_v62 = vmul.f32 %v817_v53, %v1021_v1  ;;  %v478_v2 = vadd.f32 %v1035_v7, %v343_v54  ;;  %v479_v3 = vadd.f32 %v1035_v7, %v344_v55  ;;  %v973_v52 = vld [vmem:[%s1831_s0 + $0x160] sm:$0xff]  }
  0x37   :  { %v480_v4 = vadd.f32 %v1035_v7, %v345_v56  ;;  %v481_v5 = vadd.f32 %v1035_v7, %v346_v57  ;;  %604 = vst [vmem:[%s1834_s3 + $0x200] sm:$0xff] %v476_v59  ;;  %605 = vst [vmem:[%s1834_s3 + $0x208] sm:$0xff] %v477_v60  ;;  %v820_v10 = vunpack.c.l.bf16 %v965_v58  ;;  %v821_v11 = vunpack.c.h.bf16 %v965_v58  ;;  %v974_v57 = vld [vmem:[%s1831_s0 + $0x168] sm:$0xff]   ;;  %v975_v58 = vld [vmem:[%s1831_s0 + $0x170] sm:$0xff]  }
  0x38   :  { %v482_v8 = vadd.f32 %v1035_v7, %v347_v61  ;;  %v483_v9 = vadd.f32 %v1035_v7, %v348_v62  ;;  %606 = vst [vmem:[%s1834_s3 + $0x210] sm:$0xff] %v478_v2  ;;  %607 = vst [vmem:[%s1834_s3 + $0x218] sm:$0xff] %v479_v3  ;;  %v824_v12 = vunpack.c.l.bf16 %v966_v63  ;;  %v825_v13 = vunpack.c.h.bf16 %v966_v63  ;;  %v976_v63 = vld [vmem:[%s1831_s0 + $0x178] sm:$0xff]  }
  0x39   :  { %608 = vst [vmem:[%s1834_s3 + $0x220] sm:$0xff] %v480_v4  ;;  %609 = vst [vmem:[%s1834_s3 + $0x228] sm:$0xff] %v481_v5  ;;  %v828_v14 = vunpack.c.l.bf16 %v967_v0  ;;  %v829_v15 = vunpack.c.h.bf16 %v967_v0  ;;  %v349_v16 = vmul.f32 %v820_v10, %v1021_v1  ;;  %v350_v17 = vmul.f32 %v821_v11, %v1021_v1 }
  0x3a   :  { %610 = vst [vmem:[%s1834_s3 + $0x230] sm:$0xff] %v482_v8  ;;  %611 = vst [vmem:[%s1834_s3 + $0x238] sm:$0xff] %v483_v9  ;;  %v832_v18 = vunpack.c.l.bf16 %v968_v6  ;;  %v833_v19 = vunpack.c.h.bf16 %v968_v6  ;;  %v351_v20 = vmul.f32 %v824_v12, %v1021_v1  ;;  %v352_v21 = vmul.f32 %v825_v13, %v1021_v1 }
  0x3b   :  { %v353_v22 = vmul.f32 %v828_v14, %v1021_v1  ;;  %v354_v23 = vmul.f32 %v829_v15, %v1021_v1  ;;  %v484_v25 = vadd.f32 %v1035_v7, %v349_v16  ;;  %v485_v26 = vadd.f32 %v1035_v7, %v350_v17 }
  0x3c   :  { %v355_v27 = vmul.f32 %v832_v18, %v1021_v1  ;;  %v356_v28 = vmul.f32 %v833_v19, %v1021_v1  ;;  %v486_v31 = vadd.f32 %v1035_v7, %v351_v20  ;;  %v487_v32 = vadd.f32 %v1035_v7, %v352_v21  ;;  %v977_v18 = vld [vmem:[%s1831_s0 + $0x180] sm:$0xff]  }
  0x3d   :  { %v488_v33 = vadd.f32 %v1035_v7, %v353_v22  ;;  %v489_v34 = vadd.f32 %v1035_v7, %v354_v23  ;;  %612 = vst [vmem:[%s1834_s3 + $0x240] sm:$0xff] %v484_v25  ;;  %613 = vst [vmem:[%s1834_s3 + $0x248] sm:$0xff] %v485_v26  ;;  %v836_v38 = vunpack.c.l.bf16 %v969_v24  ;;  %v837_v39 = vunpack.c.h.bf16 %v969_v24  ;;  %v978_v23 = vld [vmem:[%s1831_s0 + $0x188] sm:$0xff]   ;;  %v979_v24 = vld [vmem:[%s1831_s0 + $0x190] sm:$0xff]  }
  0x3e   :  { %v490_v36 = vadd.f32 %v1035_v7, %v355_v27  ;;  %v491_v37 = vadd.f32 %v1035_v7, %v356_v28  ;;  %614 = vst [vmem:[%s1834_s3 + $0x250] sm:$0xff] %v486_v31  ;;  %615 = vst [vmem:[%s1834_s3 + $0x258] sm:$0xff] %v487_v32  ;;  %v840_v40 = vunpack.c.l.bf16 %v970_v29  ;;  %v841_v41 = vunpack.c.h.bf16 %v970_v29  ;;  %v980_v29 = vld [vmem:[%s1831_s0 + $0x198] sm:$0xff]  }
  0x3f   :  { %616 = vst [vmem:[%s1834_s3 + $0x260] sm:$0xff] %v488_v33  ;;  %617 = vst [vmem:[%s1834_s3 + $0x268] sm:$0xff] %v489_v34  ;;  %v844_v42 = vunpack.c.l.bf16 %v971_v30  ;;  %v845_v43 = vunpack.c.h.bf16 %v971_v30  ;;  %v357_v44 = vmul.f32 %v836_v38, %v1021_v1  ;;  %v358_v45 = vmul.f32 %v837_v39, %v1021_v1 }
  0x40   :  { %618 = vst [vmem:[%s1834_s3 + $0x270] sm:$0xff] %v490_v36  ;;  %619 = vst [vmem:[%s1834_s3 + $0x278] sm:$0xff] %v491_v37  ;;  %v848_v46 = vunpack.c.l.bf16 %v972_v35  ;;  %v849_v47 = vunpack.c.h.bf16 %v972_v35  ;;  %v359_v48 = vmul.f32 %v840_v40, %v1021_v1  ;;  %v360_v49 = vmul.f32 %v841_v41, %v1021_v1 }
  0x41   :  { %v361_v50 = vmul.f32 %v844_v42, %v1021_v1  ;;  %v362_v51 = vmul.f32 %v845_v43, %v1021_v1  ;;  %v492_v53 = vadd.f32 %v1035_v7, %v357_v44  ;;  %v493_v54 = vadd.f32 %v1035_v7, %v358_v45 }
  0x42   :  { %v363_v55 = vmul.f32 %v848_v46, %v1021_v1  ;;  %v364_v56 = vmul.f32 %v849_v47, %v1021_v1  ;;  %v494_v59 = vadd.f32 %v1035_v7, %v359_v48  ;;  %v495_v60 = vadd.f32 %v1035_v7, %v360_v49  ;;  %v981_v46 = vld [vmem:[%s1831_s0 + $0x1a0] sm:$0xff]  }
  0x43   :  { %v496_v61 = vadd.f32 %v1035_v7, %v361_v50  ;;  %v497_v62 = vadd.f32 %v1035_v7, %v362_v51  ;;  %620 = vst [vmem:[%s1834_s3 + $0x280] sm:$0xff] %v492_v53  ;;  %621 = vst [vmem:[%s1834_s3 + $0x288] sm:$0xff] %v493_v54  ;;  %v852_v3 = vunpack.c.l.bf16 %v973_v52  ;;  %v853_v4 = vunpack.c.h.bf16 %v973_v52  ;;  %v982_v51 = vld [vmem:[%s1831_s0 + $0x1a8] sm:$0xff]   ;;  %v983_v52 = vld [vmem:[%s1831_s0 + $0x1b0] sm:$0xff]  }
  0x44   :  { %v498_v0 = vadd.f32 %v1035_v7, %v363_v55  ;;  %v499_v2 = vadd.f32 %v1035_v7, %v364_v56  ;;  %622 = vst [vmem:[%s1834_s3 + $0x290] sm:$0xff] %v494_v59  ;;  %623 = vst [vmem:[%s1834_s3 + $0x298] sm:$0xff] %v495_v60  ;;  %v856_v5 = vunpack.c.l.bf16 %v974_v57  ;;  %v857_v6 = vunpack.c.h.bf16 %v974_v57  ;;  %v984_v57 = vld [vmem:[%s1831_s0 + $0x1b8] sm:$0xff]  }
  0x45   :  { %624 = vst [vmem:[%s1834_s3 + $0x2a0] sm:$0xff] %v496_v61  ;;  %625 = vst [vmem:[%s1834_s3 + $0x2a8] sm:$0xff] %v497_v62  ;;  %v860_v8 = vunpack.c.l.bf16 %v975_v58  ;;  %v861_v9 = vunpack.c.h.bf16 %v975_v58  ;;  %v365_v10 = vmul.f32 %v852_v3, %v1021_v1  ;;  %v366_v11 = vmul.f32 %v853_v4, %v1021_v1 }
  0x46   :  { %626 = vst [vmem:[%s1834_s3 + $0x2b0] sm:$0xff] %v498_v0  ;;  %627 = vst [vmem:[%s1834_s3 + $0x2b8] sm:$0xff] %v499_v2  ;;  %v864_v12 = vunpack.c.l.bf16 %v976_v63  ;;  %v865_v13 = vunpack.c.h.bf16 %v976_v63  ;;  %v367_v14 = vmul.f32 %v856_v5, %v1021_v1  ;;  %v368_v15 = vmul.f32 %v857_v6, %v1021_v1 }
  0x47   :  { %v369_v16 = vmul.f32 %v860_v8, %v1021_v1  ;;  %v370_v17 = vmul.f32 %v861_v9, %v1021_v1  ;;  %v500_v19 = vadd.f32 %v1035_v7, %v365_v10  ;;  %v501_v20 = vadd.f32 %v1035_v7, %v366_v11 }
  0x48   :  { %v371_v21 = vmul.f32 %v864_v12, %v1021_v1  ;;  %v372_v22 = vmul.f32 %v865_v13, %v1021_v1  ;;  %v502_v25 = vadd.f32 %v1035_v7, %v367_v14  ;;  %v503_v26 = vadd.f32 %v1035_v7, %v368_v15  ;;  %v985_v12 = vld [vmem:[%s1831_s0 + $0x1c0] sm:$0xff]  }
  0x49   :  { %v504_v27 = vadd.f32 %v1035_v7, %v369_v16  ;;  %v505_v28 = vadd.f32 %v1035_v7, %v370_v17  ;;  %628 = vst [vmem:[%s1834_s3 + $0x2c0] sm:$0xff] %v500_v19  ;;  %629 = vst [vmem:[%s1834_s3 + $0x2c8] sm:$0xff] %v501_v20  ;;  %v868_v32 = vunpack.c.l.bf16 %v977_v18  ;;  %v869_v33 = vunpack.c.h.bf16 %v977_v18  ;;  %v986_v17 = vld [vmem:[%s1831_s0 + $0x1c8] sm:$0xff]   ;;  %v987_v18 = vld [vmem:[%s1831_s0 + $0x1d0] sm:$0xff]  }
  0x4a   :  { %v506_v30 = vadd.f32 %v1035_v7, %v371_v21  ;;  %v507_v31 = vadd.f32 %v1035_v7, %v372_v22  ;;  %630 = vst [vmem:[%s1834_s3 + $0x2d0] sm:$0xff] %v502_v25  ;;  %631 = vst [vmem:[%s1834_s3 + $0x2d8] sm:$0xff] %v503_v26  ;;  %v872_v34 = vunpack.c.l.bf16 %v978_v23  ;;  %v873_v35 = vunpack.c.h.bf16 %v978_v23 }
  0x4b   :  { %632 = vst [vmem:[%s1834_s3 + $0x2e0] sm:$0xff] %v504_v27  ;;  %633 = vst [vmem:[%s1834_s3 + $0x2e8] sm:$0xff] %v505_v28  ;;  %v876_v36 = vunpack.c.l.bf16 %v979_v24  ;;  %v877_v37 = vunpack.c.h.bf16 %v979_v24  ;;  %v373_v38 = vmul.f32 %v868_v32, %v1021_v1  ;;  %v374_v39 = vmul.f32 %v869_v33, %v1021_v1 }
  0x4c   :  { %634 = vst [vmem:[%s1834_s3 + $0x2f0] sm:$0xff] %v506_v30  ;;  %635 = vst [vmem:[%s1834_s3 + $0x2f8] sm:$0xff] %v507_v31  ;;  %v880_v40 = vunpack.c.l.bf16 %v980_v29  ;;  %v881_v41 = vunpack.c.h.bf16 %v980_v29  ;;  %v375_v42 = vmul.f32 %v872_v34, %v1021_v1  ;;  %v376_v43 = vmul.f32 %v873_v35, %v1021_v1  ;;  %v993_v30 = vld [vmem:[%s1832_s1] ss:$0 sm:$0xff] }
  0x4d   :  { %v377_v44 = vmul.f32 %v876_v36, %v1021_v1  ;;  %v378_v45 = vmul.f32 %v877_v37, %v1021_v1  ;;  %v508_v47 = vadd.f32 %v1035_v7, %v373_v38  ;;  %v509_v48 = vadd.f32 %v1035_v7, %v374_v39  ;;  %v989_v39 = vld [vmem:[%s1831_s0 + $0x1e0] sm:$0xff]  }
  0x4e   :  { %v379_v49 = vmul.f32 %v880_v40, %v1021_v1  ;;  %v380_v50 = vmul.f32 %v881_v41, %v1021_v1  ;;  %v510_v53 = vadd.f32 %v1035_v7, %v375_v42  ;;  %v511_v54 = vadd.f32 %v1035_v7, %v376_v43  ;;  %v994_v40 = vld [vmem:[%s1833_s2] ss:$0 sm:$0xff] }
  0x4f   :  { %v512_v55 = vadd.f32 %v1035_v7, %v377_v44  ;;  %v513_v56 = vadd.f32 %v1035_v7, %v378_v45  ;;  %636 = vst [vmem:[%s1834_s3 + $0x300] sm:$0xff] %v508_v47  ;;  %637 = vst [vmem:[%s1834_s3 + $0x308] sm:$0xff] %v509_v48  ;;  %v884_v60 = vunpack.c.l.bf16 %v981_v46  ;;  %v885_v61 = vunpack.c.h.bf16 %v981_v46  ;;  %v990_v45 = vld [vmem:[%s1831_s0 + $0x1e8] sm:$0xff]   ;;  %v991_v46 = vld [vmem:[%s1831_s0 + $0x1f0] sm:$0xff]  }
  0x50   :  { %v514_v58 = vadd.f32 %v1035_v7, %v379_v49  ;;  %v515_v59 = vadd.f32 %v1035_v7, %v380_v50  ;;  %638 = vst [vmem:[%s1834_s3 + $0x310] sm:$0xff] %v510_v53  ;;  %639 = vst [vmem:[%s1834_s3 + $0x318] sm:$0xff] %v511_v54  ;;  %v888_v62 = vunpack.c.l.bf16 %v982_v51  ;;  %v889_v63 = vunpack.c.h.bf16 %v982_v51  ;;  %v992_v51 = vld [vmem:[%s1831_s0 + $0x1f8] sm:$0xff]  }
  0x51   :  { %640 = vst [vmem:[%s1834_s3 + $0x320] sm:$0xff] %v512_v55  ;;  %641 = vst [vmem:[%s1834_s3 + $0x328] sm:$0xff] %v513_v56  ;;  %v892_v0 = vunpack.c.l.bf16 %v983_v52  ;;  %v893_v2 = vunpack.c.h.bf16 %v983_v52  ;;  %v381_v3 = vmul.f32 %v884_v60, %v1021_v1  ;;  %v382_v4 = vmul.f32 %v885_v61, %v1021_v1 }
  0x52   :  { %642 = vst [vmem:[%s1834_s3 + $0x330] sm:$0xff] %v514_v58  ;;  %643 = vst [vmem:[%s1834_s3 + $0x338] sm:$0xff] %v515_v59  ;;  %v896_v5 = vunpack.c.l.bf16 %v984_v57  ;;  %v897_v6 = vunpack.c.h.bf16 %v984_v57  ;;  %v383_v8 = vmul.f32 %v888_v62, %v1021_v1  ;;  %v384_v9 = vmul.f32 %v889_v63, %v1021_v1 }
  0x53   :  { %v385_v10 = vmul.f32 %v892_v0, %v1021_v1  ;;  %v386_v11 = vmul.f32 %v893_v2, %v1021_v1  ;;  %v516_v13 = vadd.f32 %v1035_v7, %v381_v3  ;;  %v517_v14 = vadd.f32 %v1035_v7, %v382_v4 }
  0x54   :  { %v387_v15 = vmul.f32 %v896_v5, %v1021_v1  ;;  %v388_v16 = vmul.f32 %v897_v6, %v1021_v1  ;;  %v518_v19 = vadd.f32 %v1035_v7, %v383_v8  ;;  %v519_v20 = vadd.f32 %v1035_v7, %v384_v9  ;;  %v988_v1 = vld [vmem:[%s1831_s0 + $0x1d8] sm:$0xff]  }
  0x55   :  { %v520_v21 = vadd.f32 %v1035_v7, %v385_v10  ;;  %v521_v22 = vadd.f32 %v1035_v7, %v386_v11  ;;  %644 = vst [vmem:[%s1834_s3 + $0x340] sm:$0xff] %v516_v13  ;;  %645 = vst [vmem:[%s1834_s3 + $0x348] sm:$0xff] %v517_v14  ;;  %v900_v25 = vunpack.c.l.bf16 %v985_v12  ;;  %v901_v26 = vunpack.c.h.bf16 %v985_v12 }
  0x56   :  { %v522_v23 = vadd.f32 %v1035_v7, %v387_v15  ;;  %v523_v24 = vadd.f32 %v1035_v7, %v388_v16  ;;  %646 = vst [vmem:[%s1834_s3 + $0x350] sm:$0xff] %v518_v19  ;;  %647 = vst [vmem:[%s1834_s3 + $0x358] sm:$0xff] %v519_v20  ;;  %v904_v27 = vunpack.c.l.bf16 %v986_v17  ;;  %v905_v7 = vunpack.c.h.bf16 %v986_v17 }
  0x57   :  { %648 = vst [vmem:[%s1834_s3 + $0x360] sm:$0xff] %v520_v21  ;;  %649 = vst [vmem:[%s1834_s3 + $0x368] sm:$0xff] %v521_v22  ;;  %v908_v28 = vunpack.c.l.bf16 %v987_v18  ;;  %v909_v29 = vunpack.c.h.bf16 %v987_v18  ;;  %v389_v31 = vmul.f32 %v993_v30, %v900_v25  ;;  %v390_v32 = vmul.f32 %v993_v30, %v901_v26 }
  0x58   :  { %650 = vst [vmem:[%s1834_s3 + $0x370] sm:$0xff] %v522_v23  ;;  %651 = vst [vmem:[%s1834_s3 + $0x378] sm:$0xff] %v523_v24  ;;  %v912_v33 = vunpack.c.l.bf16 %v988_v1  ;;  %v913_v34 = vunpack.c.h.bf16 %v988_v1  ;;  %v391_v35 = vmul.f32 %v993_v30, %v904_v27  ;;  %v392_v36 = vmul.f32 %v993_v30, %v905_v7 }
  0x59   :  { %v393_v37 = vmul.f32 %v993_v30, %v908_v28  ;;  %v394_v38 = vmul.f32 %v993_v30, %v909_v29  ;;  %v524_v41 = vadd.f32 %v994_v40, %v389_v31  ;;  %v525_v42 = vadd.f32 %v994_v40, %v390_v32 }
  0x5a   :  { %v395_v43 = vmul.f32 %v993_v30, %v912_v33  ;;  %v396_v44 = vmul.f32 %v993_v30, %v913_v34  ;;  %v526_v47 = vadd.f32 %v994_v40, %v391_v35  ;;  %v527_v48 = vadd.f32 %v994_v40, %v392_v36 }
  0x5b   :  { %v528_v49 = vadd.f32 %v994_v40, %v393_v37  ;;  %v529_v50 = vadd.f32 %v994_v40, %v394_v38  ;;  %652 = vst [vmem:[%s1834_s3 + $0x380] sm:$0xff] %v524_v41  ;;  %653 = vst [vmem:[%s1834_s3 + $0x388] sm:$0xff] %v525_v42  ;;  %v916_v54 = vunpack.c.l.bf16 %v989_v39  ;;  %v917_v55 = vunpack.c.h.bf16 %v989_v39 }
  0x5c   :  { %v530_v52 = vadd.f32 %v994_v40, %v395_v43  ;;  %v531_v53 = vadd.f32 %v994_v40, %v396_v44  ;;  %654 = vst [vmem:[%s1834_s3 + $0x390] sm:$0xff] %v526_v47  ;;  %655 = vst [vmem:[%s1834_s3 + $0x398] sm:$0xff] %v527_v48  ;;  %v920_v56 = vunpack.c.l.bf16 %v990_v45  ;;  %v921_v57 = vunpack.c.h.bf16 %v990_v45 }
  0x5d   :  { %656 = vst [vmem:[%s1834_s3 + $0x3a0] sm:$0xff] %v528_v49  ;;  %657 = vst [vmem:[%s1834_s3 + $0x3a8] sm:$0xff] %v529_v50  ;;  %v924_v58 = vunpack.c.l.bf16 %v991_v46  ;;  %v925_v59 = vunpack.c.h.bf16 %v991_v46  ;;  %v397_v60 = vmul.f32 %v993_v30, %v916_v54  ;;  %v398_v61 = vmul.f32 %v993_v30, %v917_v55 }
  0x5e   :  { %658 = vst [vmem:[%s1834_s3 + $0x3b0] sm:$0xff] %v530_v52  ;;  %659 = vst [vmem:[%s1834_s3 + $0x3b8] sm:$0xff] %v531_v53  ;;  %v928_v62 = vunpack.c.l.bf16 %v992_v51  ;;  %v929_v63 = vunpack.c.h.bf16 %v992_v51  ;;  %v399_v0 = vmul.f32 %v993_v30, %v920_v56  ;;  %v400_v2 = vmul.f32 %v993_v30, %v921_v57 }
  0x5f   :  { %v401_v3 = vmul.f32 %v993_v30, %v924_v58  ;;  %v402_v4 = vmul.f32 %v993_v30, %v925_v59  ;;  %v532_v5 = vadd.f32 %v994_v40, %v397_v60  ;;  %v533_v6 = vadd.f32 %v994_v40, %v398_v61 }
  0x60   :  { %v403_v8 = vmul.f32 %v993_v30, %v928_v62  ;;  %v404_v9 = vmul.f32 %v993_v30, %v929_v63  ;;  %v534_v10 = vadd.f32 %v994_v40, %v399_v0  ;;  %v535_v11 = vadd.f32 %v994_v40, %v400_v2 }
  0x61   :  { %v536_v12 = vadd.f32 %v994_v40, %v401_v3  ;;  %v537_v13 = vadd.f32 %v994_v40, %v402_v4  ;;  %660 = vst [vmem:[%s1834_s3 + $0x3c0] sm:$0xff] %v532_v5  ;;  %661 = vst [vmem:[%s1834_s3 + $0x3c8] sm:$0xff] %v533_v6 }
  0x62   :  { %v538_v14 = vadd.f32 %v994_v40, %v403_v8  ;;  %v539_v15 = vadd.f32 %v994_v40, %v404_v9  ;;  %662 = vst [vmem:[%s1834_s3 + $0x3d0] sm:$0xff] %v534_v10  ;;  %663 = vst [vmem:[%s1834_s3 + $0x3d8] sm:$0xff] %v535_v11 }
  0x63   :  { %664 = vst [vmem:[%s1834_s3 + $0x3e0] sm:$0xff] %v536_v12  ;;  %665 = vst [vmem:[%s1834_s3 + $0x3e8] sm:$0xff] %v537_v13 }
  0x64   :  { %666 = vst [vmem:[%s1834_s3 + $0x3f0] sm:$0xff] %v538_v14  ;;  %667 = vst [vmem:[%s1834_s3 + $0x3f8] sm:$0xff] %v539_v15 }

</bundles_post_ra>
